<compile_context>
chip_gen: v7x
topology: tpu7x:2x2x1
jax: 0.10.0
libtpu: 0.0.40
codegen_flags: <defaults>
</compile_context>

<pallas_src>
import math

import jax
import jax.numpy as jnp
from jax.experimental import pallas as pl
from jax.experimental.pallas import tpu as pltpu


def _round_up(x, m):
    return ((x + m - 1) // m) * m


# ----------------------- conv (+ fused BN statistics) kernel ----------------------
def _make_conv_kernel(kh, kw, stride, ho, wo, wph, phase_index, nph, cout):
    """One grid step = one batch item; all KH*KW taps unrolled in-kernel."""
    m2 = ho * wph  # output rows incl. junk columns wo in [Wo, Wph)

    def kernel(*refs):
        phase_refs = refs[:nph]                       # (1, Lph, Cin) bf16 each
        w_ref = refs[nph]                             # (KH, KW, Cin, Cout) bf16
        o_ref, ssum_ref, ssq_ref = refs[nph + 1], refs[nph + 2], refs[nph + 3]

        pvals = [phase_refs[i][0] for i in range(nph)]   # (Lph, Cin) bf16 values
        acc = jnp.zeros((m2, cout), jnp.float32)
        for ki in range(kh):                              # static, unrolled
            pr, qi = ki % stride, ki // stride
            for kj in range(kw):
                pc, qj = kj % stride, kj // stride
                start = qi * wph + qj                     # static offset
                lhs = pvals[phase_index[(pr, pc)]][start:start + m2, :]
                acc = acc + jnp.dot(lhs, w_ref[ki, kj],
                                    preferred_element_type=jnp.float32)
        o_ref[0] = acc

        # fused BN pass 1: per-channel sum / sum-of-squares over valid columns only
        if wph == wo:
            valid = acc
        else:
            col = jax.lax.broadcasted_iota(jnp.int32, (m2, 1), 0) % wph
            valid = jnp.where(col < wo, acc, 0.0)
        ssum_ref[0] = jnp.sum(valid, axis=0, keepdims=True)
        ssq_ref[0] = jnp.sum(valid * valid, axis=0, keepdims=True)

    return kernel


def conv2d_bn_stats(x_nhwc, w, stride, pad):
    """2-D cross-correlation (no bias) + per-channel sum / sumsq of the output.

    x_nhwc: (N,H,W,Cin) bf16.  w: (KH,KW,Cin,Cout) bf16.
    Returns (conv f32 (N,Ho,Wo,Cout), ssum f32 (N,1,Cout), ssq f32 (N,1,Cout)).
    """
    n, h, wd, cin = x_nhwc.shape
    kh, kw, cin_w, cout = w.shape
    assert cin_w == cin
    s = stride
    ho = (h + 2 * pad - kh) // s + 1
    wo = (wd + 2 * pad - kw) // s + 1

    xp = jnp.pad(x_nhwc, ((0, 0), (pad, pad), (pad, pad), (0, 0)))
    wp = wd + 2 * pad
    if wp % s:                                   # equalize column-phase widths
        xp = jnp.pad(xp, ((0, 0), (0, 0), (0, s - wp % s), (0, 0)))
        wp += s - wp % s
    wph = wp // s
    m2 = ho * wph

    # (row-phase, col-phase) pairs actually touched by the taps
    phase_index, used = {}, []
    for ki in range(kh):
        for kj in range(kw):
            key = (ki % s, kj % s)
            if key not in phase_index:
                phase_index[key] = len(used)
                used.append(key)

    # row-flattened phases; pad so every static tap slice is in range
    need = ((kh - 1) // s) * wph + ((kw - 1) // s) + m2
    raw = [xp[:, pr::s, pc::s, :].reshape(n, -1, cin) for pr, pc in used]
    lmax = _round_up(max([need] + [r.shape[1] for r in raw]), 8)
    phases = [r if r.shape[1] == lmax
              else jnp.pad(r, ((0, 0), (0, lmax - r.shape[1]), (0, 0)))
              for r in raw]

    in_specs = [pl.BlockSpec((1, lmax, cin), lambda i: (i, 0, 0)) for _ in phases]
    in_specs.append(pl.BlockSpec((kh, kw, cin, cout), lambda i: (0, 0, 0, 0)))

    conv_flat, ssum, ssq = pl.pallas_call(
        _make_conv_kernel(kh, kw, s, ho, wo, wph, phase_index, len(phases), cout),
        out_shape=(jax.ShapeDtypeStruct((n, m2, cout), jnp.float32),
                   jax.ShapeDtypeStruct((n, 1, cout), jnp.float32),
                   jax.ShapeDtypeStruct((n, 1, cout), jnp.float32)),
        grid=(n,),
        in_specs=in_specs,
        out_specs=(pl.BlockSpec((1, m2, cout), lambda i: (i, 0, 0)),
                   pl.BlockSpec((1, 1, cout), lambda i: (i, 0, 0)),
                   pl.BlockSpec((1, 1, cout), lambda i: (i, 0, 0))),
        compiler_params=pltpu.CompilerParams(dimension_semantics=("parallel",)),
    )(*phases, w)

    out = conv_flat.reshape(n, ho, wph, cout)[:, :, :wo, :]   # drop junk columns
    return out, ssum, ssq


# --------------- BN apply (scale/shift from fused stats) + residual + ReLU --------
def _make_bn_apply_kernel(inv_m, eps, add_res, relu):
    def kernel(*refs):
        if add_res:
            x_ref, ssum_ref, ssq_ref, g_ref, b_ref, r_ref, o_ref = refs
        else:
            x_ref, ssum_ref, ssq_ref, g_ref, b_ref, o_ref = refs
            r_ref = None
        ssum = jnp.sum(ssum_ref[...], axis=0)            # reduce (N,1,C) -> (1,C)
        ssq = jnp.sum(ssq_ref[...], axis=0)
        mean = ssum * inv_m
        var = ssq * inv_m - mean * mean                  # biased variance (training BN)
        scale = g_ref[...] * jax.lax.rsqrt(var + eps)
        shift = b_ref[...] - mean * scale
        y = x_ref[0] * scale + shift
        if add_res:
            y = y + r_ref[0].astype(jnp.float32)
        if relu:
            y = jnp.maximum(y, 0.0)
        o_ref[0] = y.astype(o_ref.dtype)                 # emit bf16 directly
    return kernel


def batchnorm_apply(x, ssum, ssq, gamma, beta, residual=None, relu=False, eps=1e-5):
    """Training-mode BatchNorm2d from fused stats, optional +residual, optional ReLU."""
    n, h, wd, c = x.shape
    m = n * h * wd
    add_res = residual is not None

    inputs = [x.reshape(n, h * wd, c), ssum, ssq, gamma, beta]
    in_specs = [pl.BlockSpec((1, h * wd, c), lambda i: (i, 0, 0)),
                pl.BlockSpec((n, 1, c), lambda i: (0, 0, 0)),
                pl.BlockSpec((n, 1, c), lambda i: (0, 0, 0)),
                pl.BlockSpec((1, c), lambda i: (0, 0)),
                pl.BlockSpec((1, c), lambda i: (0, 0))]
    if add_res:
        inputs.append(residual.reshape(n, h * wd, c))
        in_specs.append(pl.BlockSpec((1, h * wd, c), lambda i: (i, 0, 0)))

    out = pl.pallas_call(
        _make_bn_apply_kernel(1.0 / m, eps, add_res, relu),
        out_shape=jax.ShapeDtypeStruct((n, h * wd, c), jnp.bfloat16),
        grid=(n,),
        in_specs=in_specs,
        out_specs=pl.BlockSpec((1, h * wd, c), lambda i: (i, 0, 0)),
        compiler_params=pltpu.CompilerParams(dimension_semantics=("parallel",)),
    )(*inputs)
    return out.reshape(n, h, wd, c)


# ------------------------------- BasicBlock forward -------------------------------
def basic_block_forward(p, x_nhwc):
    """out = relu(bn2(conv2(relu(bn1(conv1(x))))) + downsample(x)).  x: bf16 NHWC."""
    stride = p['stride']
    out, s1, q1 = conv2d_bn_stats(x_nhwc, p['conv1_w'], stride, pad=1)
    out = batchnorm_apply(out, s1, q1, *p['bn1'], relu=True)            # bf16
    out, s2, q2 = conv2d_bn_stats(out, p['conv2_w'], 1, pad=1)
    if 'down_conv_w' in p:
        r, sd, qd = conv2d_bn_stats(x_nhwc, p['down_conv_w'], stride, pad=0)
        res = batchnorm_apply(r, sd, qd, *p['down_bn'], relu=False)     # bf16
    else:
        res = x_nhwc
    return batchnorm_apply(out, s2, q2, *p['bn2'], residual=res, relu=True)


def make_block_params(key, in_planes, out_planes, stride):
    ks = jax.random.split(key, 8)

    def conv_w(k, cin, cout, ksz):
        fan = ksz * ksz * cout
        w = jax.random.normal(k, (cout, cin, ksz, ksz), jnp.float32) * math.sqrt(2.0 / fan)
        # PyTorch (Cout,Cin,KH,KW) -> (KH,KW,Cin,Cout), cast to bf16 once for the MXU.
        return jnp.transpose(w, (2, 3, 1, 0)).astype(jnp.bfloat16)

    def bn_p(kg, kb, c):
        g = 1.0 + 0.1 * jax.random.normal(kg, (1, c), jnp.float32)
        b = 0.1 * jax.random.normal(kb, (1, c), jnp.float32)
        return (g, b)

    p = {'stride': stride,
         'conv1_w': conv_w(ks[0], in_planes, out_planes, 3),
         'bn1': bn_p(ks[1], ks[2], out_planes),
         'conv2_w': conv_w(ks[3], out_planes, out_planes, 3),
         'bn2': bn_p(ks[4], ks[5], out_planes)}
    if stride != 1 or in_planes != out_planes:
        p['down_conv_w'] = conv_w(ks[6], in_planes, out_planes, 1)
        p['down_bn'] = bn_p(*jax.random.split(ks[7]), out_planes)
    return p


# --------------------------- pure-JAX reference (for checking) --------------------
def _ref_block(p, x):
    def conv(xx, w, stride, pad):
        return jax.lax.conv_general_dilated(
            xx, w.astype(jnp.float32), (stride, stride),
            [(pad, pad), (pad, pad)],
            dimension_numbers=("NHWC", "HWIO", "NHWC"))

    def bn(y, gb, res=None, relu=False):
        g, b = gb
        m = jnp.mean(y, axis=(0, 1, 2), keepdims=True)
        v = jnp.mean(y * y, axis=(0, 1, 2), keepdims=True) - m * m
        out = (y - m) * jax.lax.rsqrt(v + 1e-5) * g.reshape(1, 1, 1, -1) + b.reshape(1, 1, 1, -1)
        if res is not None:
            out = out + res
        if relu:
            out = jnp.maximum(out, 0.0)
        return out.astype(jnp.bfloat16).astype(jnp.float32)   # kernels emit bf16

    out = bn(conv(x, p['conv1_w'], p['stride'], 1), p['bn1'], relu=True)
    out = conv(out, p['conv2_w'], 1, 1)
    if 'down_conv_w' in p:
        res = bn(conv(x, p['down_conv_w'], p['stride'], 0), p['down_bn'])
    else:
        res = x
    return bn(out, p['bn2'], res=res, relu=True)


# --------------------------------------- main --------------------------------------
if __name__ == "__main__":
    key = jax.random.PRNGKey(0)
    kp1, kp2, kx = jax.random.split(key, 3)

    # Block 1: 32 -> 64 channels, stride 2, with downsample (1x1 conv stride 2 + BN)
    blk1 = make_block_params(kp1, 32, 64, stride=2)
    # Block 2: 64 -> 64 channels, stride 1, identity shortcut
    blk2 = make_block_params(kp2, 64, 64, stride=1)

    x_nchw = jax.random.normal(kx, (2, 32, 16, 16), jnp.float32)
    x = jnp.transpose(x_nchw, (0, 2, 3, 1)).astype(jnp.bfloat16)   # NCHW->NHWC, bf16 once

    fwd = jax.jit(lambda xx: basic_block_forward(blk2, basic_block_forward(blk1, xx)))
    y = jax.block_until_ready(fwd(x))

    assert y.shape == (2, 8, 8, 64), y.shape
    y32 = y.astype(jnp.float32)
    assert bool(jnp.all(jnp.isfinite(y32)))
    assert bool(jnp.all(y32 >= 0.0))                               # final ReLU

    y_ref = _ref_block(blk2, _ref_block(blk1, x.astype(jnp.float32)))
    err = float(jnp.max(jnp.abs(y32 - y_ref)))
    assert err < 5e-2, f"max abs err {err}"

    print("KERNEL_OK")
</pallas_src>

<mosaic_0001>
module attributes {stable_mosaic.version = 11 : i64} {
  func.func @kernel(%arg0: i32, %arg1: memref<1x88x32xbf16, #tpu.memory_space<vmem>>, %arg2: memref<1x88x32xbf16, #tpu.memory_space<vmem>>, %arg3: memref<1x88x32xbf16, #tpu.memory_space<vmem>>, %arg4: memref<1x88x32xbf16, #tpu.memory_space<vmem>>, %arg5: memref<3x3x32x64xbf16, #tpu.memory_space<vmem>>, %arg6: memref<1x72x64xf32, #tpu.memory_space<vmem>>, %arg7: memref<1x1x64xf32, #tpu.memory_space<vmem>>, %arg8: memref<1x1x64xf32, #tpu.memory_space<vmem>>) attributes {dimension_semantics = [#tpu.dimension_semantics<parallel>], iteration_bounds = array<i64: 2>, scalar_prefetch = 0 : i64, scratch_operands = 0 : i64, tpu.core_type = #tpu.core_type<tc>, window_params = [{transform_indices = @transform_0, window_bounds = array<i64: 1, 88, 32>}, {transform_indices = @transform_1, window_bounds = array<i64: 1, 88, 32>}, {transform_indices = @transform_2, window_bounds = array<i64: 1, 88, 32>}, {transform_indices = @transform_3, window_bounds = array<i64: 1, 88, 32>}, {pipeline_mode = #tpu.pipeline_mode<synchronous>, transform_indices = @transform_4, window_bounds = array<i64: 3, 3, 32, 64>}, {transform_indices = @transform_5, window_bounds = array<i64: 1, 72, 64>}, {transform_indices = @transform_6, window_bounds = array<i64: 1, 1, 64>}, {transform_indices = @transform_7, window_bounds = array<i64: 1, 1, 64>}]} {
    %c0 = arith.constant 0 : index
    %c0_0 = arith.constant 0 : index
    %c0_1 = arith.constant 0 : index
    %0 = vector.load %arg1[%c0, %c0_0, %c0_1] : memref<1x88x32xbf16, #tpu.memory_space<vmem>>, vector<1x88x32xbf16>
    %1 = vector.shape_cast %0 : vector<1x88x32xbf16> to vector<88x32xbf16>
    %c0_2 = arith.constant 0 : index
    %c0_3 = arith.constant 0 : index
    %c0_4 = arith.constant 0 : index
    %2 = vector.load %arg2[%c0_2, %c0_3, %c0_4] : memref<1x88x32xbf16, #tpu.memory_space<vmem>>, vector<1x88x32xbf16>
    %3 = vector.shape_cast %2 : vector<1x88x32xbf16> to vector<88x32xbf16>
    %c0_5 = arith.constant 0 : index
    %c0_6 = arith.constant 0 : index
    %c0_7 = arith.constant 0 : index
    %4 = vector.load %arg3[%c0_5, %c0_6, %c0_7] : memref<1x88x32xbf16, #tpu.memory_space<vmem>>, vector<1x88x32xbf16>
    %5 = vector.shape_cast %4 : vector<1x88x32xbf16> to vector<88x32xbf16>
    %c0_8 = arith.constant 0 : index
    %c0_9 = arith.constant 0 : index
    %c0_10 = arith.constant 0 : index
    %6 = vector.load %arg4[%c0_8, %c0_9, %c0_10] : memref<1x88x32xbf16, #tpu.memory_space<vmem>>, vector<1x88x32xbf16>
    %7 = vector.shape_cast %6 : vector<1x88x32xbf16> to vector<88x32xbf16>
    %cst = arith.constant 0.000000e+00 : f32
    %8 = vector.broadcast %cst : f32 to vector<72x64xf32>
    %9 = vector.extract_strided_slice %1 {offsets = [0, 0], sizes = [72, 32], strides = [1, 1]} : vector<88x32xbf16> to vector<72x32xbf16>
    %c0_11 = arith.constant 0 : index
    %c0_12 = arith.constant 0 : index
    %c0_13 = arith.constant 0 : index
    %c0_14 = arith.constant 0 : index
    %10 = vector.load %arg5[%c0_11, %c0_12, %c0_13, %c0_14] : memref<3x3x32x64xbf16, #tpu.memory_space<vmem>>, vector<1x1x32x64xbf16>
    %11 = vector.shape_cast %10 : vector<1x1x32x64xbf16> to vector<32x64xbf16>
    %cst_15 = arith.constant dense<0.000000e+00> : vector<72x64xf32>
    %12 = tpu.matmul %9, %11, %cst_15 {dimension_numbers = #tpu.dot_dimension_numbers<[1], [0], [0], [1], [0, 0, 1, 1], [], []>} : vector<72x32xbf16>, vector<32x64xbf16>, vector<72x64xf32> -> vector<72x64xf32>
    %13 = arith.addf %8, %12 : vector<72x64xf32>
    %14 = vector.extract_strided_slice %3 {offsets = [0, 0], sizes = [72, 32], strides = [1, 1]} : vector<88x32xbf16> to vector<72x32xbf16>
    %c0_16 = arith.constant 0 : index
    %c1 = arith.constant 1 : index
    %c0_17 = arith.constant 0 : index
    %c0_18 = arith.constant 0 : index
    %15 = vector.load %arg5[%c0_16, %c1, %c0_17, %c0_18] : memref<3x3x32x64xbf16, #tpu.memory_space<vmem>>, vector<1x1x32x64xbf16>
    %16 = vector.shape_cast %15 : vector<1x1x32x64xbf16> to vector<32x64xbf16>
    %cst_19 = arith.constant dense<0.000000e+00> : vector<72x64xf32>
    %17 = tpu.matmul %14, %16, %cst_19 {dimension_numbers = #tpu.dot_dimension_numbers<[1], [0], [0], [1], [0, 0, 1, 1], [], []>} : vector<72x32xbf16>, vector<32x64xbf16>, vector<72x64xf32> -> vector<72x64xf32>
    %18 = arith.addf %13, %17 : vector<72x64xf32>
    %19 = vector.extract_strided_slice %1 {offsets = [1, 0], sizes = [72, 32], strides = [1, 1]} : vector<88x32xbf16> to vector<72x32xbf16>
    %c0_20 = arith.constant 0 : index
    %c2 = arith.constant 2 : index
    %c0_21 = arith.constant 0 : index
    %c0_22 = arith.constant 0 : index
    %20 = vector.load %arg5[%c0_20, %c2, %c0_21, %c0_22] : memref<3x3x32x64xbf16, #tpu.memory_space<vmem>>, vector<1x1x32x64xbf16>
    %21 = vector.shape_cast %20 : vector<1x1x32x64xbf16> to vector<32x64xbf16>
    %cst_23 = arith.constant dense<0.000000e+00> : vector<72x64xf32>
    %22 = tpu.matmul %19, %21, %cst_23 {dimension_numbers = #tpu.dot_dimension_numbers<[1], [0], [0], [1], [0, 0, 1, 1], [], []>} : vector<72x32xbf16>, vector<32x64xbf16>, vector<72x64xf32> -> vector<72x64xf32>
    %23 = arith.addf %18, %22 : vector<72x64xf32>
    %24 = vector.extract_strided_slice %5 {offsets = [0, 0], sizes = [72, 32], strides = [1, 1]} : vector<88x32xbf16> to vector<72x32xbf16>
    %c1_24 = arith.constant 1 : index
    %c0_25 = arith.constant 0 : index
    %c0_26 = arith.constant 0 : index
    %c0_27 = arith.constant 0 : index
    %25 = vector.load %arg5[%c1_24, %c0_25, %c0_26, %c0_27] : memref<3x3x32x64xbf16, #tpu.memory_space<vmem>>, vector<1x1x32x64xbf16>
    %26 = vector.shape_cast %25 : vector<1x1x32x64xbf16> to vector<32x64xbf16>
    %cst_28 = arith.constant dense<0.000000e+00> : vector<72x64xf32>
    %27 = tpu.matmul %24, %26, %cst_28 {dimension_numbers = #tpu.dot_dimension_numbers<[1], [0], [0], [1], [0, 0, 1, 1], [], []>} : vector<72x32xbf16>, vector<32x64xbf16>, vector<72x64xf32> -> vector<72x64xf32>
    %28 = arith.addf %23, %27 : vector<72x64xf32>
    %29 = vector.extract_strided_slice %7 {offsets = [0, 0], sizes = [72, 32], strides = [1, 1]} : vector<88x32xbf16> to vector<72x32xbf16>
    %c1_29 = arith.constant 1 : index
    %c1_30 = arith.constant 1 : index
    %c0_31 = arith.constant 0 : index
    %c0_32 = arith.constant 0 : index
    %30 = vector.load %arg5[%c1_29, %c1_30, %c0_31, %c0_32] : memref<3x3x32x64xbf16, #tpu.memory_space<vmem>>, vector<1x1x32x64xbf16>
    %31 = vector.shape_cast %30 : vector<1x1x32x64xbf16> to vector<32x64xbf16>
    %cst_33 = arith.constant dense<0.000000e+00> : vector<72x64xf32>
    %32 = tpu.matmul %29, %31, %cst_33 {dimension_numbers = #tpu.dot_dimension_numbers<[1], [0], [0], [1], [0, 0, 1, 1], [], []>} : vector<72x32xbf16>, vector<32x64xbf16>, vector<72x64xf32> -> vector<72x64xf32>
    %33 = arith.addf %28, %32 : vector<72x64xf32>
    %34 = vector.extract_strided_slice %5 {offsets = [1, 0], sizes = [72, 32], strides = [1, 1]} : vector<88x32xbf16> to vector<72x32xbf16>
    %c1_34 = arith.constant 1 : index
    %c2_35 = arith.constant 2 : index
    %c0_36 = arith.constant 0 : index
    %c0_37 = arith.constant 0 : index
    %35 = vector.load %arg5[%c1_34, %c2_35, %c0_36, %c0_37] : memref<3x3x32x64xbf16, #tpu.memory_space<vmem>>, vector<1x1x32x64xbf16>
    %36 = vector.shape_cast %35 : vector<1x1x32x64xbf16> to vector<32x64xbf16>
    %cst_38 = arith.constant dense<0.000000e+00> : vector<72x64xf32>
    %37 = tpu.matmul %34, %36, %cst_38 {dimension_numbers = #tpu.dot_dimension_numbers<[1], [0], [0], [1], [0, 0, 1, 1], [], []>} : vector<72x32xbf16>, vector<32x64xbf16>, vector<72x64xf32> -> vector<72x64xf32>
    %38 = arith.addf %33, %37 : vector<72x64xf32>
    %39 = vector.extract_strided_slice %1 {offsets = [9, 0], sizes = [72, 32], strides = [1, 1]} : vector<88x32xbf16> to vector<72x32xbf16>
    %c2_39 = arith.constant 2 : index
    %c0_40 = arith.constant 0 : index
    %c0_41 = arith.constant 0 : index
    %c0_42 = arith.constant 0 : index
    %40 = vector.load %arg5[%c2_39, %c0_40, %c0_41, %c0_42] : memref<3x3x32x64xbf16, #tpu.memory_space<vmem>>, vector<1x1x32x64xbf16>
    %41 = vector.shape_cast %40 : vector<1x1x32x64xbf16> to vector<32x64xbf16>
    %cst_43 = arith.constant dense<0.000000e+00> : vector<72x64xf32>
    %42 = tpu.matmul %39, %41, %cst_43 {dimension_numbers = #tpu.dot_dimension_numbers<[1], [0], [0], [1], [0, 0, 1, 1], [], []>} : vector<72x32xbf16>, vector<32x64xbf16>, vector<72x64xf32> -> vector<72x64xf32>
    %43 = arith.addf %38, %42 : vector<72x64xf32>
    %44 = vector.extract_strided_slice %3 {offsets = [9, 0], sizes = [72, 32], strides = [1, 1]} : vector<88x32xbf16> to vector<72x32xbf16>
    %c2_44 = arith.constant 2 : index
    %c1_45 = arith.constant 1 : index
    %c0_46 = arith.constant 0 : index
    %c0_47 = arith.constant 0 : index
    %45 = vector.load %arg5[%c2_44, %c1_45, %c0_46, %c0_47] : memref<3x3x32x64xbf16, #tpu.memory_space<vmem>>, vector<1x1x32x64xbf16>
    %46 = vector.shape_cast %45 : vector<1x1x32x64xbf16> to vector<32x64xbf16>
    %cst_48 = arith.constant dense<0.000000e+00> : vector<72x64xf32>
    %47 = tpu.matmul %44, %46, %cst_48 {dimension_numbers = #tpu.dot_dimension_numbers<[1], [0], [0], [1], [0, 0, 1, 1], [], []>} : vector<72x32xbf16>, vector<32x64xbf16>, vector<72x64xf32> -> vector<72x64xf32>
    %48 = arith.addf %43, %47 : vector<72x64xf32>
    %49 = vector.extract_strided_slice %1 {offsets = [10, 0], sizes = [72, 32], strides = [1, 1]} : vector<88x32xbf16> to vector<72x32xbf16>
    %c2_49 = arith.constant 2 : index
    %c2_50 = arith.constant 2 : index
    %c0_51 = arith.constant 0 : index
    %c0_52 = arith.constant 0 : index
    %50 = vector.load %arg5[%c2_49, %c2_50, %c0_51, %c0_52] : memref<3x3x32x64xbf16, #tpu.memory_space<vmem>>, vector<1x1x32x64xbf16>
    %51 = vector.shape_cast %50 : vector<1x1x32x64xbf16> to vector<32x64xbf16>
    %cst_53 = arith.constant dense<0.000000e+00> : vector<72x64xf32>
    %52 = tpu.matmul %49, %51, %cst_53 {dimension_numbers = #tpu.dot_dimension_numbers<[1], [0], [0], [1], [0, 0, 1, 1], [], []>} : vector<72x32xbf16>, vector<32x64xbf16>, vector<72x64xf32> -> vector<72x64xf32>
    %53 = arith.addf %48, %52 : vector<72x64xf32>
    %c0_54 = arith.constant 0 : index
    %c0_55 = arith.constant 0 : index
    %c0_56 = arith.constant 0 : index
    %54 = vector.load %arg6[%c0_54, %c0_55, %c0_56] : memref<1x72x64xf32, #tpu.memory_space<vmem>>, vector<1x72x64xf32>
    %55 = vector.shape_cast %54 : vector<1x72x64xf32> to vector<72x64xf32>
    %56 = vector.shape_cast %53 : vector<72x64xf32> to vector<1x72x64xf32>
    tpu.vector_store %arg6[%c0_54, %c0_55, %c0_56], %56 {strides = array<i32>} : memref<1x72x64xf32, #tpu.memory_space<vmem>>, vector<1x72x64xf32>,
    %57 = tpu.iota {dimensions = array<i32: 0>} : vector<72x1xi32>
    %c9_i32 = arith.constant 9 : i32
    %c0_i32 = arith.constant 0 : i32
    %58 = arith.cmpi eq, %c9_i32, %c0_i32 : i32
    %c1_i32 = arith.constant 1 : i32
    %59 = arith.select %58, %c1_i32, %c9_i32 : i32
    %60 = vector.broadcast %59 : i32 to vector<72x1xi32>
    %61 = arith.remsi %57, %60 : vector<72x1xi32>
    %c0_i32_57 = arith.constant 0 : i32
    %62 = vector.broadcast %c0_i32_57 : i32 to vector<72x1xi32>
    %63 = arith.cmpi ne, %61, %62 : vector<72x1xi32>
    %c0_i32_58 = arith.constant 0 : i32
    %64 = vector.broadcast %c0_i32_58 : i32 to vector<72x1xi32>
    %65 = arith.cmpi slt, %61, %64 : vector<72x1xi32>
    %c0_i32_59 = arith.constant 0 : i32
    %66 = arith.cmpi slt, %59, %c0_i32_59 : i32
    %67 = vector.broadcast %66 : i1 to vector<72x1xi1>
    %68 = vector.broadcast %67 : vector<72x1xi1> to vector<72x1xi1>
    %69 = arith.xori %65, %68 : vector<72x1xi1>
    %70 = arith.andi %69, %63 : vector<72x1xi1>
    %71 = vector.broadcast %59 : i32 to vector<72x1xi32>
    %72 = arith.addi %61, %71 : vector<72x1xi32>
    %73 = arith.select %70, %72, %61 : vector<72x1xi1>, vector<72x1xi32>
    %c8_i32 = arith.constant 8 : i32
    %74 = vector.broadcast %c8_i32 : i32 to vector<72x1xi32>
    %75 = arith.cmpi slt, %73, %74 : vector<72x1xi32>
    %cst_60 = arith.constant 0.000000e+00 : f32
    %76 = vector.shape_cast %75 : vector<72x1xi1> to vector<72x1xi1>
    %77 = vector.broadcast %76 : vector<72x1xi1> to vector<72x64xi1>
    %78 = vector.broadcast %cst_60 : f32 to vector<72x64xf32>
    %79 = arith.select %77, %53, %78 : vector<72x64xi1>, vector<72x64xf32>
    %cst_61 = arith.constant dense<0.000000e+00> : vector<64xf32>
    %80 = vector.multi_reduction <add>, %79, %cst_61 [0] : vector<72x64xf32> to vector<64xf32>
    %81 = vector.shape_cast %80 : vector<64xf32> to vector<1x64xf32>
    %c0_62 = arith.constant 0 : index
    %c0_63 = arith.constant 0 : index
    %c0_64 = arith.constant 0 : index
    %82 = vector.load %arg7[%c0_62, %c0_63, %c0_64] : memref<1x1x64xf32, #tpu.memory_space<vmem>>, vector<1x1x64xf32>
    %83 = vector.shape_cast %82 : vector<1x1x64xf32> to vector<1x64xf32>
    %84 = vector.shape_cast %81 : vector<1x64xf32> to vector<1x1x64xf32>
    tpu.vector_store %arg7[%c0_62, %c0_63, %c0_64], %84 {strides = array<i32>} : memref<1x1x64xf32, #tpu.memory_space<vmem>>, vector<1x1x64xf32>,
    %85 = arith.mulf %79, %79 : vector<72x64xf32>
    %cst_65 = arith.constant dense<0.000000e+00> : vector<64xf32>
    %86 = vector.multi_reduction <add>, %85, %cst_65 [0] : vector<72x64xf32> to vector<64xf32>
    %87 = vector.shape_cast %86 : vector<64xf32> to vector<1x64xf32>
    %c0_66 = arith.constant 0 : index
    %c0_67 = arith.constant 0 : index
    %c0_68 = arith.constant 0 : index
    %88 = vector.load %arg8[%c0_66, %c0_67, %c0_68] : memref<1x1x64xf32, #tpu.memory_space<vmem>>, vector<1x1x64xf32>
    %89 = vector.shape_cast %88 : vector<1x1x64xf32> to vector<1x64xf32>
    %90 = vector.shape_cast %87 : vector<1x64xf32> to vector<1x1x64xf32>
    tpu.vector_store %arg8[%c0_66, %c0_67, %c0_68], %90 {strides = array<i32>} : memref<1x1x64xf32, #tpu.memory_space<vmem>>, vector<1x1x64xf32>,
    return
  }
  func.func @transform_0(%arg0: i32) -> (i32, i32, i32) {
    %c0_i32 = arith.constant 0 : i32
    %c0_i32_0 = arith.constant 0 : i32
    %c0_i32_1 = arith.constant 0 : i32
    return %arg0, %c0_i32, %c0_i32_0 : i32, i32, i32
  }
  func.func @transform_1(%arg0: i32) -> (i32, i32, i32) {
    %c0_i32 = arith.constant 0 : i32
    %c0_i32_0 = arith.constant 0 : i32
    %c0_i32_1 = arith.constant 0 : i32
    return %arg0, %c0_i32, %c0_i32_0 : i32, i32, i32
  }
  func.func @transform_2(%arg0: i32) -> (i32, i32, i32) {
    %c0_i32 = arith.constant 0 : i32
    %c0_i32_0 = arith.constant 0 : i32
    %c0_i32_1 = arith.constant 0 : i32
    return %arg0, %c0_i32, %c0_i32_0 : i32, i32, i32
  }
  func.func @transform_3(%arg0: i32) -> (i32, i32, i32) {
    %c0_i32 = arith.constant 0 : i32
    %c0_i32_0 = arith.constant 0 : i32
    %c0_i32_1 = arith.constant 0 : i32
    return %arg0, %c0_i32, %c0_i32_0 : i32, i32, i32
  }
  func.func @transform_4(%arg0: i32) -> (i32, i32, i32, i32) {
    %c0_i32 = arith.constant 0 : i32
    %c0_i32_0 = arith.constant 0 : i32
    %c0_i32_1 = arith.constant 0 : i32
    %c0_i32_2 = arith.constant 0 : i32
    %c0_i32_3 = arith.constant 0 : i32
    return %c0_i32, %c0_i32_0, %c0_i32_1, %c0_i32_2 : i32, i32, i32, i32
  }
  func.func @transform_5(%arg0: i32) -> (i32, i32, i32) {
    %c0_i32 = arith.constant 0 : i32
    %c0_i32_0 = arith.constant 0 : i32
    %c0_i32_1 = arith.constant 0 : i32
    return %arg0, %c0_i32, %c0_i32_0 : i32, i32, i32
  }
  func.func @transform_6(%arg0: i32) -> (i32, i32, i32) {
    %c0_i32 = arith.constant 0 : i32
    %c0_i32_0 = arith.constant 0 : i32
    %c0_i32_1 = arith.constant 0 : i32
    return %arg0, %c0_i32, %c0_i32_0 : i32, i32, i32
  }
  func.func @transform_7(%arg0: i32) -> (i32, i32, i32) {
    %c0_i32 = arith.constant 0 : i32
    %c0_i32_0 = arith.constant 0 : i32
    %c0_i32_1 = arith.constant 0 : i32
    return %arg0, %c0_i32, %c0_i32_0 : i32, i32, i32
  }
}

module attributes {stable_mosaic.version = 11 : i64} {
  func.func @kernel(%arg0: i32, %arg1: memref<1x64x64xf32, #tpu.memory_space<vmem>>, %arg2: memref<2x1x64xf32, #tpu.memory_space<vmem>>, %arg3: memref<2x1x64xf32, #tpu.memory_space<vmem>>, %arg4: memref<1x64xf32, #tpu.memory_space<vmem>>, %arg5: memref<1x64xf32, #tpu.memory_space<vmem>>, %arg6: memref<1x64x64xbf16, #tpu.memory_space<vmem>>) attributes {dimension_semantics = [#tpu.dimension_semantics<parallel>], iteration_bounds = array<i64: 2>, scalar_prefetch = 0 : i64, scratch_operands = 0 : i64, tpu.core_type = #tpu.core_type<tc>, window_params = [{transform_indices = @transform_0, window_bounds = array<i64: 1, 64, 64>}, {pipeline_mode = #tpu.pipeline_mode<synchronous>, transform_indices = @transform_1, window_bounds = array<i64: 2, 1, 64>}, {pipeline_mode = #tpu.pipeline_mode<synchronous>, transform_indices = @transform_2, window_bounds = array<i64: 2, 1, 64>}, {pipeline_mode = #tpu.pipeline_mode<synchronous>, transform_indices = @transform_3, window_bounds = array<i64: 1, 64>}, {pipeline_mode = #tpu.pipeline_mode<synchronous>, transform_indices = @transform_4, window_bounds = array<i64: 1, 64>}, {transform_indices = @transform_5, window_bounds = array<i64: 1, 64, 64>}]} {
    %c0 = arith.constant 0 : index
    %c0_0 = arith.constant 0 : index
    %c0_1 = arith.constant 0 : index
    %0 = vector.load %arg2[%c0, %c0_0, %c0_1] : memref<2x1x64xf32, #tpu.memory_space<vmem>>, vector<2x1x64xf32>
    %cst = arith.constant dense<0.000000e+00> : vector<1x64xf32>
    %1 = vector.multi_reduction <add>, %0, %cst [0] : vector<2x1x64xf32> to vector<1x64xf32>
    %c0_2 = arith.constant 0 : index
    %c0_3 = arith.constant 0 : index
    %c0_4 = arith.constant 0 : index
    %2 = vector.load %arg3[%c0_2, %c0_3, %c0_4] : memref<2x1x64xf32, #tpu.memory_space<vmem>>, vector<2x1x64xf32>
    %cst_5 = arith.constant dense<0.000000e+00> : vector<1x64xf32>
    %3 = vector.multi_reduction <add>, %2, %cst_5 [0] : vector<2x1x64xf32> to vector<1x64xf32>
    %cst_6 = arith.constant 7.812500e-03 : f32
    %4 = vector.broadcast %cst_6 : f32 to vector<1x64xf32>
    %5 = arith.mulf %1, %4 : vector<1x64xf32>
    %cst_7 = arith.constant 7.812500e-03 : f32
    %6 = vector.broadcast %cst_7 : f32 to vector<1x64xf32>
    %7 = arith.mulf %3, %6 : vector<1x64xf32>
    %8 = arith.mulf %5, %5 : vector<1x64xf32>
    %9 = arith.subf %7, %8 : vector<1x64xf32>
    %c0_8 = arith.constant 0 : index
    %c0_9 = arith.constant 0 : index
    %10 = vector.load %arg4[%c0_8, %c0_9] : memref<1x64xf32, #tpu.memory_space<vmem>>, vector<1x64xf32>
    %cst_10 = arith.constant 9.99999974E-6 : f32
    %11 = vector.broadcast %cst_10 : f32 to vector<1x64xf32>
    %12 = arith.addf %9, %11 : vector<1x64xf32>
    %13 = math.rsqrt %12 : vector<1x64xf32>
    %14 = arith.mulf %10, %13 : vector<1x64xf32>
    %c0_11 = arith.constant 0 : index
    %c0_12 = arith.constant 0 : index
    %15 = vector.load %arg5[%c0_11, %c0_12] : memref<1x64xf32, #tpu.memory_space<vmem>>, vector<1x64xf32>
    %16 = arith.mulf %5, %14 : vector<1x64xf32>
    %17 = arith.subf %15, %16 : vector<1x64xf32>
    %c0_13 = arith.constant 0 : index
    %c0_14 = arith.constant 0 : index
    %c0_15 = arith.constant 0 : index
    %18 = vector.load %arg1[%c0_13, %c0_14, %c0_15] : memref<1x64x64xf32, #tpu.memory_space<vmem>>, vector<1x64x64xf32>
    %19 = vector.shape_cast %18 : vector<1x64x64xf32> to vector<64x64xf32>
    %20 = vector.broadcast %14 : vector<1x64xf32> to vector<64x64xf32>
    %21 = arith.mulf %19, %20 : vector<64x64xf32>
    %22 = vector.broadcast %17 : vector<1x64xf32> to vector<64x64xf32>
    %23 = arith.addf %21, %22 : vector<64x64xf32>
    %cst_16 = arith.constant 0.000000e+00 : f32
    %24 = vector.broadcast %cst_16 : f32 to vector<64x64xf32>
    %25 = arith.maximumf %23, %24 : vector<64x64xf32>
    %26 = arith.truncf %25 : vector<64x64xf32> to vector<64x64xbf16>
    %c0_17 = arith.constant 0 : index
    %c0_18 = arith.constant 0 : index
    %c0_19 = arith.constant 0 : index
    %27 = vector.load %arg6[%c0_17, %c0_18, %c0_19] : memref<1x64x64xbf16, #tpu.memory_space<vmem>>, vector<1x64x64xbf16>
    %28 = vector.shape_cast %27 : vector<1x64x64xbf16> to vector<64x64xbf16>
    %29 = vector.shape_cast %26 : vector<64x64xbf16> to vector<1x64x64xbf16>
    tpu.vector_store %arg6[%c0_17, %c0_18, %c0_19], %29 {strides = array<i32>} : memref<1x64x64xbf16, #tpu.memory_space<vmem>>, vector<1x64x64xbf16>,
    return
  }
  func.func @transform_0(%arg0: i32) -> (i32, i32, i32) {
    %c0_i32 = arith.constant 0 : i32
    %c0_i32_0 = arith.constant 0 : i32
    %c0_i32_1 = arith.constant 0 : i32
    return %arg0, %c0_i32, %c0_i32_0 : i32, i32, i32
  }
  func.func @transform_1(%arg0: i32) -> (i32, i32, i32) {
    %c0_i32 = arith.constant 0 : i32
    %c0_i32_0 = arith.constant 0 : i32
    %c0_i32_1 = arith.constant 0 : i32
    %c0_i32_2 = arith.constant 0 : i32
    return %c0_i32, %c0_i32_0, %c0_i32_1 : i32, i32, i32
  }
  func.func @transform_2(%arg0: i32) -> (i32, i32, i32) {
    %c0_i32 = arith.constant 0 : i32
    %c0_i32_0 = arith.constant 0 : i32
    %c0_i32_1 = arith.constant 0 : i32
    %c0_i32_2 = arith.constant 0 : i32
    return %c0_i32, %c0_i32_0, %c0_i32_1 : i32, i32, i32
  }
  func.func @transform_3(%arg0: i32) -> (i32, i32) {
    %c0_i32 = arith.constant 0 : i32
    %c0_i32_0 = arith.constant 0 : i32
    %c0_i32_1 = arith.constant 0 : i32
    return %c0_i32, %c0_i32_0 : i32, i32
  }
  func.func @transform_4(%arg0: i32) -> (i32, i32) {
    %c0_i32 = arith.constant 0 : i32
    %c0_i32_0 = arith.constant 0 : i32
    %c0_i32_1 = arith.constant 0 : i32
    return %c0_i32, %c0_i32_0 : i32, i32
  }
  func.func @transform_5(%arg0: i32) -> (i32, i32, i32) {
    %c0_i32 = arith.constant 0 : i32
    %c0_i32_0 = arith.constant 0 : i32
    %c0_i32_1 = arith.constant 0 : i32
    return %arg0, %c0_i32, %c0_i32_0 : i32, i32, i32
  }
}

module attributes {stable_mosaic.version = 11 : i64} {
  func.func @kernel(%arg0: i32, %arg1: memref<1x104x64xbf16, #tpu.memory_space<vmem>>, %arg2: memref<3x3x64x64xbf16, #tpu.memory_space<vmem>>, %arg3: memref<1x80x64xf32, #tpu.memory_space<vmem>>, %arg4: memref<1x1x64xf32, #tpu.memory_space<vmem>>, %arg5: memref<1x1x64xf32, #tpu.memory_space<vmem>>) attributes {dimension_semantics = [#tpu.dimension_semantics<parallel>], iteration_bounds = array<i64: 2>, scalar_prefetch = 0 : i64, scratch_operands = 0 : i64, tpu.core_type = #tpu.core_type<tc>, window_params = [{transform_indices = @transform_0, window_bounds = array<i64: 1, 104, 64>}, {pipeline_mode = #tpu.pipeline_mode<synchronous>, transform_indices = @transform_1, window_bounds = array<i64: 3, 3, 64, 64>}, {transform_indices = @transform_2, window_bounds = array<i64: 1, 80, 64>}, {transform_indices = @transform_3, window_bounds = array<i64: 1, 1, 64>}, {transform_indices = @transform_4, window_bounds = array<i64: 1, 1, 64>}]} {
    %c0 = arith.constant 0 : index
    %c0_0 = arith.constant 0 : index
    %c0_1 = arith.constant 0 : index
    %0 = vector.load %arg1[%c0, %c0_0, %c0_1] : memref<1x104x64xbf16, #tpu.memory_space<vmem>>, vector<1x104x64xbf16>
    %1 = vector.shape_cast %0 : vector<1x104x64xbf16> to vector<104x64xbf16>
    %cst = arith.constant 0.000000e+00 : f32
    %2 = vector.broadcast %cst : f32 to vector<80x64xf32>
    %3 = vector.extract_strided_slice %1 {offsets = [0, 0], sizes = [80, 64], strides = [1, 1]} : vector<104x64xbf16> to vector<80x64xbf16>
    %c0_2 = arith.constant 0 : index
    %c0_3 = arith.constant 0 : index
    %c0_4 = arith.constant 0 : index
    %c0_5 = arith.constant 0 : index
    %4 = vector.load %arg2[%c0_2, %c0_3, %c0_4, %c0_5] : memref<3x3x64x64xbf16, #tpu.memory_space<vmem>>, vector<1x1x64x64xbf16>
    %5 = vector.shape_cast %4 : vector<1x1x64x64xbf16> to vector<64x64xbf16>
    %cst_6 = arith.constant dense<0.000000e+00> : vector<80x64xf32>
    %6 = tpu.matmul %3, %5, %cst_6 {dimension_numbers = #tpu.dot_dimension_numbers<[1], [0], [0], [1], [0, 0, 1, 1], [], []>} : vector<80x64xbf16>, vector<64x64xbf16>, vector<80x64xf32> -> vector<80x64xf32>
    %7 = arith.addf %2, %6 : vector<80x64xf32>
    %8 = vector.extract_strided_slice %1 {offsets = [1, 0], sizes = [80, 64], strides = [1, 1]} : vector<104x64xbf16> to vector<80x64xbf16>
    %c0_7 = arith.constant 0 : index
    %c1 = arith.constant 1 : index
    %c0_8 = arith.constant 0 : index
    %c0_9 = arith.constant 0 : index
    %9 = vector.load %arg2[%c0_7, %c1, %c0_8, %c0_9] : memref<3x3x64x64xbf16, #tpu.memory_space<vmem>>, vector<1x1x64x64xbf16>
    %10 = vector.shape_cast %9 : vector<1x1x64x64xbf16> to vector<64x64xbf16>
    %cst_10 = arith.constant dense<0.000000e+00> : vector<80x64xf32>
    %11 = tpu.matmul %8, %10, %cst_10 {dimension_numbers = #tpu.dot_dimension_numbers<[1], [0], [0], [1], [0, 0, 1, 1], [], []>} : vector<80x64xbf16>, vector<64x64xbf16>, vector<80x64xf32> -> vector<80x64xf32>
    %12 = arith.addf %7, %11 : vector<80x64xf32>
    %13 = vector.extract_strided_slice %1 {offsets = [2, 0], sizes = [80, 64], strides = [1, 1]} : vector<104x64xbf16> to vector<80x64xbf16>
    %c0_11 = arith.constant 0 : index
    %c2 = arith.constant 2 : index
    %c0_12 = arith.constant 0 : index
    %c0_13 = arith.constant 0 : index
    %14 = vector.load %arg2[%c0_11, %c2, %c0_12, %c0_13] : memref<3x3x64x64xbf16, #tpu.memory_space<vmem>>, vector<1x1x64x64xbf16>
    %15 = vector.shape_cast %14 : vector<1x1x64x64xbf16> to vector<64x64xbf16>
    %cst_14 = arith.constant dense<0.000000e+00> : vector<80x64xf32>
    %16 = tpu.matmul %13, %15, %cst_14 {dimension_numbers = #tpu.dot_dimension_numbers<[1], [0], [0], [1], [0, 0, 1, 1], [], []>} : vector<80x64xbf16>, vector<64x64xbf16>, vector<80x64xf32> -> vector<80x64xf32>
    %17 = arith.addf %12, %16 : vector<80x64xf32>
    %18 = vector.extract_strided_slice %1 {offsets = [10, 0], sizes = [80, 64], strides = [1, 1]} : vector<104x64xbf16> to vector<80x64xbf16>
    %c1_15 = arith.constant 1 : index
    %c0_16 = arith.constant 0 : index
    %c0_17 = arith.constant 0 : index
    %c0_18 = arith.constant 0 : index
    %19 = vector.load %arg2[%c1_15, %c0_16, %c0_17, %c0_18] : memref<3x3x64x64xbf16, #tpu.memory_space<vmem>>, vector<1x1x64x64xbf16>
    %20 = vector.shape_cast %19 : vector<1x1x64x64xbf16> to vector<64x64xbf16>
    %cst_19 = arith.constant dense<0.000000e+00> : vector<80x64xf32>
    %21 = tpu.matmul %18, %20, %cst_19 {dimension_numbers = #tpu.dot_dimension_numbers<[1], [0], [0], [1], [0, 0, 1, 1], [], []>} : vector<80x64xbf16>, vector<64x64xbf16>, vector<80x64xf32> -> vector<80x64xf32>
    %22 = arith.addf %17, %21 : vector<80x64xf32>
    %23 = vector.extract_strided_slice %1 {offsets = [11, 0], sizes = [80, 64], strides = [1, 1]} : vector<104x64xbf16> to vector<80x64xbf16>
    %c1_20 = arith.constant 1 : index
    %c1_21 = arith.constant 1 : index
    %c0_22 = arith.constant 0 : index
    %c0_23 = arith.constant 0 : index
    %24 = vector.load %arg2[%c1_20, %c1_21, %c0_22, %c0_23] : memref<3x3x64x64xbf16, #tpu.memory_space<vmem>>, vector<1x1x64x64xbf16>
    %25 = vector.shape_cast %24 : vector<1x1x64x64xbf16> to vector<64x64xbf16>
    %cst_24 = arith.constant dense<0.000000e+00> : vector<80x64xf32>
    %26 = tpu.matmul %23, %25, %cst_24 {dimension_numbers = #tpu.dot_dimension_numbers<[1], [0], [0], [1], [0, 0, 1, 1], [], []>} : vector<80x64xbf16>, vector<64x64xbf16>, vector<80x64xf32> -> vector<80x64xf32>
    %27 = arith.addf %22, %26 : vector<80x64xf32>
    %28 = vector.extract_strided_slice %1 {offsets = [12, 0], sizes = [80, 64], strides = [1, 1]} : vector<104x64xbf16> to vector<80x64xbf16>
    %c1_25 = arith.constant 1 : index
    %c2_26 = arith.constant 2 : index
    %c0_27 = arith.constant 0 : index
    %c0_28 = arith.constant 0 : index
    %29 = vector.load %arg2[%c1_25, %c2_26, %c0_27, %c0_28] : memref<3x3x64x64xbf16, #tpu.memory_space<vmem>>, vector<1x1x64x64xbf16>
    %30 = vector.shape_cast %29 : vector<1x1x64x64xbf16> to vector<64x64xbf16>
    %cst_29 = arith.constant dense<0.000000e+00> : vector<80x64xf32>
    %31 = tpu.matmul %28, %30, %cst_29 {dimension_numbers = #tpu.dot_dimension_numbers<[1], [0], [0], [1], [0, 0, 1, 1], [], []>} : vector<80x64xbf16>, vector<64x64xbf16>, vector<80x64xf32> -> vector<80x64xf32>
    %32 = arith.addf %27, %31 : vector<80x64xf32>
    %33 = vector.extract_strided_slice %1 {offsets = [20, 0], sizes = [80, 64], strides = [1, 1]} : vector<104x64xbf16> to vector<80x64xbf16>
    %c2_30 = arith.constant 2 : index
    %c0_31 = arith.constant 0 : index
    %c0_32 = arith.constant 0 : index
    %c0_33 = arith.constant 0 : index
    %34 = vector.load %arg2[%c2_30, %c0_31, %c0_32, %c0_33] : memref<3x3x64x64xbf16, #tpu.memory_space<vmem>>, vector<1x1x64x64xbf16>
    %35 = vector.shape_cast %34 : vector<1x1x64x64xbf16> to vector<64x64xbf16>
    %cst_34 = arith.constant dense<0.000000e+00> : vector<80x64xf32>
    %36 = tpu.matmul %33, %35, %cst_34 {dimension_numbers = #tpu.dot_dimension_numbers<[1], [0], [0], [1], [0, 0, 1, 1], [], []>} : vector<80x64xbf16>, vector<64x64xbf16>, vector<80x64xf32> -> vector<80x64xf32>
    %37 = arith.addf %32, %36 : vector<80x64xf32>
    %38 = vector.extract_strided_slice %1 {offsets = [21, 0], sizes = [80, 64], strides = [1, 1]} : vector<104x64xbf16> to vector<80x64xbf16>
    %c2_35 = arith.constant 2 : index
    %c1_36 = arith.constant 1 : index
    %c0_37 = arith.constant 0 : index
    %c0_38 = arith.constant 0 : index
    %39 = vector.load %arg2[%c2_35, %c1_36, %c0_37, %c0_38] : memref<3x3x64x64xbf16, #tpu.memory_space<vmem>>, vector<1x1x64x64xbf16>
    %40 = vector.shape_cast %39 : vector<1x1x64x64xbf16> to vector<64x64xbf16>
    %cst_39 = arith.constant dense<0.000000e+00> : vector<80x64xf32>
    %41 = tpu.matmul %38, %40, %cst_39 {dimension_numbers = #tpu.dot_dimension_numbers<[1], [0], [0], [1], [0, 0, 1, 1], [], []>} : vector<80x64xbf16>, vector<64x64xbf16>, vector<80x64xf32> -> vector<80x64xf32>
    %42 = arith.addf %37, %41 : vector<80x64xf32>
    %43 = vector.extract_strided_slice %1 {offsets = [22, 0], sizes = [80, 64], strides = [1, 1]} : vector<104x64xbf16> to vector<80x64xbf16>
    %c2_40 = arith.constant 2 : index
    %c2_41 = arith.constant 2 : index
    %c0_42 = arith.constant 0 : index
    %c0_43 = arith.constant 0 : index
    %44 = vector.load %arg2[%c2_40, %c2_41, %c0_42, %c0_43] : memref<3x3x64x64xbf16, #tpu.memory_space<vmem>>, vector<1x1x64x64xbf16>
    %45 = vector.shape_cast %44 : vector<1x1x64x64xbf16> to vector<64x64xbf16>
    %cst_44 = arith.constant dense<0.000000e+00> : vector<80x64xf32>
    %46 = tpu.matmul %43, %45, %cst_44 {dimension_numbers = #tpu.dot_dimension_numbers<[1], [0], [0], [1], [0, 0, 1, 1], [], []>} : vector<80x64xbf16>, vector<64x64xbf16>, vector<80x64xf32> -> vector<80x64xf32>
    %47 = arith.addf %42, %46 : vector<80x64xf32>
    %c0_45 = arith.constant 0 : index
    %c0_46 = arith.constant 0 : index
    %c0_47 = arith.constant 0 : index
    %48 = vector.load %arg3[%c0_45, %c0_46, %c0_47] : memref<1x80x64xf32, #tpu.memory_space<vmem>>, vector<1x80x64xf32>
    %49 = vector.shape_cast %48 : vector<1x80x64xf32> to vector<80x64xf32>
    %50 = vector.shape_cast %47 : vector<80x64xf32> to vector<1x80x64xf32>
    tpu.vector_store %arg3[%c0_45, %c0_46, %c0_47], %50 {strides = array<i32>} : memref<1x80x64xf32, #tpu.memory_space<vmem>>, vector<1x80x64xf32>,
    %51 = tpu.iota {dimensions = array<i32: 0>} : vector<80x1xi32>
    %c10_i32 = arith.constant 10 : i32
    %c0_i32 = arith.constant 0 : i32
    %52 = arith.cmpi eq, %c10_i32, %c0_i32 : i32
    %c1_i32 = arith.constant 1 : i32
    %53 = arith.select %52, %c1_i32, %c10_i32 : i32
    %54 = vector.broadcast %53 : i32 to vector<80x1xi32>
    %55 = arith.remsi %51, %54 : vector<80x1xi32>
    %c0_i32_48 = arith.constant 0 : i32
    %56 = vector.broadcast %c0_i32_48 : i32 to vector<80x1xi32>
    %57 = arith.cmpi ne, %55, %56 : vector<80x1xi32>
    %c0_i32_49 = arith.constant 0 : i32
    %58 = vector.broadcast %c0_i32_49 : i32 to vector<80x1xi32>
    %59 = arith.cmpi slt, %55, %58 : vector<80x1xi32>
    %c0_i32_50 = arith.constant 0 : i32
    %60 = arith.cmpi slt, %53, %c0_i32_50 : i32
    %61 = vector.broadcast %60 : i1 to vector<80x1xi1>
    %62 = vector.broadcast %61 : vector<80x1xi1> to vector<80x1xi1>
    %63 = arith.xori %59, %62 : vector<80x1xi1>
    %64 = arith.andi %63, %57 : vector<80x1xi1>
    %65 = vector.broadcast %53 : i32 to vector<80x1xi32>
    %66 = arith.addi %55, %65 : vector<80x1xi32>
    %67 = arith.select %64, %66, %55 : vector<80x1xi1>, vector<80x1xi32>
    %c8_i32 = arith.constant 8 : i32
    %68 = vector.broadcast %c8_i32 : i32 to vector<80x1xi32>
    %69 = arith.cmpi slt, %67, %68 : vector<80x1xi32>
    %cst_51 = arith.constant 0.000000e+00 : f32
    %70 = vector.shape_cast %69 : vector<80x1xi1> to vector<80x1xi1>
    %71 = vector.broadcast %70 : vector<80x1xi1> to vector<80x64xi1>
    %72 = vector.broadcast %cst_51 : f32 to vector<80x64xf32>
    %73 = arith.select %71, %47, %72 : vector<80x64xi1>, vector<80x64xf32>
    %cst_52 = arith.constant dense<0.000000e+00> : vector<64xf32>
    %74 = vector.multi_reduction <add>, %73, %cst_52 [0] : vector<80x64xf32> to vector<64xf32>
    %75 = vector.shape_cast %74 : vector<64xf32> to vector<1x64xf32>
    %c0_53 = arith.constant 0 : index
    %c0_54 = arith.constant 0 : index
    %c0_55 = arith.constant 0 : index
    %76 = vector.load %arg4[%c0_53, %c0_54, %c0_55] : memref<1x1x64xf32, #tpu.memory_space<vmem>>, vector<1x1x64xf32>
    %77 = vector.shape_cast %76 : vector<1x1x64xf32> to vector<1x64xf32>
    %78 = vector.shape_cast %75 : vector<1x64xf32> to vector<1x1x64xf32>
    tpu.vector_store %arg4[%c0_53, %c0_54, %c0_55], %78 {strides = array<i32>} : memref<1x1x64xf32, #tpu.memory_space<vmem>>, vector<1x1x64xf32>,
    %79 = arith.mulf %73, %73 : vector<80x64xf32>
    %cst_56 = arith.constant dense<0.000000e+00> : vector<64xf32>
    %80 = vector.multi_reduction <add>, %79, %cst_56 [0] : vector<80x64xf32> to vector<64xf32>
    %81 = vector.shape_cast %80 : vector<64xf32> to vector<1x64xf32>
    %c0_57 = arith.constant 0 : index
    %c0_58 = arith.constant 0 : index
    %c0_59 = arith.constant 0 : index
    %82 = vector.load %arg5[%c0_57, %c0_58, %c0_59] : memref<1x1x64xf32, #tpu.memory_space<vmem>>, vector<1x1x64xf32>
    %83 = vector.shape_cast %82 : vector<1x1x64xf32> to vector<1x64xf32>
    %84 = vector.shape_cast %81 : vector<1x64xf32> to vector<1x1x64xf32>
    tpu.vector_store %arg5[%c0_57, %c0_58, %c0_59], %84 {strides = array<i32>} : memref<1x1x64xf32, #tpu.memory_space<vmem>>, vector<1x1x64xf32>,
    return
  }
  func.func @transform_0(%arg0: i32) -> (i32, i32, i32) {
    %c0_i32 = arith.constant 0 : i32
    %c0_i32_0 = arith.constant 0 : i32
    %c0_i32_1 = arith.constant 0 : i32
    return %arg0, %c0_i32, %c0_i32_0 : i32, i32, i32
  }
  func.func @transform_1(%arg0: i32) -> (i32, i32, i32, i32) {
    %c0_i32 = arith.constant 0 : i32
    %c0_i32_0 = arith.constant 0 : i32
    %c0_i32_1 = arith.constant 0 : i32
    %c0_i32_2 = arith.constant 0 : i32
    %c0_i32_3 = arith.constant 0 : i32
    return %c0_i32, %c0_i32_0, %c0_i32_1, %c0_i32_2 : i32, i32, i32, i32
  }
  func.func @transform_2(%arg0: i32) -> (i32, i32, i32) {
    %c0_i32 = arith.constant 0 : i32
    %c0_i32_0 = arith.constant 0 : i32
    %c0_i32_1 = arith.constant 0 : i32
    return %arg0, %c0_i32, %c0_i32_0 : i32, i32, i32
  }
  func.func @transform_3(%arg0: i32) -> (i32, i32, i32) {
    %c0_i32 = arith.constant 0 : i32
    %c0_i32_0 = arith.constant 0 : i32
    %c0_i32_1 = arith.constant 0 : i32
    return %arg0, %c0_i32, %c0_i32_0 : i32, i32, i32
  }
  func.func @transform_4(%arg0: i32) -> (i32, i32, i32) {
    %c0_i32 = arith.constant 0 : i32
    %c0_i32_0 = arith.constant 0 : i32
    %c0_i32_1 = arith.constant 0 : i32
    return %arg0, %c0_i32, %c0_i32_0 : i32, i32, i32
  }
}

module attributes {stable_mosaic.version = 11 : i64} {
  func.func @kernel(%arg0: i32, %arg1: memref<1x64x32xbf16, #tpu.memory_space<vmem>>, %arg2: memref<1x1x32x64xbf16, #tpu.memory_space<vmem>>, %arg3: memref<1x64x64xf32, #tpu.memory_space<vmem>>, %arg4: memref<1x1x64xf32, #tpu.memory_space<vmem>>, %arg5: memref<1x1x64xf32, #tpu.memory_space<vmem>>) attributes {dimension_semantics = [#tpu.dimension_semantics<parallel>], iteration_bounds = array<i64: 2>, scalar_prefetch = 0 : i64, scratch_operands = 0 : i64, tpu.core_type = #tpu.core_type<tc>, window_params = [{transform_indices = @transform_0, window_bounds = array<i64: 1, 64, 32>}, {pipeline_mode = #tpu.pipeline_mode<synchronous>, transform_indices = @transform_1, window_bounds = array<i64: 1, 1, 32, 64>}, {transform_indices = @transform_2, window_bounds = array<i64: 1, 64, 64>}, {transform_indices = @transform_3, window_bounds = array<i64: 1, 1, 64>}, {transform_indices = @transform_4, window_bounds = array<i64: 1, 1, 64>}]} {
    %c0 = arith.constant 0 : index
    %c0_0 = arith.constant 0 : index
    %c0_1 = arith.constant 0 : index
    %0 = vector.load %arg1[%c0, %c0_0, %c0_1] : memref<1x64x32xbf16, #tpu.memory_space<vmem>>, vector<1x64x32xbf16>
    %1 = vector.shape_cast %0 : vector<1x64x32xbf16> to vector<64x32xbf16>
    %cst = arith.constant 0.000000e+00 : f32
    %2 = vector.broadcast %cst : f32 to vector<64x64xf32>
    %c0_2 = arith.constant 0 : index
    %c0_3 = arith.constant 0 : index
    %c0_4 = arith.constant 0 : index
    %c0_5 = arith.constant 0 : index
    %3 = vector.load %arg2[%c0_2, %c0_3, %c0_4, %c0_5] : memref<1x1x32x64xbf16, #tpu.memory_space<vmem>>, vector<1x1x32x64xbf16>
    %4 = vector.shape_cast %3 : vector<1x1x32x64xbf16> to vector<32x64xbf16>
    %cst_6 = arith.constant dense<0.000000e+00> : vector<64x64xf32>
    %5 = tpu.matmul %1, %4, %cst_6 {dimension_numbers = #tpu.dot_dimension_numbers<[1], [0], [0], [1], [0, 0, 1, 1], [], []>} : vector<64x32xbf16>, vector<32x64xbf16>, vector<64x64xf32> -> vector<64x64xf32>
    %6 = arith.addf %2, %5 : vector<64x64xf32>
    %c0_7 = arith.constant 0 : index
    %c0_8 = arith.constant 0 : index
    %c0_9 = arith.constant 0 : index
    %7 = vector.load %arg3[%c0_7, %c0_8, %c0_9] : memref<1x64x64xf32, #tpu.memory_space<vmem>>, vector<1x64x64xf32>
    %8 = vector.shape_cast %7 : vector<1x64x64xf32> to vector<64x64xf32>
    %9 = vector.shape_cast %6 : vector<64x64xf32> to vector<1x64x64xf32>
    tpu.vector_store %arg3[%c0_7, %c0_8, %c0_9], %9 {strides = array<i32>} : memref<1x64x64xf32, #tpu.memory_space<vmem>>, vector<1x64x64xf32>,
    %cst_10 = arith.constant dense<0.000000e+00> : vector<64xf32>
    %10 = vector.multi_reduction <add>, %6, %cst_10 [0] : vector<64x64xf32> to vector<64xf32>
    %11 = vector.shape_cast %10 : vector<64xf32> to vector<1x64xf32>
    %c0_11 = arith.constant 0 : index
    %c0_12 = arith.constant 0 : index
    %c0_13 = arith.constant 0 : index
    %12 = vector.load %arg4[%c0_11, %c0_12, %c0_13] : memref<1x1x64xf32, #tpu.memory_space<vmem>>, vector<1x1x64xf32>
    %13 = vector.shape_cast %12 : vector<1x1x64xf32> to vector<1x64xf32>
    %14 = vector.shape_cast %11 : vector<1x64xf32> to vector<1x1x64xf32>
    tpu.vector_store %arg4[%c0_11, %c0_12, %c0_13], %14 {strides = array<i32>} : memref<1x1x64xf32, #tpu.memory_space<vmem>>, vector<1x1x64xf32>,
    %15 = arith.mulf %6, %6 : vector<64x64xf32>
    %cst_14 = arith.constant dense<0.000000e+00> : vector<64xf32>
    %16 = vector.multi_reduction <add>, %15, %cst_14 [0] : vector<64x64xf32> to vector<64xf32>
    %17 = vector.shape_cast %16 : vector<64xf32> to vector<1x64xf32>
    %c0_15 = arith.constant 0 : index
    %c0_16 = arith.constant 0 : index
    %c0_17 = arith.constant 0 : index
    %18 = vector.load %arg5[%c0_15, %c0_16, %c0_17] : memref<1x1x64xf32, #tpu.memory_space<vmem>>, vector<1x1x64xf32>
    %19 = vector.shape_cast %18 : vector<1x1x64xf32> to vector<1x64xf32>
    %20 = vector.shape_cast %17 : vector<1x64xf32> to vector<1x1x64xf32>
    tpu.vector_store %arg5[%c0_15, %c0_16, %c0_17], %20 {strides = array<i32>} : memref<1x1x64xf32, #tpu.memory_space<vmem>>, vector<1x1x64xf32>,
    return
  }
  func.func @transform_0(%arg0: i32) -> (i32, i32, i32) {
    %c0_i32 = arith.constant 0 : i32
    %c0_i32_0 = arith.constant 0 : i32
    %c0_i32_1 = arith.constant 0 : i32
    return %arg0, %c0_i32, %c0_i32_0 : i32, i32, i32
  }
  func.func @transform_1(%arg0: i32) -> (i32, i32, i32, i32) {
    %c0_i32 = arith.constant 0 : i32
    %c0_i32_0 = arith.constant 0 : i32
    %c0_i32_1 = arith.constant 0 : i32
    %c0_i32_2 = arith.constant 0 : i32
    %c0_i32_3 = arith.constant 0 : i32
    return %c0_i32, %c0_i32_0, %c0_i32_1, %c0_i32_2 : i32, i32, i32, i32
  }
  func.func @transform_2(%arg0: i32) -> (i32, i32, i32) {
    %c0_i32 = arith.constant 0 : i32
    %c0_i32_0 = arith.constant 0 : i32
    %c0_i32_1 = arith.constant 0 : i32
    return %arg0, %c0_i32, %c0_i32_0 : i32, i32, i32
  }
  func.func @transform_3(%arg0: i32) -> (i32, i32, i32) {
    %c0_i32 = arith.constant 0 : i32
    %c0_i32_0 = arith.constant 0 : i32
    %c0_i32_1 = arith.constant 0 : i32
    return %arg0, %c0_i32, %c0_i32_0 : i32, i32, i32
  }
  func.func @transform_4(%arg0: i32) -> (i32, i32, i32) {
    %c0_i32 = arith.constant 0 : i32
    %c0_i32_0 = arith.constant 0 : i32
    %c0_i32_1 = arith.constant 0 : i32
    return %arg0, %c0_i32, %c0_i32_0 : i32, i32, i32
  }
}

module attributes {stable_mosaic.version = 11 : i64} {
  func.func @kernel(%arg0: i32, %arg1: memref<1x64x64xf32, #tpu.memory_space<vmem>>, %arg2: memref<2x1x64xf32, #tpu.memory_space<vmem>>, %arg3: memref<2x1x64xf32, #tpu.memory_space<vmem>>, %arg4: memref<1x64xf32, #tpu.memory_space<vmem>>, %arg5: memref<1x64xf32, #tpu.memory_space<vmem>>, %arg6: memref<1x64x64xbf16, #tpu.memory_space<vmem>>) attributes {dimension_semantics = [#tpu.dimension_semantics<parallel>], iteration_bounds = array<i64: 2>, scalar_prefetch = 0 : i64, scratch_operands = 0 : i64, tpu.core_type = #tpu.core_type<tc>, window_params = [{transform_indices = @transform_0, window_bounds = array<i64: 1, 64, 64>}, {pipeline_mode = #tpu.pipeline_mode<synchronous>, transform_indices = @transform_1, window_bounds = array<i64: 2, 1, 64>}, {pipeline_mode = #tpu.pipeline_mode<synchronous>, transform_indices = @transform_2, window_bounds = array<i64: 2, 1, 64>}, {pipeline_mode = #tpu.pipeline_mode<synchronous>, transform_indices = @transform_3, window_bounds = array<i64: 1, 64>}, {pipeline_mode = #tpu.pipeline_mode<synchronous>, transform_indices = @transform_4, window_bounds = array<i64: 1, 64>}, {transform_indices = @transform_5, window_bounds = array<i64: 1, 64, 64>}]} {
    %c0 = arith.constant 0 : index
    %c0_0 = arith.constant 0 : index
    %c0_1 = arith.constant 0 : index
    %0 = vector.load %arg2[%c0, %c0_0, %c0_1] : memref<2x1x64xf32, #tpu.memory_space<vmem>>, vector<2x1x64xf32>
    %cst = arith.constant dense<0.000000e+00> : vector<1x64xf32>
    %1 = vector.multi_reduction <add>, %0, %cst [0] : vector<2x1x64xf32> to vector<1x64xf32>
    %c0_2 = arith.constant 0 : index
    %c0_3 = arith.constant 0 : index
    %c0_4 = arith.constant 0 : index
    %2 = vector.load %arg3[%c0_2, %c0_3, %c0_4] : memref<2x1x64xf32, #tpu.memory_space<vmem>>, vector<2x1x64xf32>
    %cst_5 = arith.constant dense<0.000000e+00> : vector<1x64xf32>
    %3 = vector.multi_reduction <add>, %2, %cst_5 [0] : vector<2x1x64xf32> to vector<1x64xf32>
    %cst_6 = arith.constant 7.812500e-03 : f32
    %4 = vector.broadcast %cst_6 : f32 to vector<1x64xf32>
    %5 = arith.mulf %1, %4 : vector<1x64xf32>
    %cst_7 = arith.constant 7.812500e-03 : f32
    %6 = vector.broadcast %cst_7 : f32 to vector<1x64xf32>
    %7 = arith.mulf %3, %6 : vector<1x64xf32>
    %8 = arith.mulf %5, %5 : vector<1x64xf32>
    %9 = arith.subf %7, %8 : vector<1x64xf32>
    %c0_8 = arith.constant 0 : index
    %c0_9 = arith.constant 0 : index
    %10 = vector.load %arg4[%c0_8, %c0_9] : memref<1x64xf32, #tpu.memory_space<vmem>>, vector<1x64xf32>
    %cst_10 = arith.constant 9.99999974E-6 : f32
    %11 = vector.broadcast %cst_10 : f32 to vector<1x64xf32>
    %12 = arith.addf %9, %11 : vector<1x64xf32>
    %13 = math.rsqrt %12 : vector<1x64xf32>
    %14 = arith.mulf %10, %13 : vector<1x64xf32>
    %c0_11 = arith.constant 0 : index
    %c0_12 = arith.constant 0 : index
    %15 = vector.load %arg5[%c0_11, %c0_12] : memref<1x64xf32, #tpu.memory_space<vmem>>, vector<1x64xf32>
    %16 = arith.mulf %5, %14 : vector<1x64xf32>
    %17 = arith.subf %15, %16 : vector<1x64xf32>
    %c0_13 = arith.constant 0 : index
    %c0_14 = arith.constant 0 : index
    %c0_15 = arith.constant 0 : index
    %18 = vector.load %arg1[%c0_13, %c0_14, %c0_15] : memref<1x64x64xf32, #tpu.memory_space<vmem>>, vector<1x64x64xf32>
    %19 = vector.shape_cast %18 : vector<1x64x64xf32> to vector<64x64xf32>
    %20 = vector.broadcast %14 : vector<1x64xf32> to vector<64x64xf32>
    %21 = arith.mulf %19, %20 : vector<64x64xf32>
    %22 = vector.broadcast %17 : vector<1x64xf32> to vector<64x64xf32>
    %23 = arith.addf %21, %22 : vector<64x64xf32>
    %24 = arith.truncf %23 : vector<64x64xf32> to vector<64x64xbf16>
    %c0_16 = arith.constant 0 : index
    %c0_17 = arith.constant 0 : index
    %c0_18 = arith.constant 0 : index
    %25 = vector.load %arg6[%c0_16, %c0_17, %c0_18] : memref<1x64x64xbf16, #tpu.memory_space<vmem>>, vector<1x64x64xbf16>
    %26 = vector.shape_cast %25 : vector<1x64x64xbf16> to vector<64x64xbf16>
    %27 = vector.shape_cast %24 : vector<64x64xbf16> to vector<1x64x64xbf16>
    tpu.vector_store %arg6[%c0_16, %c0_17, %c0_18], %27 {strides = array<i32>} : memref<1x64x64xbf16, #tpu.memory_space<vmem>>, vector<1x64x64xbf16>,
    return
  }
  func.func @transform_0(%arg0: i32) -> (i32, i32, i32) {
    %c0_i32 = arith.constant 0 : i32
    %c0_i32_0 = arith.constant 0 : i32
    %c0_i32_1 = arith.constant 0 : i32
    return %arg0, %c0_i32, %c0_i32_0 : i32, i32, i32
  }
  func.func @transform_1(%arg0: i32) -> (i32, i32, i32) {
    %c0_i32 = arith.constant 0 : i32
    %c0_i32_0 = arith.constant 0 : i32
    %c0_i32_1 = arith.constant 0 : i32
    %c0_i32_2 = arith.constant 0 : i32
    return %c0_i32, %c0_i32_0, %c0_i32_1 : i32, i32, i32
  }
  func.func @transform_2(%arg0: i32) -> (i32, i32, i32) {
    %c0_i32 = arith.constant 0 : i32
    %c0_i32_0 = arith.constant 0 : i32
    %c0_i32_1 = arith.constant 0 : i32
    %c0_i32_2 = arith.constant 0 : i32
    return %c0_i32, %c0_i32_0, %c0_i32_1 : i32, i32, i32
  }
  func.func @transform_3(%arg0: i32) -> (i32, i32) {
    %c0_i32 = arith.constant 0 : i32
    %c0_i32_0 = arith.constant 0 : i32
    %c0_i32_1 = arith.constant 0 : i32
    return %c0_i32, %c0_i32_0 : i32, i32
  }
  func.func @transform_4(%arg0: i32) -> (i32, i32) {
    %c0_i32 = arith.constant 0 : i32
    %c0_i32_0 = arith.constant 0 : i32
    %c0_i32_1 = arith.constant 0 : i32
    return %c0_i32, %c0_i32_0 : i32, i32
  }
  func.func @transform_5(%arg0: i32) -> (i32, i32, i32) {
    %c0_i32 = arith.constant 0 : i32
    %c0_i32_0 = arith.constant 0 : i32
    %c0_i32_1 = arith.constant 0 : i32
    return %arg0, %c0_i32, %c0_i32_0 : i32, i32, i32
  }
}

module attributes {stable_mosaic.version = 11 : i64} {
  func.func @kernel(%arg0: i32, %arg1: memref<1x64x64xf32, #tpu.memory_space<vmem>>, %arg2: memref<2x1x64xf32, #tpu.memory_space<vmem>>, %arg3: memref<2x1x64xf32, #tpu.memory_space<vmem>>, %arg4: memref<1x64xf32, #tpu.memory_space<vmem>>, %arg5: memref<1x64xf32, #tpu.memory_space<vmem>>, %arg6: memref<1x64x64xbf16, #tpu.memory_space<vmem>>, %arg7: memref<1x64x64xbf16, #tpu.memory_space<vmem>>) attributes {dimension_semantics = [#tpu.dimension_semantics<parallel>], iteration_bounds = array<i64: 2>, scalar_prefetch = 0 : i64, scratch_operands = 0 : i64, tpu.core_type = #tpu.core_type<tc>, window_params = [{transform_indices = @transform_0, window_bounds = array<i64: 1, 64, 64>}, {pipeline_mode = #tpu.pipeline_mode<synchronous>, transform_indices = @transform_1, window_bounds = array<i64: 2, 1, 64>}, {pipeline_mode = #tpu.pipeline_mode<synchronous>, transform_indices = @transform_2, window_bounds = array<i64: 2, 1, 64>}, {pipeline_mode = #tpu.pipeline_mode<synchronous>, transform_indices = @transform_3, window_bounds = array<i64: 1, 64>}, {pipeline_mode = #tpu.pipeline_mode<synchronous>, transform_indices = @transform_4, window_bounds = array<i64: 1, 64>}, {transform_indices = @transform_5, window_bounds = array<i64: 1, 64, 64>}, {transform_indices = @transform_6, window_bounds = array<i64: 1, 64, 64>}]} {
    %c0 = arith.constant 0 : index
    %c0_0 = arith.constant 0 : index
    %c0_1 = arith.constant 0 : index
    %0 = vector.load %arg2[%c0, %c0_0, %c0_1] : memref<2x1x64xf32, #tpu.memory_space<vmem>>, vector<2x1x64xf32>
    %cst = arith.constant dense<0.000000e+00> : vector<1x64xf32>
    %1 = vector.multi_reduction <add>, %0, %cst [0] : vector<2x1x64xf32> to vector<1x64xf32>
    %c0_2 = arith.constant 0 : index
    %c0_3 = arith.constant 0 : index
    %c0_4 = arith.constant 0 : index
    %2 = vector.load %arg3[%c0_2, %c0_3, %c0_4] : memref<2x1x64xf32, #tpu.memory_space<vmem>>, vector<2x1x64xf32>
    %cst_5 = arith.constant dense<0.000000e+00> : vector<1x64xf32>
    %3 = vector.multi_reduction <add>, %2, %cst_5 [0] : vector<2x1x64xf32> to vector<1x64xf32>
    %cst_6 = arith.constant 7.812500e-03 : f32
    %4 = vector.broadcast %cst_6 : f32 to vector<1x64xf32>
    %5 = arith.mulf %1, %4 : vector<1x64xf32>
    %cst_7 = arith.constant 7.812500e-03 : f32
    %6 = vector.broadcast %cst_7 : f32 to vector<1x64xf32>
    %7 = arith.mulf %3, %6 : vector<1x64xf32>
    %8 = arith.mulf %5, %5 : vector<1x64xf32>
    %9 = arith.subf %7, %8 : vector<1x64xf32>
    %c0_8 = arith.constant 0 : index
    %c0_9 = arith.constant 0 : index
    %10 = vector.load %arg4[%c0_8, %c0_9] : memref<1x64xf32, #tpu.memory_space<vmem>>, vector<1x64xf32>
    %cst_10 = arith.constant 9.99999974E-6 : f32
    %11 = vector.broadcast %cst_10 : f32 to vector<1x64xf32>
    %12 = arith.addf %9, %11 : vector<1x64xf32>
    %13 = math.rsqrt %12 : vector<1x64xf32>
    %14 = arith.mulf %10, %13 : vector<1x64xf32>
    %c0_11 = arith.constant 0 : index
    %c0_12 = arith.constant 0 : index
    %15 = vector.load %arg5[%c0_11, %c0_12] : memref<1x64xf32, #tpu.memory_space<vmem>>, vector<1x64xf32>
    %16 = arith.mulf %5, %14 : vector<1x64xf32>
    %17 = arith.subf %15, %16 : vector<1x64xf32>
    %c0_13 = arith.constant 0 : index
    %c0_14 = arith.constant 0 : index
    %c0_15 = arith.constant 0 : index
    %18 = vector.load %arg1[%c0_13, %c0_14, %c0_15] : memref<1x64x64xf32, #tpu.memory_space<vmem>>, vector<1x64x64xf32>
    %19 = vector.shape_cast %18 : vector<1x64x64xf32> to vector<64x64xf32>
    %20 = vector.broadcast %14 : vector<1x64xf32> to vector<64x64xf32>
    %21 = arith.mulf %19, %20 : vector<64x64xf32>
    %22 = vector.broadcast %17 : vector<1x64xf32> to vector<64x64xf32>
    %23 = arith.addf %21, %22 : vector<64x64xf32>
    %c0_16 = arith.constant 0 : index
    %c0_17 = arith.constant 0 : index
    %c0_18 = arith.constant 0 : index
    %24 = vector.load %arg6[%c0_16, %c0_17, %c0_18] : memref<1x64x64xbf16, #tpu.memory_space<vmem>>, vector<1x64x64xbf16>
    %25 = vector.shape_cast %24 : vector<1x64x64xbf16> to vector<64x64xbf16>
    %26 = arith.extf %25 : vector<64x64xbf16> to vector<64x64xf32>
    %27 = arith.addf %23, %26 : vector<64x64xf32>
    %cst_19 = arith.constant 0.000000e+00 : f32
    %28 = vector.broadcast %cst_19 : f32 to vector<64x64xf32>
    %29 = arith.maximumf %27, %28 : vector<64x64xf32>
    %30 = arith.truncf %29 : vector<64x64xf32> to vector<64x64xbf16>
    %c0_20 = arith.constant 0 : index
    %c0_21 = arith.constant 0 : index
    %c0_22 = arith.constant 0 : index
    %31 = vector.load %arg7[%c0_20, %c0_21, %c0_22] : memref<1x64x64xbf16, #tpu.memory_space<vmem>>, vector<1x64x64xbf16>
    %32 = vector.shape_cast %31 : vector<1x64x64xbf16> to vector<64x64xbf16>
    %33 = vector.shape_cast %30 : vector<64x64xbf16> to vector<1x64x64xbf16>
    tpu.vector_store %arg7[%c0_20, %c0_21, %c0_22], %33 {strides = array<i32>} : memref<1x64x64xbf16, #tpu.memory_space<vmem>>, vector<1x64x64xbf16>,
    return
  }
  func.func @transform_0(%arg0: i32) -> (i32, i32, i32) {
    %c0_i32 = arith.constant 0 : i32
    %c0_i32_0 = arith.constant 0 : i32
    %c0_i32_1 = arith.constant 0 : i32
    return %arg0, %c0_i32, %c0_i32_0 : i32, i32, i32
  }
  func.func @transform_1(%arg0: i32) -> (i32, i32, i32) {
    %c0_i32 = arith.constant 0 : i32
    %c0_i32_0 = arith.constant 0 : i32
    %c0_i32_1 = arith.constant 0 : i32
    %c0_i32_2 = arith.constant 0 : i32
    return %c0_i32, %c0_i32_0, %c0_i32_1 : i32, i32, i32
  }
  func.func @transform_2(%arg0: i32) -> (i32, i32, i32) {
    %c0_i32 = arith.constant 0 : i32
    %c0_i32_0 = arith.constant 0 : i32
    %c0_i32_1 = arith.constant 0 : i32
    %c0_i32_2 = arith.constant 0 : i32
    return %c0_i32, %c0_i32_0, %c0_i32_1 : i32, i32, i32
  }
  func.func @transform_3(%arg0: i32) -> (i32, i32) {
    %c0_i32 = arith.constant 0 : i32
    %c0_i32_0 = arith.constant 0 : i32
    %c0_i32_1 = arith.constant 0 : i32
    return %c0_i32, %c0_i32_0 : i32, i32
  }
  func.func @transform_4(%arg0: i32) -> (i32, i32) {
    %c0_i32 = arith.constant 0 : i32
    %c0_i32_0 = arith.constant 0 : i32
    %c0_i32_1 = arith.constant 0 : i32
    return %c0_i32, %c0_i32_0 : i32, i32
  }
  func.func @transform_5(%arg0: i32) -> (i32, i32, i32) {
    %c0_i32 = arith.constant 0 : i32
    %c0_i32_0 = arith.constant 0 : i32
    %c0_i32_1 = arith.constant 0 : i32
    return %arg0, %c0_i32, %c0_i32_0 : i32, i32, i32
  }
  func.func @transform_6(%arg0: i32) -> (i32, i32, i32) {
    %c0_i32 = arith.constant 0 : i32
    %c0_i32_0 = arith.constant 0 : i32
    %c0_i32_1 = arith.constant 0 : i32
    return %arg0, %c0_i32, %c0_i32_0 : i32, i32, i32
  }
}

module attributes {stable_mosaic.version = 11 : i64} {
  func.func @kernel(%arg0: i32, %arg1: memref<1x64x64xf32, #tpu.memory_space<vmem>>, %arg2: memref<2x1x64xf32, #tpu.memory_space<vmem>>, %arg3: memref<2x1x64xf32, #tpu.memory_space<vmem>>, %arg4: memref<1x64xf32, #tpu.memory_space<vmem>>, %arg5: memref<1x64xf32, #tpu.memory_space<vmem>>, %arg6: memref<1x64x64xbf16, #tpu.memory_space<vmem>>, %arg7: memref<1x64x64xbf16, #tpu.memory_space<vmem>>) attributes {dimension_semantics = [#tpu.dimension_semantics<parallel>], iteration_bounds = array<i64: 2>, scalar_prefetch = 0 : i64, scratch_operands = 0 : i64, tpu.core_type = #tpu.core_type<tc>, window_params = [{transform_indices = @transform_0, window_bounds = array<i64: 1, 64, 64>}, {pipeline_mode = #tpu.pipeline_mode<synchronous>, transform_indices = @transform_1, window_bounds = array<i64: 2, 1, 64>}, {pipeline_mode = #tpu.pipeline_mode<synchronous>, transform_indices = @transform_2, window_bounds = array<i64: 2, 1, 64>}, {pipeline_mode = #tpu.pipeline_mode<synchronous>, transform_indices = @transform_3, window_bounds = array<i64: 1, 64>}, {pipeline_mode = #tpu.pipeline_mode<synchronous>, transform_indices = @transform_4, window_bounds = array<i64: 1, 64>}, {transform_indices = @transform_5, window_bounds = array<i64: 1, 64, 64>}, {transform_indices = @transform_6, window_bounds = array<i64: 1, 64, 64>}]} {
    %c0 = arith.constant 0 : index
    %c0_0 = arith.constant 0 : index
    %c0_1 = arith.constant 0 : index
    %0 = vector.load %arg2[%c0, %c0_0, %c0_1] : memref<2x1x64xf32, #tpu.memory_space<vmem>>, vector<2x1x64xf32>
    %cst = arith.constant dense<0.000000e+00> : vector<1x64xf32>
    %1 = vector.multi_reduction <add>, %0, %cst [0] : vector<2x1x64xf32> to vector<1x64xf32>
    %c0_2 = arith.constant 0 : index
    %c0_3 = arith.constant 0 : index
    %c0_4 = arith.constant 0 : index
    %2 = vector.load %arg3[%c0_2, %c0_3, %c0_4] : memref<2x1x64xf32, #tpu.memory_space<vmem>>, vector<2x1x64xf32>
    %cst_5 = arith.constant dense<0.000000e+00> : vector<1x64xf32>
    %3 = vector.multi_reduction <add>, %2, %cst_5 [0] : vector<2x1x64xf32> to vector<1x64xf32>
    %cst_6 = arith.constant 7.812500e-03 : f32
    %4 = vector.broadcast %cst_6 : f32 to vector<1x64xf32>
    %5 = arith.mulf %1, %4 : vector<1x64xf32>
    %cst_7 = arith.constant 7.812500e-03 : f32
    %6 = vector.broadcast %cst_7 : f32 to vector<1x64xf32>
    %7 = arith.mulf %3, %6 : vector<1x64xf32>
    %8 = arith.mulf %5, %5 : vector<1x64xf32>
    %9 = arith.subf %7, %8 : vector<1x64xf32>
    %c0_8 = arith.constant 0 : index
    %c0_9 = arith.constant 0 : index
    %10 = vector.load %arg4[%c0_8, %c0_9] : memref<1x64xf32, #tpu.memory_space<vmem>>, vector<1x64xf32>
    %cst_10 = arith.constant 9.99999974E-6 : f32
    %11 = vector.broadcast %cst_10 : f32 to vector<1x64xf32>
    %12 = arith.addf %9, %11 : vector<1x64xf32>
    %13 = math.rsqrt %12 : vector<1x64xf32>
    %14 = arith.mulf %10, %13 : vector<1x64xf32>
    %c0_11 = arith.constant 0 : index
    %c0_12 = arith.constant 0 : index
    %15 = vector.load %arg5[%c0_11, %c0_12] : memref<1x64xf32, #tpu.memory_space<vmem>>, vector<1x64xf32>
    %16 = arith.mulf %5, %14 : vector<1x64xf32>
    %17 = arith.subf %15, %16 : vector<1x64xf32>
    %c0_13 = arith.constant 0 : index
    %c0_14 = arith.constant 0 : index
    %c0_15 = arith.constant 0 : index
    %18 = vector.load %arg1[%c0_13, %c0_14, %c0_15] : memref<1x64x64xf32, #tpu.memory_space<vmem>>, vector<1x64x64xf32>
    %19 = vector.shape_cast %18 : vector<1x64x64xf32> to vector<64x64xf32>
    %20 = vector.broadcast %14 : vector<1x64xf32> to vector<64x64xf32>
    %21 = arith.mulf %19, %20 : vector<64x64xf32>
    %22 = vector.broadcast %17 : vector<1x64xf32> to vector<64x64xf32>
    %23 = arith.addf %21, %22 : vector<64x64xf32>
    %c0_16 = arith.constant 0 : index
    %c0_17 = arith.constant 0 : index
    %c0_18 = arith.constant 0 : index
    %24 = vector.load %arg6[%c0_16, %c0_17, %c0_18] : memref<1x64x64xbf16, #tpu.memory_space<vmem>>, vector<1x64x64xbf16>
    %25 = vector.shape_cast %24 : vector<1x64x64xbf16> to vector<64x64xbf16>
    %26 = arith.extf %25 : vector<64x64xbf16> to vector<64x64xf32>
    %27 = arith.addf %23, %26 : vector<64x64xf32>
    %cst_19 = arith.constant 0.000000e+00 : f32
    %28 = vector.broadcast %cst_19 : f32 to vector<64x64xf32>
    %29 = arith.maximumf %27, %28 : vector<64x64xf32>
    %30 = arith.truncf %29 : vector<64x64xf32> to vector<64x64xbf16>
    %c0_20 = arith.constant 0 : index
    %c0_21 = arith.constant 0 : index
    %c0_22 = arith.constant 0 : index
    %31 = vector.load %arg7[%c0_20, %c0_21, %c0_22] : memref<1x64x64xbf16, #tpu.memory_space<vmem>>, vector<1x64x64xbf16>
    %32 = vector.shape_cast %31 : vector<1x64x64xbf16> to vector<64x64xbf16>
    %33 = vector.shape_cast %30 : vector<64x64xbf16> to vector<1x64x64xbf16>
    tpu.vector_store %arg7[%c0_20, %c0_21, %c0_22], %33 {strides = array<i32>} : memref<1x64x64xbf16, #tpu.memory_space<vmem>>, vector<1x64x64xbf16>,
    return
  }
  func.func @transform_0(%arg0: i32) -> (i32, i32, i32) {
    %c0_i32 = arith.constant 0 : i32
    %c0_i32_0 = arith.constant 0 : i32
    %c0_i32_1 = arith.constant 0 : i32
    return %arg0, %c0_i32, %c0_i32_0 : i32, i32, i32
  }
  func.func @transform_1(%arg0: i32) -> (i32, i32, i32) {
    %c0_i32 = arith.constant 0 : i32
    %c0_i32_0 = arith.constant 0 : i32
    %c0_i32_1 = arith.constant 0 : i32
    %c0_i32_2 = arith.constant 0 : i32
    return %c0_i32, %c0_i32_0, %c0_i32_1 : i32, i32, i32
  }
  func.func @transform_2(%arg0: i32) -> (i32, i32, i32) {
    %c0_i32 = arith.constant 0 : i32
    %c0_i32_0 = arith.constant 0 : i32
    %c0_i32_1 = arith.constant 0 : i32
    %c0_i32_2 = arith.constant 0 : i32
    return %c0_i32, %c0_i32_0, %c0_i32_1 : i32, i32, i32
  }
  func.func @transform_3(%arg0: i32) -> (i32, i32) {
    %c0_i32 = arith.constant 0 : i32
    %c0_i32_0 = arith.constant 0 : i32
    %c0_i32_1 = arith.constant 0 : i32
    return %c0_i32, %c0_i32_0 : i32, i32
  }
  func.func @transform_4(%arg0: i32) -> (i32, i32) {
    %c0_i32 = arith.constant 0 : i32
    %c0_i32_0 = arith.constant 0 : i32
    %c0_i32_1 = arith.constant 0 : i32
    return %c0_i32, %c0_i32_0 : i32, i32
  }
  func.func @transform_5(%arg0: i32) -> (i32, i32, i32) {
    %c0_i32 = arith.constant 0 : i32
    %c0_i32_0 = arith.constant 0 : i32
    %c0_i32_1 = arith.constant 0 : i32
    return %arg0, %c0_i32, %c0_i32_0 : i32, i32, i32
  }
  func.func @transform_6(%arg0: i32) -> (i32, i32, i32) {
    %c0_i32 = arith.constant 0 : i32
    %c0_i32_0 = arith.constant 0 : i32
    %c0_i32_1 = arith.constant 0 : i32
    return %arg0, %c0_i32, %c0_i32_0 : i32, i32, i32
  }
}

</mosaic_0001>

<bundles_post_ra>
// kernel: _lambda_.11
= control target key start
LH: loop header
LB: loop body
LE: loop exit
PB: predicated region body
PF: predicated region fallthrough
CT: control target
= control target key end

     0   :  { %s464_s18 = smov 0   ;;  %s511_s0 = inlined_call_operand.vmem [shape: f32[2,64,64], index: 0, kind: input, shape index: {}]   ;;  %s512_s1 = inlined_call_operand.vmem [shape: f32[2,1,64], index: 1, kind: input, shape index: {}]   ;;  %s513_s2 = inlined_call_operand.vmem [shape: f32[2,1,64], index: 2, kind: input, shape index: {}]   ;;  %s514_s3 = inlined_call_operand.vmem [shape: f32[1,64], index: 3, kind: input, shape index: {}]   ;;  %s515_s4 = inlined_call_operand.vmem [shape: f32[1,64], index: 4, kind: input, shape index: {}]   ;;  %s516_s5 = inlined_call_operand.vmem [shape: bf16[2,64,64], index: 5, kind: output, shape index: {}]  }
   0x1 LB: > { %s387_s19 = sadd.s32 4294967295, %s432_s18   ;;  %p391_p0 = scmp.ge.s32.totalorder %s432_s18, 1  ;;  %s432_s18 = sphi %s464_s18, %s15_s18  }
   0x2   : > { %p187_p1 = scmp.lt.s32.totalorder %s432_s18, 3 }
   0x4   : > { %p188_p2 = pnand %p391_p0, %p187_p1 }
   0x5   : > { %v225_v0 = vld [vmem:[%s512_s1] sm:$0x1] (!%p188_p2)  ;;  %v226_v1 = vld [vmem:[%s512_s1 + $0x1] sm:$0x1] (!%p188_p2)  ;;  %vm227_vm0 = vcmask (!%p188_p2), 516096   ;;  %p215_p3 = scmp.lt.s32.totalorder (!%p188_p2), %s387_s19, 1  ;;  %v256_v15 = vlaneseq (!%p188_p2) }
   0x6   : > { %191 = sbr.rel (%p188_p2) target bundleno = 46 (0x2e), region = 40  ;;  %v228_v2 = vsel (!%p188_p2), %vm227_vm0, %v225_v0, 0.0  ;;  %v229_v3 = vsel (!%p188_p2), %vm227_vm0, %v226_v1, 0.0  ;;  %v231_v4 = vld [vmem:[%s513_s2] sm:$0x1] (!%p188_p2)  ;;  %vm323_vm1 = vcmask (!%p188_p2), 519168  }
   0x7   : > { %v232_v5 = vld [vmem:[%s513_s2 + $0x1] sm:$0x1] (!%p188_p2)  ;;  %v230_v6 = vadd.f32 (!%p188_p2), %v229_v3, %v228_v2  ;;  %v233_v7 = vsel (!%p188_p2), %vm227_vm0, %v231_v4, 0.0  ;;  %v257_v16 = vshrl.u32 (!%p188_p2), %v256_v15, 7  ;;  %v240_v17 = vld [vmem:[%s514_s3] sm:$0x1] (!%p188_p2) }
   0x8   : > { %v234_v8 = vsel (!%p188_p2), %vm227_vm0, %v232_v5, 0.0  ;;  %v244_v21 = vld [vmem:[%s515_s4] sm:$0x1] (!%p188_p2) }
   0x9   : > { %v235_v9 = vadd.f32 (!%p188_p2), %v234_v8, %v233_v7  ;;  %v236_v10 = vmul.f32 (!%p188_p2), 0.0078125, %v230_v6  ;;  %v258_v18 = vsub.s32 (!%p188_p2), 0, %v257_v16 }
   0xb   : > { %v237_v11 = vmul.f32 (!%p188_p2), 0.0078125, %v235_v9  ;;  %v238_v12 = vmul.f32 (!%p188_p2), %v236_v10, %v236_v10 }
   0xd   : > { %v239_v13 = vsub.f32 %v237_v11, %v238_v12  ;;  %s518_s19 = smov (!%p215_p3, %s387_s19), 1 }
   0xe   : > { %s406_s28 = sshll.u32 %s518_s19, 6  ;;  %s407_s11 = sshll.u32 %s518_s19, 5 }
   0xf   : > { %v241_v14 = vadd.f32 1e-05, %v239_v13  ;;  %s219_s6 = scalar_lea.vmem %s511_s0, %s406_s28  ;;  %s224_s14 = scalar_lea.vmem %s516_s5, %s407_s11 }
  0x10   : > { %v247_v22 = vld [vmem:[%s219_s6] sm:$0xff]  ;;  %v248_v23 = vld [vmem:[%s219_s6 + $0x8] sm:$0xff]  ;;  %v249_v24 = vld [vmem:[%s219_s6 + $0x10] sm:$0xff] }
  0x11   : > { %424 = vrsqrt.f32 %v241_v14  ;;  %v250_v25 = vld [vmem:[%s219_s6 + $0x18] sm:$0xff]  ;;  %v251_v28 = vld [vmem:[%s219_s6 + $0x20] sm:$0xff]  ;;  %v252_v29 = vld [vmem:[%s219_s6 + $0x28] sm:$0xff] }
  0x12   : > { %v253_v30 = vld [vmem:[%s219_s6 + $0x30] sm:$0xff]  ;;  %v254_v31 = vld [vmem:[%s219_s6 + $0x38] sm:$0xff] }
  0x1b   : > { %v425_v19 = vpop.eup %424 }
  0x1c   : > { %v243_v20 = vmul.f32 %v425_v19, %v240_v17 }
  0x1e   : > { %v245_v26 = vmul.f32 %v243_v20, %v236_v10  ;;  %v259_v27 = vrot.slane %v243_v20, %v258_v18 }
  0x20   : > { %v246_v32 = vsub.f32 %v244_v21, %v245_v26  ;;  %v261_v33 = vmul.f32 %v259_v27, %v247_v22  ;;  %v262_v34 = vmul.f32 %v259_v27, %v248_v23  ;;  %v263_v35 = vmul.f32 %v259_v27, %v249_v24 }
  0x21   : > { %v264_v36 = vmul.f32 %v259_v27, %v250_v25  ;;  %v265_v37 = vmul.f32 %v259_v27, %v251_v28  ;;  %v266_v38 = vmul.f32 %v259_v27, %v252_v29  ;;  %v267_v39 = vmul.f32 %v259_v27, %v253_v30 }
  0x22   : > { %v273_v40 = vrot.slane %v246_v32, %v258_v18  ;;  %v268_v41 = vmul.f32 %v259_v27, %v254_v31 }
  0x24   : > { %v275_v42 = vadd.f32 %v273_v40, %v261_v33  ;;  %v276_v43 = vadd.f32 %v273_v40, %v262_v34  ;;  %v277_v44 = vadd.f32 %v273_v40, %v263_v35  ;;  %v278_v45 = vadd.f32 %v273_v40, %v264_v36 }
  0x25   : > { %v279_v46 = vadd.f32 %v273_v40, %v265_v37  ;;  %v280_v47 = vadd.f32 %v273_v40, %v266_v38  ;;  %v281_v48 = vadd.f32 %v273_v40, %v267_v39  ;;  %v282_v49 = vadd.f32 %v273_v40, %v268_v41 }
  0x26   : > { %v283_v50 = vmax.f32 %v275_v42, 0.0  ;;  %v284_v51 = vmax.f32 %v276_v43, 0.0  ;;  %v285_v52 = vmax.f32 %v277_v44, 0.0  ;;  %v286_v53 = vmax.f32 %v278_v45, 0.0 }
  0x27   : > { %v287_v54 = vmax.f32 %v279_v46, 0.0  ;;  %v288_v55 = vmax.f32 %v280_v47, 0.0  ;;  %v289_v56 = vmax.f32 %v281_v48, 0.0  ;;  %v290_v57 = vmax.f32 %v282_v49, 0.0 }
  0x28   : > { %v408_v58 = vpack.c.bf16 %v283_v50, %v283_v50  ;;  %v409_v59 = vpack.c.bf16 %v284_v51, %v284_v51  ;;  %v410_v60 = vpack.c.bf16 %v285_v52, %v285_v52  ;;  %v411_v61 = vpack.c.bf16 %v286_v53, %v286_v53 }
  0x29   : > { %v412_v62 = vpack.c.bf16 %v287_v54, %v287_v54  ;;  %v413_v63 = vpack.c.bf16 %v288_v55, %v288_v55  ;;  %v414_v0 = vpack.c.bf16 %v289_v56, %v289_v56  ;;  %v415_v1 = vpack.c.bf16 %v290_v57, %v290_v57 }
  0x2a   : > { %324 = vst.msk [vmem:[%s224_s14] sm:$0xf] %vm323_vm1, %v408_v58  ;;  %325 = vst.msk [vmem:[%s224_s14 + $0x4] sm:$0xf] %vm323_vm1, %v409_v59 }
  0x2b   : > { %326 = vst.msk [vmem:[%s224_s14 + $0x8] sm:$0xf] %vm323_vm1, %v410_v60  ;;  %327 = vst.msk [vmem:[%s224_s14 + $0xc] sm:$0xf] %vm323_vm1, %v411_v61 }
  0x2c   : > { %328 = vst.msk [vmem:[%s224_s14 + $0x10] sm:$0xf] %vm323_vm1, %v412_v62  ;;  %329 = vst.msk [vmem:[%s224_s14 + $0x14] sm:$0xf] %vm323_vm1, %v413_v63 }
  0x2d   : > { %330 = vst.msk [vmem:[%s224_s14 + $0x18] sm:$0xf] %vm323_vm1, %v414_v0  ;;  %331 = vst.msk [vmem:[%s224_s14 + $0x1c] sm:$0xf] %vm323_vm1, %v415_v1 }
  0x2e PF: > { %s15_s18 = sadd.s32 1, %s432_s18  }
  0x2f   : > { %p12_p4 = scmp.ge.s32.totalorder %s15_s18, 4  }
  0x31   :  { %14 = sbr.rel (!%p12_p4) target bundleno = 1 (0x1), region = 70 }

// kernel: _lambda_.10
= control target key start
LH: loop header
LB: loop body
LE: loop exit
PB: predicated region body
PF: predicated region fallthrough
CT: control target
= control target key end

     0   :  { %s2770_s24 = smov 0   ;;  %s3441_s0 = inlined_call_operand.vmem [shape: bf16[2,88,32], index: 0, kind: input, shape index: {}]   ;;  %s3442_s1 = inlined_call_operand.vmem [shape: bf16[2,88,32], index: 1, kind: input, shape index: {}]   ;;  %s3443_s2 = inlined_call_operand.vmem [shape: bf16[2,88,32], index: 2, kind: input, shape index: {}]   ;;  %s3444_s3 = inlined_call_operand.vmem [shape: bf16[2,88,32], index: 3, kind: input, shape index: {}]   ;;  %s3445_s4 = inlined_call_operand.vmem [shape: bf16[3,3,32,64], index: 4, kind: input, shape index: {}]   ;;  %s3446_s5 = inlined_call_operand.vmem [shape: f32[2,72,64], index: 5, kind: output, shape index: {0}]   ;;  %s3447_s6 = inlined_call_operand.vmem [shape: f32[2,1,64], index: 6, kind: output, shape index: {1}]   ;;  %s3448_s7 = inlined_call_operand.vmem [shape: f32[2,1,64], index: 7, kind: output, shape index: {2}]  }
   0x1 LB: > { %s2069_s25 = sadd.s32 4294967295, %s2726_s24   ;;  %p2073_p0 = scmp.ge.s32.totalorder %s2726_s24, 1  ;;  %s2726_s24 = sphi %s2770_s24, %s18_s24  }
   0x2   : > { %p272_p1 = scmp.lt.s32.totalorder %s2726_s24, 3 }
   0x4   : > { %p273_p2 = pnand %p2073_p0, %p272_p1 }
   0x5   : > { %v2670_v0 = vld [vmem:[%s3445_s4 + $0x10] sm:$0xff] (!%p273_p2)   ;;  %v2728_v1 = vmov (!%p273_p2), 0.0   ;;  %v2786_v2 = vld [vmem:[%s3445_s4 + $0x40] sm:$0xff] (!%p273_p2)   ;;  %v2672_v3 = vld [vmem:[%s3445_s4 + $0x18] sm:$0xff] (!%p273_p2)   ;;  %vm2729_vm0 = vmmov (!%p273_p2), 0   ;;  %p325_p3 = scmp.lt.s32.totalorder (!%p273_p2), %s2069_s25, 1 }
   0x6   : > { %276 = sbr.rel (%p273_p2) target bundleno = 428 (0x1ac), region = 40  ;;  %2271 = vmatprep.subr.bf16.mxu1 (!%p273_p2), %v2728_v1  ;;  %2367 = vmatprep.subr.bf16.mxu0 (!%p273_p2), %v2728_v1  ;;  %v2798_v4 = vld [vmem:[%s3445_s4 + $0x48] sm:$0xff] (!%p273_p2)   ;;  %v2676_v5 = vld [vmem:[%s3445_s4 + $0x50] sm:$0xff] (!%p273_p2)   ;;  %vm442_vm1 = vcmask (!%p273_p2), 261120   ;;  %v2680_v6 = vld [vmem:[%s3445_s4] sm:$0xff] (!%p273_p2)   ;;  %vm1552_vm3 = vcmask (!%p273_p2), 1046528  }
   0x7   : > { %2272 = vmatpush3.bf16.msra.mxu1 (!%p273_p2), %v2670_v0  ;;  %2275 = vmatprep.mubr.msk.bf16.mxu1 (!%p273_p2), %vm2729_vm0, %v2728_v1  ;;  %v2681_v14 = vld [vmem:[%s3445_s4 + $0x58] sm:$0xff] (!%p273_p2)   ;;  %v2690_v29 = vld [vmem:[%s3445_s4 + $0x8] sm:$0xff] (!%p273_p2)   ;;  %vm660_vm2 = vsmask.f32 (!%p273_p2), 7424  ;;  %v2689_v46 = vld [vmem:[%s3445_s4 + $0x60] sm:$0xff] (!%p273_p2)   ;;  %vm1670_vm12 = vcmask (!%p273_p2), 523264  }
   0x8   : > { %2368 = vmatpush3.bf16.msra.mxu0 (!%p273_p2), %v2786_v2  ;;  %2273 = vmatprep.subr.bf16.mxu1 (!%p273_p2), %v2728_v1  ;;  %v2696_v54 = vld [vmem:[%s3445_s4 + $0x68] sm:$0xff] (!%p273_p2)  }
   0x9   : > { %2369 = vmatprep.subr.bf16.mxu0 (!%p273_p2), %v2728_v1  ;;  %2371 = vmatprep.mubr.msk.bf16.mxu0 (!%p273_p2), %vm2729_vm0, %v2728_v1 }
   0xb   : > { %2274 = vmatpush3.bf16.msra.mxu1 (!%p273_p2), %v2672_v3 }
   0xc   : > { %2370 = vmatpush3.bf16.msra.mxu0 (!%p273_p2), %v2798_v4  ;;  %2295 = vmatprep.subr.bf16.mxu1 (!%p273_p2), %v2728_v1 }
   0xd   : > { %s3468_s25 = smov (!%p325_p3, %s2069_s25), 1  ;;  %2391 = vmatprep.subr.bf16.mxu0 %v2728_v1 }
   0xe   : > { %s2806_s11 = smul.u32 44, %s3468_s25  ;;  %s355_s20 = scalar_lea.vmem %s3448_s7, %s3468_s25 }
  0x10   : > { %s2817_s16 = scalar_lea.vmem %s3442_s1, %s2806_s11  ;;  %s2823_s19 = scalar_lea.vmem %s3444_s3, %s2806_s11 }
  0x11   : > { %v368_v7 = vld [vmem:[%s2817_s16] sm:$0xf]  ;;  %v369_v8 = vld [vmem:[%s2817_s16 + $0x4] sm:$0xf]  ;;  %v370_v11 = vld [vmem:[%s2817_s16 + $0x8] sm:$0xf]  ;;  %s2851_s28 = scalar_lea.vmem %s3443_s2, %s2806_s11  ;;  %s2907_s13 = scalar_lea.vmem %s3441_s0, %s2806_s11 }
  0x12   : > { %v2083_v9 = vcombine.low %v368_v7, %v369_v8  ;;  %v2675_v10 = vld [vmem:[%s2823_s19] sm:$0xff]   ;;  %v2183_v12 = vcombine.low %v369_v8, %v370_v11  ;;  %v371_v13 = vld [vmem:[%s2817_s16 + $0xc] sm:$0xf]  ;;  %v372_v15 = vld [vmem:[%s2817_s16 + $0x10] sm:$0xf] }
  0x13   : > { %2372 = vmatmul.mubr.msk.bf16.vlgmr.msra.gmra.mrb[0].mxu0 %vm442_vm1, %v2675_v10  ;;  %v2184_v18 = vcombine.low %v371_v13, %v372_v15  ;;  %v2679_v19 = vld [vmem:[%s2823_s19 + $0x8] sm:$0xff]   ;;  %v373_v20 = vld [vmem:[%s2817_s16 + $0x14] sm:$0xf]  ;;  %v374_v21 = vld [vmem:[%s2817_s16 + $0x18] sm:$0xf]  ;;  %v2084_v25 = vcombine.low %v370_v11, %v371_v13 }
  0x14   : > { %2276 = vmatmul.mubr.msk.bf16.vlgmr.msra.gmra.mrb[0].mxu1 %vm442_vm1, %v2083_v9  ;;  %2392 = vmatpush3.bf16.msra.mxu0 %v2676_v5  ;;  %v1401_v16 = vshrl.u32 %v2183_v12, 16  ;;  %v1403_v17 = vshll.u32 %v2183_v12, 16  ;;  %v2854_v24 = vcombine.low %v373_v20, %v374_v21  ;;  %v375_v26 = vld [vmem:[%s2817_s16 + $0x1c] sm:$0xf]  ;;  %v2859_v28 = vld [vmem:[%s2851_s28] sm:$0xff]   ;;  %v2881_v34 = vld [vmem:[%s2851_s28 + $0x8] sm:$0xff]   ;;  %v2085_v36 = vcombine.low %v372_v15, %v373_v20 }
  0x15   : > { %2279 = vmatprep.mubr.msk.bf16.mxu1 %vm2729_vm0, %v2728_v1  ;;  %2375 = vmatprep.mubr.msk.bf16.mxu0 %vm2729_vm0, %v2728_v1  ;;  %v1408_v23 = vshll.u32 %v2184_v18, 16  ;;  %v2865_v30 = vld [vmem:[%s2817_s16 + $0x20] sm:$0xf]  ;;  %v1086_v35 = vshll.u32 %v2859_v28, 16  ;;  %v2684_v37 = vld [vmem:[%s2823_s19 + $0x10] sm:$0xff]   ;;  %v1084_v38 = vshrl.u32 %v2859_v28, 16  ;;  %v2086_v44 = vcombine.low %v374_v21, %v375_v26 }
  0x16   : > { %2296 = vmatpush3.bf16.msra.mxu1 %v2680_v6  ;;  %v1405_v22 = vrot.slane %v1403_v17, 1  ;;  %2393 = vmatprep.subr.bf16.mxu0 %v2728_v1  ;;  %v2869_v32 = vcombine.low %v375_v26, %v2865_v30  ;;  %v1090_v40 = vshll.u32 %v2881_v34, 16  ;;  %v2895_v43 = vld [vmem:[%s2851_s28 + $0x10] sm:$0xff]   ;;  %v1094_v47 = vshrl.u32 %v2881_v34, 16  ;;  %v2913_v51 = vld [vmem:[%s2851_s28 + $0x18] sm:$0xff]   ;;  %v2936_v63 = vld [vmem:[%s2817_s16 + $0x24] sm:$0xff]   ;;  %s352_s16 = scalar_lea.vmem %s3447_s6, %s3468_s25 }
  0x17   : > { %2297 = vmatprep.subr.bf16.mxu1 %v2728_v1  ;;  %v1410_v27 = vrot.slane %v1408_v23, 1  ;;  %v1088_v39 = vrot.slane %v1086_v35, 1  ;;  %v1097_v48 = vshll.u32 %v2895_v43, 16  ;;  %v1412_v49 = vshrl.u32 %v2184_v18, 16  ;;  %v358_v56 = vld [vmem:[%s2907_s13 + $0x4] sm:$0xf] }
  0x18   : > { %2394 = vmatpush3.bf16.msra.mxu0 %v2681_v14  ;;  %v1406_v31 = vor.u32 %v1405_v22, %v1401_v16  ;;  %v1092_v42 = vrot.slane %v1090_v40, 1  ;;  %v1416_v50 = vshll.u32 %v2854_v24, 16  ;;  %v2925_v57 = vld [vmem:[%s2907_s13 + $0x8] sm:$0xf]  ;;  %v2928_v58 = vld [vmem:[%s2907_s13 + $0xc] sm:$0xf]  ;;  %v2087_v0 = vcombine.low %v2865_v30, %v2865_v30 }
  0x19   : > { %2415 = vmatprep.subr.bf16.mxu0 %v2728_v1  ;;  %v1089_v41 = vor.u32 %v1088_v39, %v1084_v38  ;;  %v1099_v53 = vrot.slane %v1097_v48, 1  ;;  %v1414_v55 = vor.u32 %v1412_v49, %v1410_v27  ;;  %v2931_v59 = vld [vmem:[%s2907_s13 + $0x10] sm:$0xf]  ;;  %v1101_v60 = vshrl.u32 %v2895_v43, 16  ;;  %v2942_v5 = vld [vmem:[%s2851_s28 + $0x20] sm:$0xf] }
  0x1a   : > { %2298 = vmatpush3.bf16.msra.mxu1 %v2690_v29  ;;  %v2872_v33 = vsel %vm660_vm2, %v1406_v31, %v1410_v27  ;;  %v1096_v52 = vor.u32 %v1094_v47, %v1092_v42  ;;  %v1418_v61 = vrot.slane %v1416_v50, 1  ;;  %v1420_v62 = vshrl.u32 %v2854_v24, 16  ;;  %v388_v6 = vld [vmem:[%s2851_s28 + $0x24] sm:$0xf]  ;;  %v362_v10 = vld [vmem:[%s2907_s13 + $0x14] sm:$0xf] }
  0x1b   : > { %2376 = vmatmul.mubr.msk.bf16.gmra.mrb[4].mxu0 %vm442_vm1, %v2679_v19  ;;  %2319 = vmatprep.subr.bf16.mxu1 %v2728_v1  ;;  %v1093_v45 = vsel %vm660_vm2, %v1089_v41, %v1092_v42  ;;  %v1104_v3 = vshll.u32 %v2913_v51, 16  ;;  %v1424_v7 = vshll.u32 %v2869_v32, 16  ;;  %v2948_v9 = vcombine.low %v358_v56, %v2925_v57  ;;  %v2956_v12 = vld [vmem:[%s2907_s13 + $0x18] sm:$0xf]  ;;  %v2959_v13 = vld [vmem:[%s2907_s13 + $0x1c] sm:$0xf] }
  0x1c   : > { %2280 = vmatmul.mubr.msk.bf16.gmra.mrb[4].mxu1 %vm442_vm1, %v2084_v25  ;;  %2379 = vmatprep.mubr.msk.bf16.mxu0 %vm2729_vm0, %v2728_v1  ;;  %v1100_v8 = vsel %vm660_vm2, %v1096_v52, %v1099_v53  ;;  %v2953_v11 = vcombine.low %v2928_v58, %v2931_v59  ;;  %v2962_v14 = vsel %vm660_vm2, %v1414_v55, %v1418_v61  ;;  %v2965_v15 = vld [vmem:[%s2907_s13 + $0x20] sm:$0xf]  ;;  %v1428_v18 = vshrl.u32 %v2869_v32, 16  ;;  %v2981_v23 = vld [vmem:[%s2907_s13 + $0x24] sm:$0xf] }
  0x1d   : > { %2283 = vmatprep.mubr.msk.bf16.mxu1 %vm2729_vm0, %v2728_v1  ;;  %v1422_v16 = vor.u32 %v1420_v62, %v1418_v61  ;;  %v1426_v17 = vrot.slane %v1424_v7, 1  ;;  %v1432_v19 = vshll.u32 %v2936_v63, 16  ;;  %v2971_v20 = vcombine.low %v362_v10, %v2956_v12  ;;  %v367_v24 = vld [vmem:[%s2907_s13 + $0x28] sm:$0xf]  ;;  %v357_v30 = vld [vmem:[%s2907_s13] sm:$0xf] }
  0x1e   : > { %v2975_v21 = vcombine.low %v2959_v13, %v2965_v15  ;;  %v1553_v22 = vrot.slane %v2948_v9, 1  ;;  %v1554_v29 = vrot.slane %v2953_v11, 1  ;;  %v1103_v31 = vor.u32 %v1101_v60, %v1099_v53  ;;  %v2700_v49 = vld [vmem:[%s3445_s4 + $0x20] sm:$0xff]  }
  0x1f   : > { %v2985_v25 = vsel %vm660_vm2, %v1422_v16, %v1426_v17  ;;  %v1430_v26 = vor.u32 %v1428_v18, %v1426_v17  ;;  %v2987_v27 = vrot.slane %v1432_v19, 1  ;;  %v1106_v32 = vrot.slane %v1104_v3, 1  ;;  %v2709_v18 = vld [vmem:[%s3445_s4 + $0x78] sm:$0xff]  }
  0x20   : > { %v2155_v35 = vcombine.low %v2942_v5, %v388_v6  ;;  %v3002_v38 = vsel %vm1552_vm3, %v1553_v22, %v1554_v29  ;;  %v1558_v39 = vrot.slane %v2975_v21, 1  ;;  %v3006_v40 = vcombine.low %v2981_v23, %v367_v24 }
  0x21   : > { %v3011_v42 = vcombine.low %v357_v30, %v358_v56  ;;  %v3040_v55 = vcombine.low %v2925_v57, %v2928_v58  ;;  %v1242_v61 = vshll.u32 %v2948_v9, 16  ;;  %v3053_v57 = vcombine.low %v2931_v59, %v362_v10 }
  0x22   : > { %v1112_v47 = vshll.u32 %v2155_v35, 16  ;;  %v1560_v48 = vrot.slane %v3006_v40, 1  ;;  %v1116_v60 = vshrl.u32 %v2155_v35, 16  ;;  %v1240_v62 = vshrl.u32 %v2948_v9, 16  ;;  %v2706_v9 = vld [vmem:[%s3445_s4 + $0x70] sm:$0xff]  }
  0x23   : > { %2380 = vmatmul.mubr.msk.bf16.gmra.mrb[8].mxu0 %vm442_vm1, %v2684_v37  ;;  %v2999_v37 = vsel %vm660_vm2, %v1430_v26, %v2987_v27  ;;  %v1247_v3 = vshll.u32 %v2953_v11, 16  ;;  %v3066_v7 = vcombine.low %v2956_v12, %v2959_v13  ;;  %v1251_v10 = vshrl.u32 %v2953_v11, 16 }
  0x24   : > { %2284 = vmatmul.mubr.msk.bf16.gmra.mrb[8].mxu1 %vm442_vm1, %v2085_v36  ;;  %2395 = vmatprep.mubr.msk.bf16.mxu0 %vm2729_vm0, %v2728_v1  ;;  %v1556_v36 = vrot.slane %v2971_v20, 1  ;;  %v3025_v50 = vsel %vm1552_vm3, %v1558_v39, %v1560_v48  ;;  %v1114_v53 = vrot.slane %v1112_v47, 1  ;;  %v1255_v16 = vshll.u32 %v2971_v20, 16 }
  0x25   : > { %2287 = vmatprep.mubr.msk.bf16.mxu1 %vm2729_vm0, %v2728_v1  ;;  %v1249_v59 = vrot.slane %v1247_v3, 1  ;;  %v663_v17 = vshll.u32 %v3011_v42, 16  ;;  %v667_v11 = vshll.u32 %v3040_v55, 16  ;;  %v2099_v19 = vcombine.low %v2965_v15, %v2965_v15 }
  0x26   : > { %v3009_v41 = vsel %vm1552_vm3, %v1554_v29, %v1556_v36  ;;  %v1118_v58 = vor.u32 %v1116_v60, %v1114_v53  ;;  %v1257_v13 = vrot.slane %v1255_v16, 1  ;;  %v661_v22 = vshrl.u32 %v3011_v42, 16 }
  0x27   : > { %v1253_v12 = vor.u32 %v1251_v10, %v1249_v59  ;;  %v665_v26 = vrot.slane %v663_v17, 1  ;;  %v1259_v29 = vshrl.u32 %v2971_v20, 16  ;;  %v1263_v30 = vshll.u32 %v2975_v21, 16 }
  0x28   : > { %v671_v20 = vshrl.u32 %v3040_v55, 16  ;;  %v1271_v47 = vshll.u32 %v3006_v40, 16 }
  0x29   : > { %v1258_v24 = vsel %vm660_vm2, %v1253_v12, %v1257_v13  ;;  %v1261_v35 = vor.u32 %v1259_v29, %v1257_v13  ;;  %v2715_v12 = vld [vmem:[%s3445_s4 + $0x88] sm:$0xff]  }
  0x2b   : > { %2396 = vmatmul.mubr.msk.bf16.vlgmr.msra.gmra.mrb[0].mxu0 %vm442_vm1, %v1093_v45  ;;  %v1107_v45 = vsel %vm660_vm2, %v1103_v31, %v1106_v32  ;;  %v669_v31 = vrot.slane %v667_v11, 1 }
  0x2c   : > { %2288 = vmatmul.mubr.msk.bf16.gmra.mrb[12].mxu1 %vm442_vm1, %v2086_v44  ;;  %2416 = vmatpush3.bf16.msra.mxu0 %v2689_v46  ;;  %v3014_v44 = vsel %vm1552_vm3, %v1556_v36, %v1558_v39  ;;  %v1108_v46 = vshrl.u32 %v2913_v51, 16  ;;  %v1265_v36 = vrot.slane %v1263_v30, 1  ;;  %v674_v39 = vshll.u32 %v3053_v57, 16 }
  0x2d   : > { %2291 = vmatprep.mubr.msk.bf16.mxu1 %vm2729_vm0, %v2728_v1  ;;  %2399 = vmatprep.mubr.msk.bf16.mxu0 %vm2729_vm0, %v2728_v1 }
  0x2e   : > { %2417 = vmatprep.subr.bf16.mxu0 %v2728_v1  ;;  %v1110_v52 = vor.u32 %v1108_v46, %v1106_v32  ;;  %v666_v32 = vor.u32 %v665_v26, %v661_v22  ;;  %v1267_v46 = vshrl.u32 %v2975_v21, 16  ;;  %v1273_v21 = vrot.slane %v1271_v47, 1 }
  0x30   : > { %2418 = vmatpush3.bf16.msra.mxu0 %v2696_v54  ;;  %v2707_v54 = vld [vmem:[%s3445_s4 + $0x28] sm:$0xff]   ;;  %v1115_v56 = vsel %vm660_vm2, %v1110_v52, %v1114_v53  ;;  %v673_v52 = vor.u32 %v671_v20, %v669_v31  ;;  %v676_v53 = vrot.slane %v674_v39, 1 }
  0x31   : > { %2439 = vmatprep.subr.bf16.mxu0 %v2728_v1 }
  0x33   : > { %2400 = vmatmul.mubr.msk.bf16.gmra.mrb[4].mxu0 %vm442_vm1, %v1100_v8 }
  0x34   : > { %2292 = vmatmul.mubr.msk.bf16.gmra.mrb[16].mxu1 %vm442_vm1, %v2087_v0  ;;  %2403 = vmatprep.mubr.msk.bf16.mxu0 %vm2729_vm0, %v2728_v1  ;;  %v1244_v0 = vrot.slane %v1242_v61, 1  ;;  %v678_v61 = vshrl.u32 %v3053_v57, 16 }
  0x35   : > { %2299 = vmatprep.mubr.msk.bf16.mxu1 %vm2729_vm0, %v2728_v1 }
  0x36   : > { %v1245_v6 = vor.u32 %v1244_v0, %v1240_v62  ;;  %v1275_v62 = vshrl.u32 %v3006_v40, 16  ;;  %v680_v0 = vor.u32 %v678_v61, %v676_v53 }
  0x38   : > { %v1250_v8 = vsel %vm660_vm2, %v1245_v6, %v1249_v59  ;;  %v1277_v6 = vor.u32 %v1275_v62, %v1273_v21 }
  0x3b   : > { %2404 = vmatmul.mubr.msk.bf16.gmra.mrb[8].mxu0 %vm442_vm1, %v1107_v45  ;;  %v1266_v45 = vsel %vm660_vm2, %v1261_v35, %v1265_v36 }
  0x3c   : > { %2300 = vmatmul.mubr.msk.bf16.vlgmr.msra.gmra.mrb[0].mxu1 %vm442_vm1, %v3011_v42  ;;  %2407 = vmatprep.mubr.msk.bf16.mxu0 %vm2729_vm0, %v2728_v1  ;;  %v670_v42 = vsel %vm660_vm2, %v666_v32, %v669_v31 }
  0x3d   : > { %2303 = vmatprep.mubr.msk.bf16.mxu1 %vm2729_vm0, %v2728_v1  ;;  %2320 = vmatpush3.bf16.msra.mxu1 %v2700_v49  ;;  %v2711_v49 = vld [vmem:[%s3445_s4 + $0x30] sm:$0xff]  }
  0x3e   : > { %2321 = vmatprep.subr.bf16.mxu1 %v2728_v1 }
  0x41   : > { %2322 = vmatpush3.bf16.msra.mxu1 %v2707_v54  ;;  %v1269_v54 = vor.u32 %v1267_v46, %v1265_v36 }
  0x42   : > { %2343 = vmatprep.subr.bf16.mxu1 %v2728_v1 }
  0x43   : > { %2408 = vmatmul.mubr.msk.bf16.gmra.mrb[12].mxu0 %vm442_vm1, %v1115_v56  ;;  %v677_v56 = vsel %vm660_vm2, %v673_v52, %v676_v53  ;;  %v1274_v60 = vsel %vm660_vm2, %v1269_v54, %v1273_v21 }
  0x44   : > { %2304 = vmatmul.mubr.msk.bf16.gmra.mrb[4].mxu1 %vm442_vm1, %v3040_v55  ;;  %2411 = vmatprep.mubr.msk.bf16.mxu0 %vm2729_vm0, %v2728_v1  ;;  %v2714_v55 = vld [vmem:[%s3445_s4 + $0x38] sm:$0xff]  }
  0x45   : > { %2307 = vmatprep.mubr.msk.bf16.mxu1 %vm2729_vm0, %v2728_v1 }
  0x4b   : > { %2412 = vmatmul.mubr.msk.bf16.gmra.mrb[16].mxu0 %vm442_vm1, %v1118_v58  ;;  %v681_v58 = vshll.u32 %v3066_v7, 16 }
  0x4c   : > { %2308 = vmatmul.mubr.msk.bf16.gmra.mrb[8].mxu1 %vm442_vm1, %v3053_v57  ;;  %2419 = vmatprep.mubr.msk.bf16.mxu0 %vm2729_vm0, %v2728_v1  ;;  %v2111_v57 = vcombine.low %v2965_v15, %v2981_v23  ;;  %v2713_v23 = vld [vmem:[%s3445_s4 + $0x80] sm:$0xff]  }
  0x4d   : > { %2311 = vmatprep.mubr.msk.bf16.mxu1 %vm2729_vm0, %v2728_v1  ;;  %v683_v3 = vrot.slane %v681_v58, 1 }
  0x4f   : > { %v684_v59 = vsel %vm660_vm2, %v680_v0, %v683_v3 }
  0x53   : > { %2420 = vmatmul.mubr.msk.bf16.vlgmr.msra.gmra.mrb[0].mxu0 %vm442_vm1, %v1250_v8  ;;  %v685_v8 = vshrl.u32 %v3066_v7, 16 }
  0x54   : > { %2312 = vmatmul.mubr.msk.bf16.gmra.mrb[12].mxu1 %vm442_vm1, %v3066_v7  ;;  %2440 = vmatpush3.bf16.msra.mxu0 %v2706_v9  ;;  %v689_v9 = vshll.u32 %v2111_v57, 16  ;;  %v693_v7 = vshrl.u32 %v2111_v57, 16 }
  0x55   : > { %2315 = vmatprep.mubr.msk.bf16.mxu1 %vm2729_vm0, %v2728_v1  ;;  %2423 = vmatprep.mubr.msk.bf16.mxu0 %vm2729_vm0, %v2728_v1  ;;  %v687_v10 = vor.u32 %v685_v8, %v683_v3 }
  0x56   : > { %2441 = vmatprep.subr.bf16.mxu0 %v2728_v1  ;;  %v691_v16 = vrot.slane %v689_v9, 1 }
  0x58   : > { %2442 = vmatpush3.bf16.msra.mxu0 %v2709_v18  ;;  %v692_v15 = vsel %vm660_vm2, %v687_v10, %v691_v16  ;;  %v695_v13 = vor.u32 %v693_v7, %v691_v16 }
  0x59   : > { %2463 = vmatprep.subr.bf16.mxu0 %v2728_v1 }
  0x5b   : > { %2424 = vmatmul.mubr.msk.bf16.gmra.mrb[4].mxu0 %vm442_vm1, %v1258_v24 }
  0x5c   : > { %2316 = vmatmul.mubr.msk.bf16.gmra.mrb[16].mxu1 %vm442_vm1, %v2099_v19  ;;  %2427 = vmatprep.mubr.msk.bf16.mxu0 %vm2729_vm0, %v2728_v1 }
  0x5d   : > { %2323 = vmatprep.mubr.msk.bf16.mxu1 %vm2729_vm0, %v2728_v1 }
  0x63   : > { %2428 = vmatmul.mubr.msk.bf16.gmra.mrb[8].mxu0 %vm442_vm1, %v1266_v45 }
  0x64   : > { %2324 = vmatmul.mubr.msk.bf16.vlgmr.msra.gmra.mrb[0].mxu1 %vm442_vm1, %v670_v42  ;;  %2431 = vmatprep.mubr.msk.bf16.mxu0 %vm2729_vm0, %v2728_v1 }
  0x65   : > { %2327 = vmatprep.mubr.msk.bf16.mxu1 %vm2729_vm0, %v2728_v1  ;;  %2344 = vmatpush3.bf16.msra.mxu1 %v2711_v49 }
  0x66   : > { %2345 = vmatprep.subr.bf16.mxu1 %v2728_v1 }
  0x69   : > { %2346 = vmatpush3.bf16.msra.mxu1 %v2714_v55 }
  0x6a   : > { %2487 = vmatprep.subr.bf16.mxu1 %v2728_v1 }
  0x6b   : > { %2432 = vmatmul.mubr.msk.bf16.gmra.mrb[12].mxu0 %vm442_vm1, %v1274_v60 }
  0x6c   : > { %2328 = vmatmul.mubr.msk.bf16.gmra.mrb[4].mxu1 %vm442_vm1, %v677_v56  ;;  %2435 = vmatprep.mubr.msk.bf16.mxu0 %vm2729_vm0, %v2728_v1 }
  0x6d   : > { %2331 = vmatprep.mubr.msk.bf16.mxu1 %vm2729_vm0, %v2728_v1 }
  0x73   : > { %2436 = vmatmul.mubr.msk.bf16.gmra.mrb[16].mxu0 %vm442_vm1, %v1277_v6 }
  0x74   : > { %2332 = vmatmul.mubr.msk.bf16.gmra.mrb[8].mxu1 %vm442_vm1, %v684_v59  ;;  %2443 = vmatprep.mubr.msk.bf16.mxu0 %vm2729_vm0, %v2728_v1 }
  0x75   : > { %2335 = vmatprep.mubr.msk.bf16.mxu1 %vm2729_vm0, %v2728_v1 }
  0x7b   : > { %2444 = vmatmul.mubr.msk.bf16.vlgmr.msra.gmra.mrb[0].mxu0 %vm442_vm1, %v2872_v33  ;;  %v2718_v33 = vld [vmem:[%s2823_s19 + $0x18] sm:$0xff]  }
  0x7c   : > { %2336 = vmatmul.mubr.msk.bf16.gmra.mrb[12].mxu1 %vm442_vm1, %v692_v15  ;;  %2464 = vmatpush3.bf16.msra.mxu0 %v2713_v23 }
  0x7d   : > { %2339 = vmatprep.mubr.msk.bf16.mxu1 %vm2729_vm0, %v2728_v1  ;;  %2447 = vmatprep.mubr.msk.bf16.mxu0 %vm2729_vm0, %v2728_v1 }
  0x7e   : > { %2465 = vmatprep.subr.bf16.mxu0 %v2728_v1 }
  0x80   : > { %2466 = vmatpush3.bf16.msra.mxu0 %v2715_v12 }
  0x83   : > { %2448 = vmatmul.mubr.msk.bf16.gmra.mrb[4].mxu0 %vm442_vm1, %v2962_v14 }
  0x84   : > { %2340 = vmatmul.mubr.msk.bf16.gmra.mrb[16].mxu1 %vm442_vm1, %v695_v13  ;;  %2451 = vmatprep.mubr.msk.bf16.mxu0 %vm2729_vm0, %v2728_v1 }
  0x85   : > { %2347 = vmatprep.mubr.msk.bf16.mxu1 %vm2729_vm0, %v2728_v1 }
  0x8b   : > { %2452 = vmatmul.mubr.msk.bf16.gmra.mrb[8].mxu0 %vm442_vm1, %v2985_v25 }
  0x8c   : > { %2348 = vmatmul.mubr.msk.bf16.vlgmr.msra.gmra.mrb[0].mxu1 %vm442_vm1, %v2859_v28  ;;  %2455 = vmatprep.mubr.msk.bf16.mxu0 %vm2729_vm0, %v2728_v1  ;;  %v1436_v28 = vshrl.u32 %v2936_v63, 16 }
  0x8d   : > { %2351 = vmatprep.mubr.msk.bf16.mxu1 %vm2729_vm0, %v2728_v1  ;;  %2489 = vmatpush3.bf16.msra.mxu1 %v2786_v2 }
  0x8e   : > { %2488 = vmatprep.subr.bf16.mxu1 %v2728_v1  ;;  %v1438_v2 = vor.u32 %v1436_v28, %v2987_v27 }
  0x91   : > { %2490 = vmatpush3.bf16.msra.mxu1 %v2798_v4  ;;  %v2127_v4 = vcombine.low %v2942_v5, %v2942_v5 }
  0x93   : > { %2456 = vmatmul.mubr.msk.bf16.gmra.mrb[12].mxu0 %vm442_vm1, %v2999_v37 }
  0x94   : > { %2352 = vmatmul.mubr.msk.bf16.gmra.mrb[4].mxu1 %vm442_vm1, %v2881_v34  ;;  %2459 = vmatprep.mubr.msk.bf16.mxu0 %vm2729_vm0, %v2728_v1  ;;  %v2719_v34 = vld [vmem:[%s2823_s19 + $0x20] ss:$0 sps:$4 sm:$0xff]   ;;  %s2641_s19 = smul.u32 72, %s3468_s25 }
  0x95   : > { %2355 = vmatprep.mubr.msk.bf16.mxu1 %vm2729_vm0, %v2728_v1 }
  0x96   : > { %s3306_s11 = scalar_lea.vmem %s3446_s5, %s2641_s19 }
  0x9b   : > { %2460 = vmatmul.mubr.msk.bf16.gmra.mrb[16].mxu0 %vm442_vm1, %v1438_v2 }
  0x9c   : > { %2356 = vmatmul.mubr.msk.bf16.gmra.mrb[8].mxu1 %vm442_vm1, %v2895_v43  ;;  %2467 = vmatprep.mubr.msk.bf16.mxu0 %vm2729_vm0, %v2728_v1  ;;  %v1680_v43 = vlaneseq }
  0x9d   : > { %2359 = vmatprep.mubr.msk.bf16.mxu1 %vm2729_vm0, %v2728_v1 }
  0xa3   : > { %2468 = vmatmul.mubr.msk.bf16.vlgmr.msra.gmra.mrb[0].mxu0 %vm442_vm1, %v3002_v38 }
  0xa4   : > { %2360 = vmatmul.mubr.msk.bf16.gmra.mrb[12].mxu1 %vm442_vm1, %v2913_v51  ;;  %2471 = vmatprep.mubr.msk.bf16.mxu0 %vm2729_vm0, %v2728_v1  ;;  %v3225_v51 = vshrl.u32 %v1680_v43, 7 }
  0xa5   : > { %2363 = vmatprep.mubr.msk.bf16.mxu1 %vm2729_vm0, %v2728_v1 }
  0xa6   : > { %v1682_v63 = vadd.s32 8, %v3225_v51  ;;  %v3229_v5 = vmul.u32.u64.low 3817748708, %v3225_v51  ;;  %v3230_v14 = vmul.u32.u64.high 3817748708, %v3225_v51, %v3229_v5  ;;  %v1683_v37 = vadd.s32 16, %v3225_v51 }
  0xa7   : > { %v1684_v40 = vadd.s32 24, %v3225_v51  ;;  %v1685_v22 = vadd.s32 32, %v3225_v51  ;;  %v3251_v24 = vadd.s32 40, %v3225_v51  ;;  %v3268_v52 = vadd.s32 48, %v3225_v51 }
  0xa8   : > { %v3232_v25 = vmul.u32.u64.low 3817748708, %v1682_v63  ;;  %v3233_v27 = vmul.u32.u64.high 3817748708, %v1682_v63, %v3232_v25  ;;  %v3273_v55 = vadd.s32 56, %v3225_v51  ;;  %v3301_v28 = vadd.s32 64, %v3225_v51 }
  0xa9   : > { %v3246_v11 = vmul.u32.u64.low 3817748708, %v1684_v40  ;;  %v3247_v19 = vmul.u32.u64.high 3817748708, %v1684_v40, %v3246_v11  ;;  %v3255_v32 = vmul.u32.u64.low 3817748708, %v1685_v22  ;;  %v3256_v35 = vmul.u32.u64.high 3817748708, %v1685_v22, %v3255_v32 }
  0xaa   : > { %v1707_v18 = vshrl.u32 %v3233_v27, 3  ;;  %v3261_v20 = vmul.u32.u64.low 3817748708, %v3251_v24  ;;  %v3262_v39 = vmul.u32.u64.high 3817748708, %v3251_v24, %v3261_v20 }
  0xab   : > { %2472 = vmatmul.mubr.msk.bf16.gmra.mrb[4].mxu0 %vm442_vm1, %v3009_v41  ;;  %v1729_v49 = vshrl.u32 %v3247_v19, 3  ;;  %v1740_v61 = vshrl.u32 %v3256_v35, 3  ;;  %v3284_v3 = vmul.u32.u64.low 3817748708, %v3268_v52  ;;  %v3285_v57 = vmul.u32.u64.high 3817748708, %v3268_v52, %v3284_v3 }
  0xac   : > { %2364 = vmatmul.mubr.msk.bf16.gmra.mrb[16].mxu1 %vm442_vm1, %v2127_v4  ;;  %2475 = vmatprep.mubr.msk.bf16.mxu0 %vm2729_vm0, %v2728_v1  ;;  %v1708_v31 = vmul.u32 9, %v1707_v18  ;;  %v1751_v0 = vshrl.u32 %v3262_v39, 3  ;;  %v3293_v10 = vmul.u32.u64.low 3817748708, %v3273_v55  ;;  %v3294_v16 = vmul.u32.u64.high 3817748708, %v3273_v55, %v3293_v10 }
  0xad   : > { %2383 = vmatprep.mubr.msk.bf16.mxu1 %vm2729_vm0, %v2728_v1  ;;  %v1730_v60 = vmul.u32 9, %v1729_v49  ;;  %v1741_v7 = vmul.u32 9, %v1740_v61  ;;  %v1762_v25 = vshrl.u32 %v3285_v57, 3 }
  0xae   : > { %v1709_v47 = vsub.s32 %v1682_v63, %v1708_v31  ;;  %v1752_v12 = vmul.u32 9, %v1751_v0 }
  0xaf   : > { %v1731_v23 = vsub.s32 %v1684_v40, %v1730_v60  ;;  %v3309_v43 = vsub.s32 %v1685_v22, %v1741_v7  ;;  %v1763_v22 = vmul.u32 9, %v1762_v25 }
  0xb0   : > { %vm1790_vm6 = vcmp.ne.s32.totalorder %v1709_v47, 0  ;;  %vm1799_vm7 = vcmp.lt.s32.totalorder %v1709_v47, 0  ;;  %v1817_v59 = vadd.s32 9, %v1709_v47 }
  0xb1   : > { %vm3288_vm9 = vmand %vm1799_vm7, %vm1790_vm6  ;;  %vm1792_vm14 = vcmp.ne.s32.totalorder %v1731_v23, 0  ;;  %vm1801_vm15 = vcmp.lt.s32.totalorder %v1731_v23, 0  ;;  %v1819_v5 = vadd.s32 9, %v1731_v23  ;;  %vm1793_vm3 = vcmp.ne.s32.totalorder %v3309_v43, 0 }
  0xb2   : > { %v1826_v13 = vsel %vm3288_vm9, %v1817_v59, %v1709_v47  ;;  %vm3329_vm2 = vmand %vm1801_vm15, %vm1792_vm14 }
  0xb3   : > { %2476 = vmatmul.mubr.msk.bf16.gmra.mrb[8].mxu0 %vm442_vm1, %v3014_v44 }
  0xb4   : > { %2384 = vmatmul.mubr.msk.bf16.vlgmr.msra.gmra.mrb[12].mxu1 %vm442_vm1, %v2718_v33  ;;  %2479 = vmatprep.mubr.msk.bf16.mxu0 %vm2729_vm0, %v2728_v1 }
  0xb5   : > { %2387 = vmatprep.mubr.msk.bf16.mxu1 %vm2729_vm0, %v2728_v1 }
  0xbb   : > { %2480 = vmatmul.mubr.msk.bf16.gmra.mrb[12].mxu0 %vm442_vm1, %v3025_v50  ;;  %v3242_v50 = vmul.u32.u64.low 3817748708, %v1683_v37  ;;  %v3243_v17 = vmul.u32.u64.high 3817748708, %v1683_v37, %v3242_v50 }
  0xbc   : > { %2388 = vmatmul.mubr.msk.bf16.gmra.mrb[16].mxu1 %vm442_vm1, %v2719_v34  ;;  %2483 = vmatprep.mubr.msk.bf16.mxu0 %vm2729_vm0, %v2728_v1  ;;  %vm1835_vm0 = vcmp.lt.s32.totalorder %v1826_v13, 8  ;;  %v1773_v50 = vshrl.u32 %v3294_v16, 3 }
  0xbd   : > { %v1718_v46 = vshrl.u32 %v3243_v17, 3 }
  0xbe   : > { %v1774_v35 = vmul.u32 9, %v1773_v50 }
  0xbf   : > { %v1719_v53 = vmul.u32 9, %v1718_v46  ;;  %v1820_v46 = vadd.s32 9, %v3309_v43 }
  0xc0   : > { %v1775_v3 = vsub.s32 %v3273_v55, %v1774_v35 }
  0xc1   : > { %v1720_v8 = vsub.s32 %v1683_v37, %v1719_v53  ;;  %v1764_v53 = vsub.s32 %v3268_v52, %v1763_v22 }
  0xc2   : > { %vm1796_vm15 = vcmp.ne.s32.totalorder %v1775_v3, 0  ;;  %v1823_v63 = vadd.s32 9, %v1775_v3 }
  0xc3   : > { %2484 = vmatmul.mubr.msk.bf16.gmra.mrb[16].mxu0 %vm442_vm1, %v1560_v48  ;;  %v1696_v48 = vshrl.u32 %v3230_v14, 3  ;;  %vm1791_vm10 = vcmp.ne.s32.totalorder %v1720_v8, 0  ;;  %vm1800_vm11 = vcmp.lt.s32.totalorder %v1720_v8, 0  ;;  %v1818_v4 = vadd.s32 9, %v1720_v8 }
  0xc4   : > { %vm3313_vm1 = vmand %vm1800_vm11, %vm1791_vm10  ;;  %v3318_v14 = vsub.s32 %v3251_v24, %v1752_v12  ;;  %vm1795_vm11 = vcmp.ne.s32.totalorder %v1764_v53, 0 }
  0xc5   : > { %v1697_v26 = vmul.u32 9, %v1696_v48  ;;  %v1827_v18 = vsel %vm3313_vm1, %v1818_v4, %v1720_v8 }
  0xc6   : > { %vm1803_vm6 = vcmp.lt.s32.totalorder %v3318_v14, 0  ;;  %vm1836_vm7 = vcmp.lt.s32.totalorder %v1827_v18, 8  ;;  %v1821_v47 = vadd.s32 9, %v3318_v14 }
  0xc7   : > { %v1698_v45 = vsub.s32 %v3225_v51, %v1697_v26  ;;  %v1828_v26 = vsel %vm3329_vm2, %v1819_v5, %v1731_v23 }
  0xc8   : > { %vm1837_vm9 = vcmp.lt.s32.totalorder %v1828_v26, 8 }
  0xc9   : > { %vm1789_vm4 = vcmp.ne.s32.totalorder %v1698_v45, 0  ;;  %vm1798_vm5 = vcmp.lt.s32.totalorder %v1698_v45, 0  ;;  %v1816_v21 = vadd.s32 9, %v1698_v45 }
  0xca   : > { %vm3278_vm8 = vmand %vm1798_vm5, %vm1789_vm4  ;;  %vm1802_vm4 = vcmp.lt.s32.totalorder %v3309_v43, 0  ;;  %vm1794_vm5 = vcmp.ne.s32.totalorder %v3318_v14, 0 }
  0xcb   : > { %v1825_v15 = vsel %vm3278_vm8, %v1816_v21, %v1698_v45  ;;  %vm3353_vm8 = vmand %vm1802_vm4, %vm1793_vm3 }
  0xcc   : > { %vm1834_vm13 = vcmp.lt.s32.totalorder %v1825_v15, 8  ;;  %vm3363_vm10 = vmand %vm1803_vm6, %vm1794_vm5  ;;  %v1829_v52 = vsel %vm3353_vm8, %v1820_v46, %v3309_v43 }
  0xcd   : > { %vm1838_vm14 = vcmp.lt.s32.totalorder %v1829_v52, 8 }
 0x15f   : > { %v3236_v38 = vpop.f32.mrb[0].mxu1 }
 0x160   : > { %v2349_v1 = vpop.f32.mrb[1].mxu1 }
 0x161   : > { %v3239_v41 = vpop.f32.mrb[2].mxu1  ;;  %v3325_v1 = vmul.u32.u64.low 3817748708, %v3301_v28  ;;  %v3326_v40 = vmul.u32.u64.high 3817748708, %v3301_v28, %v3325_v1 }
 0x162   : > { %v2350_v44 = vpop.f32.mrb[3].mxu1 }
 0x163   : > { %v1784_v61 = vshrl.u32 %v3326_v40, 3 }
 0x165   : > { %v1785_v16 = vmul.u32 9, %v1784_v61 }
 0x167   : > { %v3253_v29 = vpop.f32.mrb[4].mxu1 }
 0x168   : > { %v2353_v30 = vpop.f32.mrb[5].mxu1 }
 0x169   : > { %v3258_v36 = vpop.f32.mrb[6].mxu1 }
 0x16a   : > { %v2354_v42 = vpop.f32.mrb[7].mxu1 }
 0x16f   : > { %v3270_v54 = vpop.f32.mrb[8].mxu1 }
 0x170   : > { %v2357_v56 = vpop.f32.mrb[9].mxu1 }
 0x171   : > { %v3276_v58 = vpop.f32.mrb[10].mxu1 }
 0x172   : > { %v2358_v6 = vpop.f32.mrb[11].mxu1 }
 0x176   : > { %v1623_v2 = vpop.f32.mrb[0].mxu0 }
 0x177   : > { %v2491_v33 = vadd.f32 %v1623_v2, %v3236_v38  ;;  %v2469_v34 = vpop.f32.mrb[1].mxu0 }
 0x178   : > { %v1626_v51 = vpop.f32.mrb[2].mxu0 }
 0x179   : > { %1671 = vst.msk [vmem:[%s3306_s11] sm:$0xff] %vm1670_vm12, %v2491_v33  ;;  %v1861_v27 = vsel %vm1834_vm13, %v2491_v33, 0.0  ;;  %v2492_v37 = vadd.f32 %v1626_v51, %v3239_v41  ;;  %v2470_v38 = vpop.f32.mrb[3].mxu0  ;;  %vm1804_vm13 = vcmp.lt.s32.totalorder %v1764_v53, 0  ;;  %v1822_v33 = vadd.s32 9, %v1764_v53 }
 0x17a   : > { %v1895_v44 = vmul.f32 %v1861_v27, %v1861_v27  ;;  %v1870_v41 = vsel %vm1670_vm12, %v1861_v27, 0.0  ;;  %vm3388_vm2 = vmand %vm1804_vm13, %vm1795_vm11 }
 0x17b   : > { %1672 = vst.msk [vmem:[%s3306_s11 + $0x8] sm:$0xff] %vm1670_vm12, %v2492_v37  ;;  %v1862_v17 = vsel %vm1835_vm0, %v2492_v37, 0.0  ;;  %vm1805_vm0 = vcmp.lt.s32.totalorder %v1775_v3, 0  ;;  %v1786_v37 = vsub.s32 %v3301_v28, %v1785_v16 }
 0x17c   : > { %v1871_v11 = vsel %vm1670_vm12, %v1862_v17, 0.0  ;;  %v1896_v19 = vmul.f32 %v1862_v17, %v1862_v17  ;;  %v1904_v30 = vsel %vm1670_vm12, %v1895_v44, 0.0  ;;  %vm3397_vm3 = vmand %vm1805_vm0, %vm1796_vm15 }
 0x17d   : > { %v1872_v24 = vadd.f32 %v1871_v11, %v1870_v41  ;;  %v1832_v18 = vsel %vm3397_vm3, %v1823_v63, %v1775_v3  ;;  %vm1797_vm4 = vcmp.ne.s32.totalorder %v1786_v37, 0  ;;  %vm1806_vm5 = vcmp.lt.s32.totalorder %v1786_v37, 0 }
 0x17e   : > { %v1905_v31 = vsel %vm1670_vm12, %v1896_v19, 0.0  ;;  %v1631_v32 = vpop.f32.mrb[4].mxu0  ;;  %vm3412_vm8 = vmand %vm1806_vm5, %vm1797_vm4 }
 0x17f   : > { %v1906_v20 = vadd.f32 %v1905_v31, %v1904_v30  ;;  %v2493_v39 = vadd.f32 %v1631_v32, %v3253_v29  ;;  %v2473_v42 = vpop.f32.mrb[5].mxu0  ;;  %v1824_v32 = vadd.s32 9, %v1786_v37 }
 0x180   : > { %v1634_v49 = vpop.f32.mrb[6].mxu0 }
 0x181   : > { %1673 = vst.msk [vmem:[%s3306_s11 + $0x10] sm:$0xff] %vm1670_vm12, %v2493_v39  ;;  %v1863_v21 = vsel %vm1836_vm7, %v2493_v39, 0.0  ;;  %v2494_v56 = vadd.f32 %v1634_v49, %v3258_v36  ;;  %v2474_v60 = vpop.f32.mrb[7].mxu0  ;;  %v1830_v36 = vsel %vm3363_vm10, %v1821_v47, %v3318_v14  ;;  %vm1841_vm7 = vcmp.lt.s32.totalorder %v1832_v18, 8 }
 0x182   : > { %v1873_v62 = vsel %vm1670_vm12, %v1863_v21, 0.0  ;;  %v1897_v0 = vmul.f32 %v1863_v21, %v1863_v21  ;;  %vm1839_vm1 = vcmp.lt.s32.totalorder %v1830_v36, 8  ;;  %vm1893_vm10 = vcmask 516096  }
 0x183   : > { %v1874_v57 = vadd.f32 %v1873_v62, %v1872_v24  ;;  %1674 = vst.msk [vmem:[%s3306_s11 + $0x18] sm:$0xff] %vm1670_vm12, %v2494_v56  ;;  %v1864_v6 = vsel %vm1837_vm9, %v2494_v56, 0.0  ;;  %v1833_v56 = vsel %vm3412_vm8, %v1824_v32, %v1786_v37 }
 0x184   : > { %v1907_v59 = vsel %vm1670_vm12, %v1897_v0, 0.0  ;;  %v1875_v8 = vsel %vm1670_vm12, %v1864_v6, 0.0  ;;  %v1898_v9 = vmul.f32 %v1864_v6, %v1864_v6  ;;  %vm1842_vm9 = vcmp.lt.s32.totalorder %v1833_v56, 8 }
 0x185   : > { %v1908_v10 = vadd.f32 %v1907_v59, %v1906_v20  ;;  %v1876_v55 = vadd.f32 %v1875_v8, %v1874_v57 }
 0x186   : > { %v1909_v15 = vsel %vm1670_vm12, %v1898_v9, 0.0  ;;  %v1639_v7 = vpop.f32.mrb[8].mxu0 }
 0x187   : > { %v1053_v23 = vpop.f32.mrb[12].mxu1  ;;  %v1910_v12 = vadd.f32 %v1909_v15, %v1908_v10  ;;  %v2495_v13 = vadd.f32 %v1639_v7, %v3270_v54  ;;  %v2477_v4 = vpop.f32.mrb[9].mxu0 }
 0x188   : > { %v2385_v2 = vpop.f32.mrb[13].mxu1  ;;  %v1642_v43 = vpop.f32.mrb[10].mxu0 }
 0x189   : > { %v1056_v34 = vpop.f32.mrb[14].mxu1  ;;  %1675 = vst.msk [vmem:[%s3306_s11 + $0x20] sm:$0xff] %vm1670_vm12, %v2495_v13  ;;  %v1865_v5 = vsel %vm1838_vm14, %v2495_v13, 0.0  ;;  %v2496_v14 = vadd.f32 %v1642_v43, %v3276_v58  ;;  %v2478_v25 = vpop.f32.mrb[11].mxu0  ;;  %v1831_v58 = vsel %vm3388_vm2, %v1822_v33, %v1764_v53 }
 0x18a   : > { %v2386_v54 = vpop.f32.mrb[15].mxu1  ;;  %v1877_v38 = vsel %vm1670_vm12, %v1865_v5, 0.0  ;;  %v1899_v1 = vmul.f32 %v1865_v5, %v1865_v5  ;;  %vm1840_vm6 = vcmp.lt.s32.totalorder %v1831_v58, 8 }
 0x18b   : > { %v1878_v40 = vadd.f32 %v1877_v38, %v1876_v55  ;;  %1676 = vst.msk [vmem:[%s3306_s11 + $0x28] sm:$0xff] %vm1670_vm12, %v2496_v14  ;;  %v1866_v44 = vsel %vm1839_vm1, %v2496_v14, 0.0 }
 0x18c   : > { %v1911_v48 = vsel %vm1670_vm12, %v1899_v1, 0.0  ;;  %v1879_v50 = vsel %vm1670_vm12, %v1866_v44, 0.0  ;;  %v1900_v17 = vmul.f32 %v1866_v44, %v1866_v44 }
 0x18d   : > { %v1912_v41 = vadd.f32 %v1911_v48, %v1910_v12  ;;  %v1880_v28 = vadd.f32 %v1879_v50, %v1878_v40 }
 0x18e   : > { %v1913_v11 = vsel %vm1670_vm12, %v1900_v17, 0.0  ;;  %v1647_v22 = vpop.f32.mrb[12].mxu0 }
 0x18f   : > { %v1061_v19 = vpop.f32.mrb[16].mxu1  ;;  %v1914_v24 = vadd.f32 %v1913_v11, %v1912_v41  ;;  %v2497_v26 = vadd.f32 %v1647_v22, %v1053_v23  ;;  %v2481_v31 = vpop.f32.mrb[13].mxu0 }
 0x190   : > { %v2389_v30 = vpop.f32.mrb[17].mxu1  ;;  %v1650_v20 = vpop.f32.mrb[14].mxu0 }
 0x191   : > { %v1064_v35 = vpop.f32.mrb[18].mxu1  ;;  %1677 = vst.msk [vmem:[%s3306_s11 + $0x30] sm:$0xff] %vm1670_vm12, %v2497_v26  ;;  %v1867_v42 = vsel %vm1840_vm6, %v2497_v26, 0.0  ;;  %v2498_v45 = vadd.f32 %v1650_v20, %v1056_v34  ;;  %v2482_v47 = vpop.f32.mrb[15].mxu0 }
 0x192   : > { %v2390_v46 = vpop.f32.mrb[19].mxu1  ;;  %v1881_v49 = vsel %vm1670_vm12, %v1867_v42, 0.0  ;;  %v1901_v29 = vmul.f32 %v1867_v42, %v1867_v42 }
 0x193   : > { %v1882_v53 = vadd.f32 %v1881_v49, %v1880_v28  ;;  %1678 = vst.msk [vmem:[%s3306_s11 + $0x38] sm:$0xff] %vm1670_vm12, %v2498_v45  ;;  %v1868_v21 = vsel %vm1841_vm7, %v2498_v45, 0.0 }
 0x194   : > { %v1915_v60 = vsel %vm1670_vm12, %v1901_v29, 0.0  ;;  %v1883_v61 = vsel %vm1670_vm12, %v1868_v21, 0.0  ;;  %v1902_v62 = vmul.f32 %v1868_v21, %v1868_v21 }
 0x195   : > { %v1916_v0 = vadd.f32 %v1915_v60, %v1914_v24  ;;  %v1884_v3 = vadd.f32 %v1883_v61, %v1882_v53 }
 0x196   : > { %v1917_v57 = vsel %vm1670_vm12, %v1902_v62, 0.0  ;;  %v1655_v6 = vpop.f32.mrb[16].mxu0 }
 0x197   : > { %v1918_v52 = vadd.f32 %v1917_v57, %v1916_v0  ;;  %v2499_v36 = vadd.f32 %v1655_v6, %v1061_v19  ;;  %v2485_v59 = vpop.f32.mrb[17].mxu0 }
 0x198   : > { %v1658_v8 = vpop.f32.mrb[18].mxu0 }
 0x199   : > { %1679 = vst.msk [vmem:[%s3306_s11 + $0x40] sm:$0xff] %vm1670_vm12, %v2499_v36  ;;  %v1869_v9 = vsel %vm1842_vm9, %v2499_v36, 0.0  ;;  %v2486_v10 = vpop.f32.mrb[19].mxu0 }
 0x19a   : > { %v1885_v55 = vsel %vm1670_vm12, %v1869_v9, 0.0  ;;  %v1903_v16 = vmul.f32 %v1869_v9, %v1869_v9 }
 0x19b   : > { %v1886_v15 = vadd.f32 %v1885_v55, %v1884_v3 }
 0x19c   : > { %v1919_v23 = vsel %vm1670_vm12, %v1903_v16, 0.0 }
 0x19d   : > { %v1887_v7 = vrot.slane %v1886_v15, 4  ;;  %v1920_v12 = vadd.f32 %v1919_v23, %v1918_v52 }
 0x19f   : > { %v1888_v13 = vadd.f32 %v1887_v7, %v1886_v15  ;;  %v1921_v2 = vrot.slane %v1920_v12, 4 }
 0x1a1   : > { %v1889_v4 = vrot.slane %v1888_v13, 2  ;;  %v1922_v33 = vadd.f32 %v1921_v2, %v1920_v12 }
 0x1a3   : > { %v1890_v34 = vadd.f32 %v1889_v4, %v1888_v13  ;;  %v1923_v43 = vrot.slane %v1922_v33, 2 }
 0x1a5   : > { %v1891_v51 = vrot.slane %v1890_v34, 1  ;;  %v1924_v63 = vadd.f32 %v1923_v43, %v1922_v33 }
 0x1a7   : > { %v1892_v5 = vadd.f32 %v1891_v51, %v1890_v34  ;;  %v1925_v14 = vrot.slane %v1924_v63, 1 }
 0x1a9   : > { %1894 = vst.msk [vmem:[%s352_s16] sm:$0x1] %vm1893_vm10, %v1892_v5  ;;  %v1926_v54 = vadd.f32 %v1925_v14, %v1924_v63 }
 0x1ab   : > { %1927 = vst.msk [vmem:[%s355_s20] sm:$0x1] %vm1893_vm10, %v1926_v54 }
 0x1ac PF: > { %s18_s24 = sadd.s32 1, %s2726_s24  }
 0x1ad   : > { %p15_p4 = scmp.ge.s32.totalorder %s18_s24, 4  }
 0x1af   :  { %17 = sbr.rel (!%p15_p4) target bundleno = 1 (0x1), region = 111 }

// kernel: _lambda_.13
= control target key start
LH: loop header
LB: loop body
LE: loop exit
PB: predicated region body
PF: predicated region fallthrough
CT: control target
= control target key end

     0   :  { %s597_s15 = smov 0   ;;  %s656_s0 = inlined_call_operand.vmem [shape: bf16[2,64,32], index: 0, kind: input, shape index: {}]   ;;  %s657_s1 = inlined_call_operand.vmem [shape: bf16[1,1,32,64], index: 1, kind: input, shape index: {}]   ;;  %s658_s2 = inlined_call_operand.vmem [shape: f32[2,64,64], index: 2, kind: output, shape index: {0}]   ;;  %s659_s3 = inlined_call_operand.vmem [shape: f32[2,1,64], index: 3, kind: output, shape index: {1}]   ;;  %s660_s4 = inlined_call_operand.vmem [shape: f32[2,1,64], index: 4, kind: output, shape index: {2}]  }
   0x1 LB: > { %s505_s16 = sadd.s32 4294967295, %s570_s15   ;;  %p509_p0 = scmp.ge.s32.totalorder %s570_s15, 1  ;;  %s570_s15 = sphi %s597_s15, %s15_s15  }
   0x2   : > { %p167_p1 = scmp.lt.s32.totalorder %s570_s15, 3 }
   0x4   : > { %p168_p2 = pnand %p509_p0, %p167_p1 }
   0x5   : > { %v558_v0 = vld [vmem:[%s657_s1] sm:$0xff] (!%p168_p2)   ;;  %p199_p3 = scmp.lt.s32.totalorder (!%p168_p2), %s505_s16, 1  ;;  %v559_v1 = vld [vmem:[%s657_s1 + $0x8] sm:$0xff] (!%p168_p2)   ;;  %vm260_vm0 = vcmask (!%p168_p2), 261120   ;;  %vm338_vm1 = vcmask (!%p168_p2), 523264   ;;  %vm368_vm2 = vcmask (!%p168_p2), 516096  }
   0x6   : > { %171 = sbr.rel (%p168_p2) target bundleno = 263 (0x107), region = 28  ;;  %534 = vmatprep.subr.bf16.mxu0 (!%p168_p2), %v558_v0  ;;  %546 = vmatprep.subr.bf16.mxu1 (!%p168_p2), %v558_v0 }
   0x7   : > { %535 = vmatpush3.bf16.msra.mxu0 (!%p168_p2), %v558_v0  ;;  %548 = vmatpush3.bf16.msra.mxu1 (!%p168_p2), %v558_v0 }
   0x8   : > { %536 = vmatprep.subr.bf16.mxu0 (!%p168_p2), %v559_v1  ;;  %547 = vmatprep.subr.bf16.mxu1 (!%p168_p2), %v559_v1 }
   0xb   : > { %537 = vmatpush3.bf16.msra.mxu0 (!%p168_p2), %v559_v1  ;;  %549 = vmatpush3.bf16.msra.mxu1 (!%p168_p2), %v559_v1 }
   0xd   : > { %s662_s16 = smov (!%p199_p3, %s505_s16), 1 }
   0xe   : > { %s526_s21 = sshll.u32 %s662_s16, 5  ;;  %s527_s25 = sshll.u32 %s662_s16, 6 }
   0xf   : > { %s203_s24 = scalar_lea.vmem %s656_s0, %s526_s21  ;;  %s208_s28 = scalar_lea.vmem %s658_s2, %s527_s25 }
  0x10   : > { %v560_v2 = vld [vmem:[%s203_s24] sm:$0xff]   ;;  %v561_v3 = vld [vmem:[%s203_s24 + $0x8] sm:$0xff]   ;;  %v562_v4 = vld [vmem:[%s203_s24 + $0x10] sm:$0xff]   ;;  %s211_s5 = scalar_lea.vmem %s659_s3, %s662_s16  ;;  %s214_s8 = scalar_lea.vmem %s660_s4, %s662_s16 }
  0x11   : > { %538 = vmatprep.mubr.msk.bf16.mxu0 %vm260_vm0, %v560_v2  ;;  %v563_v5 = vld [vmem:[%s203_s24 + $0x18] sm:$0xff]   ;;  %542 = vmatprep.mubr.msk.bf16.mxu1 %vm260_vm0, %v562_v4 }
  0x12   : > { %539 = vmatmul.mubr.msk.bf16.vlgmr.msra.gmra.mrb[0].mxu0 %vm260_vm0, %v561_v3  ;;  %543 = vmatmul.mubr.msk.bf16.vlgmr.msra.gmra.mrb[0].mxu1 %vm260_vm0, %v563_v5 }
  0xe5   : > { %v540_v6 = vpop.f32.mrb[0].mxu0  ;;  %v544_v8 = vpop.f32.mrb[0].mxu1 }
  0xe6   : > { %341 = vst.msk [vmem:[%s208_s28 + $0x10] sm:$0xff] %vm338_vm1, %v540_v6  ;;  %v307_v7 = vpop.f32.mrb[1].mxu0  ;;  %345 = vst.msk [vmem:[%s208_s28 + $0x30] sm:$0xff] %vm338_vm1, %v544_v8  ;;  %v323_v11 = vpop.f32.mrb[1].mxu1  ;;  %v372_v14 = vmul.f32 %v540_v6, %v540_v6  ;;  %v350_v19 = vsel %vm338_vm1, %v540_v6, 0.0  ;;  %v376_v37 = vmul.f32 %v544_v8, %v544_v8  ;;  %v358_v41 = vsel %vm338_vm1, %v544_v8, 0.0 }
  0xe7   : > { %339 = vst.msk [vmem:[%s208_s28] sm:$0xff] %vm338_vm1, %v307_v7  ;;  %v370_v9 = vmul.f32 %v307_v7, %v307_v7  ;;  %v541_v10 = vpop.f32.mrb[2].mxu0  ;;  %343 = vst.msk [vmem:[%s208_s28 + $0x20] sm:$0xff] %vm338_vm1, %v323_v11  ;;  %v545_v13 = vpop.f32.mrb[2].mxu1  ;;  %v347_v15 = vsel %vm338_vm1, %v307_v7, 0.0  ;;  %v374_v24 = vmul.f32 %v323_v11, %v323_v11  ;;  %v354_v29 = vsel %vm338_vm1, %v323_v11, 0.0 }
  0xe8   : > { %342 = vst.msk [vmem:[%s208_s28 + $0x18] sm:$0xff] %vm338_vm1, %v541_v10  ;;  %v310_v12 = vpop.f32.mrb[3].mxu0  ;;  %346 = vst.msk [vmem:[%s208_s28 + $0x38] sm:$0xff] %vm338_vm1, %v545_v13  ;;  %v326_v18 = vpop.f32.mrb[3].mxu1  ;;  %v373_v22 = vmul.f32 %v541_v10, %v541_v10  ;;  %v381_v27 = vsel %vm338_vm1, %v372_v14, 0.0  ;;  %v352_v28 = vsel %vm338_vm1, %v541_v10, 0.0  ;;  %v377_v42 = vmul.f32 %v545_v13, %v545_v13 }
  0xe9   : > { %340 = vst.msk [vmem:[%s208_s28 + $0x8] sm:$0xff] %vm338_vm1, %v310_v12  ;;  %v348_v16 = vsel %vm338_vm1, %v310_v12, 0.0  ;;  %v371_v17 = vmul.f32 %v310_v12, %v310_v12  ;;  %344 = vst.msk [vmem:[%s208_s28 + $0x28] sm:$0xff] %vm338_vm1, %v326_v18  ;;  %v378_v21 = vsel %vm338_vm1, %v370_v9, 0.0  ;;  %v385_v33 = vsel %vm338_vm1, %v374_v24, 0.0 }
  0xea   : > { %v349_v20 = vadd.f32 %v348_v16, %v347_v15  ;;  %v383_v32 = vsel %vm338_vm1, %v373_v22, 0.0  ;;  %v375_v34 = vmul.f32 %v326_v18, %v326_v18  ;;  %v356_v38 = vsel %vm338_vm1, %v326_v18, 0.0 }
  0xeb   : > { %v379_v23 = vsel %vm338_vm1, %v371_v17, 0.0  ;;  %v389_v46 = vsel %vm338_vm1, %v376_v37, 0.0  ;;  %v360_v47 = vsel %vm338_vm1, %v545_v13, 0.0  ;;  %v391_v50 = vsel %vm338_vm1, %v377_v42, 0.0 }
  0xec   : > { %v351_v25 = vadd.f32 %v350_v19, %v349_v20  ;;  %v380_v26 = vadd.f32 %v379_v23, %v378_v21  ;;  %v387_v43 = vsel %vm338_vm1, %v375_v34, 0.0 }
  0xee   : > { %v382_v30 = vadd.f32 %v381_v27, %v380_v26  ;;  %v353_v31 = vadd.f32 %v352_v28, %v351_v25 }
  0xf0   : > { %v355_v35 = vadd.f32 %v354_v29, %v353_v31  ;;  %v384_v36 = vadd.f32 %v383_v32, %v382_v30 }
  0xf2   : > { %v386_v39 = vadd.f32 %v385_v33, %v384_v36  ;;  %v357_v40 = vadd.f32 %v356_v38, %v355_v35 }
  0xf4   : > { %v359_v44 = vadd.f32 %v358_v41, %v357_v40  ;;  %v388_v45 = vadd.f32 %v387_v43, %v386_v39 }
  0xf6   : > { %v361_v48 = vadd.f32 %v360_v47, %v359_v44  ;;  %v390_v49 = vadd.f32 %v389_v46, %v388_v45 }
  0xf8   : > { %v362_v51 = vrot.slane %v361_v48, 4  ;;  %v392_v52 = vadd.f32 %v391_v50, %v390_v49 }
  0xfa   : > { %v363_v53 = vadd.f32 %v362_v51, %v361_v48  ;;  %v393_v54 = vrot.slane %v392_v52, 4 }
  0xfc   : > { %v364_v55 = vrot.slane %v363_v53, 2  ;;  %v394_v56 = vadd.f32 %v393_v54, %v392_v52 }
  0xfe   : > { %v365_v57 = vadd.f32 %v364_v55, %v363_v53  ;;  %v395_v58 = vrot.slane %v394_v56, 2 }
 0x100   : > { %v366_v59 = vrot.slane %v365_v57, 1  ;;  %v396_v60 = vadd.f32 %v395_v58, %v394_v56 }
 0x102   : > { %v367_v61 = vadd.f32 %v366_v59, %v365_v57  ;;  %v397_v62 = vrot.slane %v396_v60, 1 }
 0x104   : > { %369 = vst.msk [vmem:[%s211_s5] sm:$0x1] %vm368_vm2, %v367_v61  ;;  %v398_v63 = vadd.f32 %v397_v62, %v396_v60 }
 0x106   : > { %399 = vst.msk [vmem:[%s214_s8] sm:$0x1] %vm368_vm2, %v398_v63 }
 0x107 PF: > { %s15_s15 = sadd.s32 1, %s570_s15  }
 0x108   : > { %p12_p4 = scmp.ge.s32.totalorder %s15_s15, 4  }
 0x10a   :  { %14 = sbr.rel (!%p12_p4) target bundleno = 1 (0x1), region = 82 }

// kernel: _lambda_.14
= control target key start
LH: loop header
LB: loop body
LE: loop exit
PB: predicated region body
PF: predicated region fallthrough
CT: control target
= control target key end

     0   :  { %s456_s18 = smov 0   ;;  %s503_s0 = inlined_call_operand.vmem [shape: f32[2,64,64], index: 0, kind: input, shape index: {}]   ;;  %s504_s1 = inlined_call_operand.vmem [shape: f32[2,1,64], index: 1, kind: input, shape index: {}]   ;;  %s505_s2 = inlined_call_operand.vmem [shape: f32[2,1,64], index: 2, kind: input, shape index: {}]   ;;  %s506_s3 = inlined_call_operand.vmem [shape: f32[1,64], index: 3, kind: input, shape index: {}]   ;;  %s507_s4 = inlined_call_operand.vmem [shape: f32[1,64], index: 4, kind: input, shape index: {}]   ;;  %s508_s5 = inlined_call_operand.vmem [shape: bf16[2,64,64], index: 5, kind: output, shape index: {}]  }
   0x1 LB: > { %s379_s19 = sadd.s32 4294967295, %s424_s18   ;;  %p383_p0 = scmp.ge.s32.totalorder %s424_s18, 1  ;;  %s424_s18 = sphi %s456_s18, %s15_s18  }
   0x2   : > { %p187_p1 = scmp.lt.s32.totalorder %s424_s18, 3 }
   0x4   : > { %p188_p2 = pnand %p383_p0, %p187_p1 }
   0x5   : > { %v225_v0 = vld [vmem:[%s504_s1] sm:$0x1] (!%p188_p2)  ;;  %v226_v1 = vld [vmem:[%s504_s1 + $0x1] sm:$0x1] (!%p188_p2)  ;;  %vm227_vm0 = vcmask (!%p188_p2), 516096   ;;  %p215_p3 = scmp.lt.s32.totalorder (!%p188_p2), %s379_s19, 1  ;;  %v256_v15 = vlaneseq (!%p188_p2) }
   0x6   : > { %191 = sbr.rel (%p188_p2) target bundleno = 44 (0x2c), region = 40  ;;  %v228_v2 = vsel (!%p188_p2), %vm227_vm0, %v225_v0, 0.0  ;;  %v229_v3 = vsel (!%p188_p2), %vm227_vm0, %v226_v1, 0.0  ;;  %v231_v4 = vld [vmem:[%s505_s2] sm:$0x1] (!%p188_p2)  ;;  %vm315_vm1 = vcmask (!%p188_p2), 519168  }
   0x7   : > { %v232_v5 = vld [vmem:[%s505_s2 + $0x1] sm:$0x1] (!%p188_p2)  ;;  %v230_v6 = vadd.f32 (!%p188_p2), %v229_v3, %v228_v2  ;;  %v233_v7 = vsel (!%p188_p2), %vm227_vm0, %v231_v4, 0.0  ;;  %v257_v16 = vshrl.u32 (!%p188_p2), %v256_v15, 7  ;;  %v240_v17 = vld [vmem:[%s506_s3] sm:$0x1] (!%p188_p2) }
   0x8   : > { %v234_v8 = vsel (!%p188_p2), %vm227_vm0, %v232_v5, 0.0  ;;  %v244_v21 = vld [vmem:[%s507_s4] sm:$0x1] (!%p188_p2) }
   0x9   : > { %v235_v9 = vadd.f32 (!%p188_p2), %v234_v8, %v233_v7  ;;  %v236_v10 = vmul.f32 (!%p188_p2), 0.0078125, %v230_v6  ;;  %v258_v18 = vsub.s32 (!%p188_p2), 0, %v257_v16 }
   0xb   : > { %v237_v11 = vmul.f32 (!%p188_p2), 0.0078125, %v235_v9  ;;  %v238_v12 = vmul.f32 (!%p188_p2), %v236_v10, %v236_v10 }
   0xd   : > { %v239_v13 = vsub.f32 %v237_v11, %v238_v12  ;;  %s510_s19 = smov (!%p215_p3, %s379_s19), 1 }
   0xe   : > { %s398_s28 = sshll.u32 %s510_s19, 6  ;;  %s399_s11 = sshll.u32 %s510_s19, 5 }
   0xf   : > { %v241_v14 = vadd.f32 1e-05, %v239_v13  ;;  %s219_s6 = scalar_lea.vmem %s503_s0, %s398_s28  ;;  %s224_s14 = scalar_lea.vmem %s508_s5, %s399_s11 }
  0x10   : > { %v247_v22 = vld [vmem:[%s219_s6] sm:$0xff]  ;;  %v248_v23 = vld [vmem:[%s219_s6 + $0x8] sm:$0xff]  ;;  %v249_v24 = vld [vmem:[%s219_s6 + $0x10] sm:$0xff] }
  0x11   : > { %416 = vrsqrt.f32 %v241_v14  ;;  %v250_v25 = vld [vmem:[%s219_s6 + $0x18] sm:$0xff]  ;;  %v251_v28 = vld [vmem:[%s219_s6 + $0x20] sm:$0xff]  ;;  %v252_v29 = vld [vmem:[%s219_s6 + $0x28] sm:$0xff] }
  0x12   : > { %v253_v30 = vld [vmem:[%s219_s6 + $0x30] sm:$0xff]  ;;  %v254_v31 = vld [vmem:[%s219_s6 + $0x38] sm:$0xff] }
  0x1b   : > { %v417_v19 = vpop.eup %416 }
  0x1c   : > { %v243_v20 = vmul.f32 %v417_v19, %v240_v17 }
  0x1e   : > { %v245_v26 = vmul.f32 %v243_v20, %v236_v10  ;;  %v259_v27 = vrot.slane %v243_v20, %v258_v18 }
  0x20   : > { %v246_v32 = vsub.f32 %v244_v21, %v245_v26  ;;  %v261_v33 = vmul.f32 %v259_v27, %v247_v22  ;;  %v262_v34 = vmul.f32 %v259_v27, %v248_v23  ;;  %v263_v35 = vmul.f32 %v259_v27, %v249_v24 }
  0x21   : > { %v264_v36 = vmul.f32 %v259_v27, %v250_v25  ;;  %v265_v37 = vmul.f32 %v259_v27, %v251_v28  ;;  %v266_v38 = vmul.f32 %v259_v27, %v252_v29  ;;  %v267_v39 = vmul.f32 %v259_v27, %v253_v30 }
  0x22   : > { %v273_v40 = vrot.slane %v246_v32, %v258_v18  ;;  %v268_v41 = vmul.f32 %v259_v27, %v254_v31 }
  0x24   : > { %v275_v42 = vadd.f32 %v273_v40, %v261_v33  ;;  %v276_v43 = vadd.f32 %v273_v40, %v262_v34  ;;  %v277_v44 = vadd.f32 %v273_v40, %v263_v35  ;;  %v278_v45 = vadd.f32 %v273_v40, %v264_v36 }
  0x25   : > { %v279_v46 = vadd.f32 %v273_v40, %v265_v37  ;;  %v280_v47 = vadd.f32 %v273_v40, %v266_v38  ;;  %v281_v48 = vadd.f32 %v273_v40, %v267_v39  ;;  %v282_v49 = vadd.f32 %v273_v40, %v268_v41 }
  0x26   : > { %v400_v50 = vpack.c.bf16 %v275_v42, %v275_v42  ;;  %v401_v51 = vpack.c.bf16 %v276_v43, %v276_v43  ;;  %v402_v52 = vpack.c.bf16 %v277_v44, %v277_v44  ;;  %v403_v53 = vpack.c.bf16 %v278_v45, %v278_v45 }
  0x27   : > { %v404_v54 = vpack.c.bf16 %v279_v46, %v279_v46  ;;  %v405_v55 = vpack.c.bf16 %v280_v47, %v280_v47  ;;  %v406_v56 = vpack.c.bf16 %v281_v48, %v281_v48  ;;  %v407_v57 = vpack.c.bf16 %v282_v49, %v282_v49 }
  0x28   : > { %316 = vst.msk [vmem:[%s224_s14] sm:$0xf] %vm315_vm1, %v400_v50  ;;  %317 = vst.msk [vmem:[%s224_s14 + $0x4] sm:$0xf] %vm315_vm1, %v401_v51 }
  0x29   : > { %318 = vst.msk [vmem:[%s224_s14 + $0x8] sm:$0xf] %vm315_vm1, %v402_v52  ;;  %319 = vst.msk [vmem:[%s224_s14 + $0xc] sm:$0xf] %vm315_vm1, %v403_v53 }
  0x2a   : > { %320 = vst.msk [vmem:[%s224_s14 + $0x10] sm:$0xf] %vm315_vm1, %v404_v54  ;;  %321 = vst.msk [vmem:[%s224_s14 + $0x14] sm:$0xf] %vm315_vm1, %v405_v55 }
  0x2b   : > { %322 = vst.msk [vmem:[%s224_s14 + $0x18] sm:$0xf] %vm315_vm1, %v406_v56  ;;  %323 = vst.msk [vmem:[%s224_s14 + $0x1c] sm:$0xf] %vm315_vm1, %v407_v57 }
  0x2c PF: > { %s15_s18 = sadd.s32 1, %s424_s18  }
  0x2d   : > { %p12_p4 = scmp.ge.s32.totalorder %s15_s18, 4  }
  0x2f   :  { %14 = sbr.rel (!%p12_p4) target bundleno = 1 (0x1), region = 70 }

// kernel: _lambda_.12
= control target key start
LH: loop header
LB: loop body
LE: loop exit
PB: predicated region body
PF: predicated region fallthrough
CT: control target
= control target key end

     0   :  { %s2779_s15 = smov 0   ;;  %s3549_s0 = inlined_call_operand.vmem [shape: bf16[2,104,64], index: 0, kind: input, shape index: {}]   ;;  %s3550_s1 = inlined_call_operand.vmem [shape: bf16[3,3,64,64], index: 1, kind: input, shape index: {}]   ;;  %s3551_s2 = inlined_call_operand.vmem [shape: f32[2,80,64], index: 2, kind: output, shape index: {0}]   ;;  %s3552_s3 = inlined_call_operand.vmem [shape: f32[2,1,64], index: 3, kind: output, shape index: {1}]   ;;  %s3553_s4 = inlined_call_operand.vmem [shape: f32[2,1,64], index: 4, kind: output, shape index: {2}]  }
   0x1 LB: > { %s2003_s16 = sadd.s32 4294967295, %s2750_s15   ;;  %p2007_p0 = scmp.ge.s32.totalorder %s2750_s15, 1  ;;  %s2750_s15 = sphi %s2779_s15, %s15_s15  }
   0x2   : > { %p167_p1 = scmp.lt.s32.totalorder %s2750_s15, 3 }
   0x4   : > { %p168_p2 = pnand %p2007_p0, %p167_p1 }
   0x5   : > { %v2694_v0 = vld [vmem:[%s3550_s1 + $0x20] sm:$0xff] (!%p168_p2)   ;;  %v2752_v1 = vmov (!%p168_p2), 0.0   ;;  %v2696_v3 = vld [vmem:[%s3550_s1 + $0x28] sm:$0xff] (!%p168_p2)   ;;  %vm2753_vm0 = vmmov (!%p168_p2), 0   ;;  %p199_p3 = scmp.lt.s32.totalorder (!%p168_p2), %s2003_s16, 1  ;;  %v2698_v5 = vld [vmem:[%s3550_s1 + $0x30] sm:$0xff] (!%p168_p2)  }
   0x6   : > { %171 = sbr.rel (%p168_p2) target bundleno = 438 (0x1b6), region = 28  ;;  %2252 = vmatprep.subr.bf16.mxu1 (!%p168_p2), %v2752_v1  ;;  %2364 = vmatprep.subr.bf16.mxu0 (!%p168_p2), %v2752_v1  ;;  %v2795_v2 = vld [vmem:[%s3550_s1 + $0x80] sm:$0xff] (!%p168_p2)   ;;  %v2807_v4 = vld [vmem:[%s3550_s1 + $0x88] sm:$0xff] (!%p168_p2)   ;;  %v2823_v6 = vld [vmem:[%s3550_s1 + $0x90] sm:$0xff] (!%p168_p2)   ;;  %vm274_vm1 = vsmask.f32 (!%p168_p2), 7424 }
   0x7   : > { %2253 = vmatpush3.bf16.msra.mxu1 (!%p168_p2), %v2694_v0  ;;  %2260 = vmatprep.mubr.msk.bf16.mxu1 (!%p168_p2), %vm2753_vm0, %v2752_v1  ;;  %v2700_v7 = vld [vmem:[%s3550_s1 + $0x38] sm:$0xff] (!%p168_p2)   ;;  %vm841_vm2 = vsmask.f32 (!%p168_p2), 6400  ;;  %vm343_vm3 = vcmask (!%p168_p2), 523264   ;;  %v2707_v37 = vld [vmem:[%s3550_s1] sm:$0xff] (!%p168_p2)   ;;  %v2713_v54 = vld [vmem:[%s3550_s1 + $0x8] sm:$0xff] (!%p168_p2)  }
   0x8   : > { %2365 = vmatpush3.bf16.msra.mxu0 (!%p168_p2), %v2795_v2  ;;  %2254 = vmatprep.subr.bf16.mxu1 (!%p168_p2), %v2752_v1  ;;  %v2837_v8 = vld [vmem:[%s3550_s1 + $0x98] sm:$0xff] (!%p168_p2)   ;;  %v2708_v38 = vld [vmem:[%s3550_s1 + $0xa0] sm:$0xff] (!%p168_p2)   ;;  %v2709_v56 = vld [vmem:[%s3550_s1 + $0xa8] sm:$0xff] (!%p168_p2)   ;;  %vm1026_vm4 = vcmask (!%p168_p2), 1045504   ;;  %vm548_vm5 = vcmask (!%p168_p2), 1046528   ;;  %vm1480_vm7 = vcmask (!%p168_p2), 1044480  }
   0x9   : > { %2366 = vmatprep.subr.bf16.mxu0 (!%p168_p2), %v2752_v1  ;;  %2372 = vmatprep.mubr.msk.bf16.mxu0 (!%p168_p2), %vm2753_vm0, %v2752_v1  ;;  %vm1315_vm6 = vsmask.f32 (!%p168_p2), 5376 }
   0xb   : > { %2255 = vmatpush3.bf16.msra.mxu1 (!%p168_p2), %v2696_v3 }
   0xc   : > { %2367 = vmatpush3.bf16.msra.mxu0 (!%p168_p2), %v2807_v4  ;;  %2256 = vmatprep.subr.bf16.mxu1 (!%p168_p2), %v2752_v1 }
   0xd   : > { %s3575_s16 = smov (!%p199_p3, %s2003_s16), 1  ;;  %2368 = vmatprep.subr.bf16.mxu0 %v2752_v1 }
   0xe   : > { %s2662_s27 = smul.u32 52, %s3575_s16  ;;  %s214_s30 = scalar_lea.vmem %s3553_s4, %s3575_s16 }
   0xf   : > { %2257 = vmatpush3.bf16.msra.mxu1 %v2698_v5  ;;  %s2663_s21 = smul.u32 80, %s3575_s16 }
  0x10   : > { %s2832_s8 = scalar_lea.vmem %s3549_s0, %s2662_s27  ;;  %2369 = vmatpush3.bf16.msra.mxu0 %v2823_v6  ;;  %2258 = vmatprep.subr.bf16.mxu1 %v2752_v1  ;;  %s211_s27 = scalar_lea.vmem %s3552_s3, %s3575_s16 }
  0x11   : > { %v216_v9 = vld [vmem:[%s2832_s8] sm:$0xf]  ;;  %v217_v10 = vld [vmem:[%s2832_s8 + $0x4] sm:$0xf]  ;;  %v218_v11 = vld [vmem:[%s2832_s8 + $0x8] sm:$0xf]  ;;  %2370 = vmatprep.subr.bf16.mxu0 %v2752_v1  ;;  %s3405_s24 = scalar_lea.vmem %s3551_s2, %s2663_s21 }
  0x12   : > { %v219_v12 = vld [vmem:[%s2832_s8 + $0xc] sm:$0xf]  ;;  %v2843_v13 = vcombine.low %v216_v9, %v217_v10  ;;  %v220_v14 = vld [vmem:[%s2832_s8 + $0x10] sm:$0xf]  ;;  %v221_v15 = vld [vmem:[%s2832_s8 + $0x14] sm:$0xf]  ;;  %v2847_v16 = vcombine.low %v217_v10, %v218_v11 }
  0x13   : > { %v2851_v17 = vcombine.low %v218_v11, %v219_v12  ;;  %v2853_v18 = vcombine.low %v220_v14, %v221_v15  ;;  %v2855_v19 = vcombine.low %v219_v12, %v220_v14  ;;  %2259 = vmatpush3.bf16.msra.mxu1 %v2700_v7  ;;  %v222_v34 = vld [vmem:[%s2832_s8 + $0x18] sm:$0xf]  ;;  %v2880_v42 = vld [vmem:[%s2832_s8 + $0x1c] sm:$0xf]  ;;  %v2908_v59 = vld [vmem:[%s2832_s8 + $0x20] sm:$0xf] }
  0x14   : > { %v276_v20 = vshrl.u32 %v2843_v13, 16  ;;  %v278_v21 = vshll.u32 %v2843_v13, 16  ;;  %v843_v22 = vshrl.u32 %v2847_v16, 16  ;;  %v846_v23 = vshll.u32 %v2847_v16, 16  ;;  %2371 = vmatpush3.bf16.msra.mxu0 %v2837_v8  ;;  %2280 = vmatprep.subr.bf16.mxu1 %v2752_v1  ;;  %v2918_v63 = vld [vmem:[%s2832_s8 + $0x24] sm:$0xf] }
  0x15   : > { %v283_v24 = vshll.u32 %v2851_v17, 16  ;;  %v851_v25 = vshrl.u32 %v2855_v19, 16  ;;  %v854_v26 = vshll.u32 %v2855_v19, 16  ;;  %2392 = vmatprep.subr.bf16.mxu0 %v2752_v1  ;;  %v287_v39 = vshrl.u32 %v2851_v17, 16  ;;  %v2712_v7 = vld [vmem:[%s3550_s1 + $0xb0] sm:$0xff]   ;;  %v2714_v11 = vld [vmem:[%s3550_s1 + $0xb8] sm:$0xff]  }
  0x16   : > { %v280_v27 = vrot.slane %v278_v21, 1  ;;  %v845_v28 = vrot.slane %v843_v22, 1  ;;  %v848_v29 = vrot.slane %v846_v23, 2  ;;  %v291_v40 = vshll.u32 %v2853_v18, 16  ;;  %v2715_v9 = vld [vmem:[%s3550_s1 + $0x10] sm:$0xff]   ;;  %v2718_v22 = vld [vmem:[%s3550_s1 + $0x18] sm:$0xff]  }
  0x17   : > { %v285_v30 = vrot.slane %v283_v24, 1  ;;  %v2866_v31 = vrot.slane %v283_v24, 3  ;;  %v853_v32 = vrot.slane %v851_v25, 1  ;;  %v856_v33 = vrot.slane %v854_v26, 2  ;;  %v2956_v23 = vld [vmem:[%s2832_s8 + $0x28] sm:$0xf] }
  0x18   : > { %v281_v35 = vor.u32 %v280_v27, %v276_v20  ;;  %v849_v36 = vor.u32 %v848_v29, %v845_v28  ;;  %v2882_v43 = vcombine.low %v221_v15, %v222_v34  ;;  %v293_v45 = vrot.slane %v291_v40, 1  ;;  %v2717_v26 = vld [vmem:[%s3550_s1 + $0xc0] sm:$0xff]   ;;  %v227_v28 = vld [vmem:[%s2832_s8 + $0x2c] sm:$0xf] }
  0x19   : > { %v857_v41 = vor.u32 %v856_v33, %v853_v32  ;;  %v2885_v46 = vrot.slane %v287_v39, 2  ;;  %v295_v47 = vshrl.u32 %v2853_v18, 16  ;;  %v1320_v49 = vrot.slane %v291_v40, 3 }
  0x1a   : > { %v286_v44 = vsel %vm274_vm1, %v281_v35, %v285_v30  ;;  %v860_v50 = vshrl.u32 %v2882_v43, 16  ;;  %v863_v51 = vshll.u32 %v2882_v43, 16  ;;  %v289_v52 = vor.u32 %v287_v39, %v285_v30 }
  0x1b   : > { %2261 = vmatmul.mubr.msk.bf16.vlgmr.msra.gmra.mrb[0].mxu1 %vm343_vm3, %v286_v44  ;;  %v858_v48 = vsel %vm841_vm2, %v849_v36, %v857_v41  ;;  %v2894_v53 = vcombine.low %v222_v34, %v2880_v42  ;;  %v1319_v55 = vrot.slane %v295_v47, 2  ;;  %v1318_v60 = vor.u32 %v2866_v31, %v2885_v46 }
  0x1c   : > { %2373 = vmatmul.mubr.msk.bf16.vlgmr.msra.gmra.mrb[0].mxu0 %vm343_vm3, %v858_v48  ;;  %2281 = vmatpush3.bf16.msra.mxu1 %v2707_v37  ;;  %v862_v57 = vrot.slane %v860_v50, 1  ;;  %v865_v58 = vrot.slane %v863_v51, 2  ;;  %v294_v0 = vsel %vm274_vm1, %v289_v52, %v293_v45  ;;  %v2934_v10 = vcombine.low %v2908_v59, %v2918_v63 }
  0x1d   : > { %2393 = vmatpush3.bf16.msra.mxu0 %v2708_v38  ;;  %2264 = vmatprep.mubr.msk.bf16.mxu1 %vm2753_vm0, %v2752_v1  ;;  %v2912_v61 = vor.u32 %v1320_v49, %v1319_v55  ;;  %v299_v3 = vshll.u32 %v2894_v53, 16  ;;  %v297_v12 = vor.u32 %v295_v47, %v293_v45  ;;  %v1027_v15 = vrot.slane %v2847_v16, 2  ;;  %v2723_v38 = vld [vmem:[%s3550_s1 + $0xc8] sm:$0xff]   ;;  %v2725_v55 = vld [vmem:[%s3550_s1 + $0xd0] sm:$0xff]  }
  0x1e   : > { %2394 = vmatprep.subr.bf16.mxu0 %v2752_v1  ;;  %2376 = vmatprep.mubr.msk.bf16.mxu0 %vm2753_vm0, %v2752_v1  ;;  %v2914_v62 = vor.u32 %v865_v58, %v862_v57  ;;  %v1028_v20 = vrot.slane %v2855_v19, 2  ;;  %v307_v21 = vshll.u32 %v2934_v10, 16  ;;  %v303_v25 = vshrl.u32 %v2894_v53, 16 }
  0x1f   : > { %2282 = vmatprep.subr.bf16.mxu1 %v2752_v1  ;;  %v301_v14 = vrot.slane %v299_v3, 1  ;;  %v1030_v29 = vrot.slane %v2882_v43, 2  ;;  %v2969_v30 = vcombine.low %v2956_v23, %v2956_v23  ;;  %v549_v32 = vrot.slane %v2843_v13, 1 }
  0x20   : > { %2283 = vmatpush3.bf16.msra.mxu1 %v2713_v54  ;;  %v867_v5 = vsel %vm841_vm2, %v857_v41, %v2914_v62  ;;  %v1029_v27 = vsel %vm1026_vm4, %v1027_v15, %v1028_v20  ;;  %v309_v33 = vrot.slane %v307_v21, 1  ;;  %v311_v34 = vshrl.u32 %v2934_v10, 16  ;;  %v2992_v41 = vld [vmem:[%s2832_s8 + $0x30] ss:$0 sps:$4 sm:$0xff]  }
  0x21   : > { %2395 = vmatpush3.bf16.msra.mxu0 %v2709_v56  ;;  %2284 = vmatprep.subr.bf16.mxu1 %v2752_v1  ;;  %v302_v24 = vsel %vm274_vm1, %v297_v12, %v301_v14  ;;  %v2975_v35 = vcombine.low %v2956_v23, %v227_v28  ;;  %v550_v36 = vrot.slane %v2851_v17, 1  ;;  %v305_v37 = vor.u32 %v303_v25, %v301_v14 }
  0x22   : > { %2396 = vmatprep.subr.bf16.mxu0 %v2752_v1  ;;  %v552_v40 = vrot.slane %v2853_v18, 1  ;;  %v315_v44 = vshll.u32 %v2969_v30, 16  ;;  %v554_v45 = vrot.slane %v2894_v53, 1  ;;  %v1182_v49 = vrot.slane %v2992_v41, 2 }
  0x23   : > { %2265 = vmatmul.mubr.msk.bf16.gmra.mrb[4].mxu1 %vm343_vm3, %v294_v0  ;;  %v2988_v39 = vsel %vm548_vm5, %v549_v32, %v550_v36  ;;  %v1180_v47 = vrot.slane %v2975_v35, 2  ;;  %v310_v50 = vsel %vm274_vm1, %v305_v37, %v309_v33  ;;  %v3005_v51 = vcombine.low %v2880_v42, %v2908_v59 }
  0x24   : > { %2377 = vmatmul.mubr.msk.bf16.gmra.mrb[4].mxu0 %vm343_vm3, %v867_v5  ;;  %2268 = vmatprep.mubr.msk.bf16.mxu1 %vm2753_vm0, %v2752_v1  ;;  %v2999_v48 = vsel %vm548_vm5, %v550_v36, %v552_v40  ;;  %v3010_v52 = vsel %vm548_vm5, %v552_v40, %v554_v45  ;;  %v1031_v54 = vsel %vm1026_vm4, %v1028_v20, %v1030_v29  ;;  %v1323_v57 = vrot.slane %v303_v25, 2 }
  0x25   : > { %2397 = vmatpush3.bf16.msra.mxu0 %v2712_v7  ;;  %2400 = vmatprep.mubr.msk.bf16.mxu0 %vm2753_vm0, %v2752_v1  ;;  %v3021_v42 = vsel %vm1026_vm4, %v1180_v47, %v1182_v49  ;;  %v3028_v56 = vsel %vm1315_vm6, %v1318_v60, %v2912_v61  ;;  %v1324_v58 = vrot.slane %v299_v3, 3  ;;  %v317_v59 = vrot.slane %v315_v44, 1 }
  0x26   : > { %2398 = vmatprep.subr.bf16.mxu0 %v2752_v1  ;;  %2285 = vmatpush3.bf16.msra.mxu1 %v2715_v9  ;;  %v1327_v0 = vrot.slane %v311_v34, 2  ;;  %v1328_v5 = vrot.slane %v307_v21, 3  ;;  %v313_v31 = vor.u32 %v311_v34, %v309_v33  ;;  %v699_v60 = vrot.slane %v2847_v16, 1  ;;  %v2728_v9 = vld [vmem:[%s3550_s1 + $0xd8] sm:$0xff]  }
  0x27   : > { %2286 = vmatprep.subr.bf16.mxu1 %v2752_v1  ;;  %v1325_v46 = vor.u32 %v1324_v58, %v1323_v57  ;;  %v700_v7 = vrot.slane %v2855_v19, 1  ;;  %v1032_v3 = vrot.slane %v3005_v51, 2  ;;  %v702_v19 = vrot.slane %v2882_v43, 1 }
  0x28   : > { %v2071_v14 = vcombine.low %v2918_v63, %v2956_v23  ;;  %v2072_v15 = vcombine.low %v227_v28, %v227_v28  ;;  %v318_v21 = vsel %vm274_vm1, %v313_v31, %v317_v59  ;;  %v1481_v63 = vrot.slane %v2851_v17, 3 }
  0x29   : > { %2399 = vmatpush3.bf16.msra.mxu0 %v2714_v11  ;;  %v3045_v11 = vor.u32 %v1328_v5, %v1327_v0  ;;  %v3050_v12 = vsel %vm1315_vm6, %v2912_v61, %v1325_v46  ;;  %v3053_v16 = vsel %vm548_vm5, %v699_v60, %v700_v7  ;;  %v704_v61 = vrot.slane %v3005_v51, 1 }
  0x2a   : > { %2420 = vmatprep.subr.bf16.mxu0 %v2752_v1  ;;  %2287 = vmatpush3.bf16.msra.mxu1 %v2718_v22  ;;  %v3064_v22 = vsel %vm548_vm5, %v700_v7, %v702_v19  ;;  %v1482_v23 = vrot.slane %v2853_v18, 3  ;;  %v708_v28 = vrot.slane %v2072_v15, 1  ;;  %v869_v34 = vshrl.u32 %v3005_v51, 16 }
  0x2b   : > { %2269 = vmatmul.mubr.msk.bf16.gmra.mrb[8].mxu1 %vm343_vm3, %v302_v24  ;;  %2308 = vmatprep.subr.bf16.mxu1 %v2752_v1  ;;  %v3060_v20 = vsel %vm1315_vm6, %v1325_v46, %v3045_v11  ;;  %v1033_v24 = vsel %vm1026_vm4, %v1030_v29, %v1032_v3  ;;  %v3074_v25 = vsel %vm548_vm5, %v702_v19, %v704_v61  ;;  %v1034_v36 = vrot.slane %v2071_v14, 2  ;;  %v2727_v46 = vld [vmem:[%s3550_s1 + $0x48] sm:$0xff]  }
  0x2c   : > { %2401 = vmatmul.mubr.msk.bf16.vlgmr.msra.gmra.mrb[0].mxu0 %vm343_vm3, %v1029_v27  ;;  %2272 = vmatprep.mubr.msk.bf16.mxu1 %vm2753_vm0, %v2752_v1  ;;  %v1484_v27 = vrot.slane %v2894_v53, 3  ;;  %v3079_v43 = vsel %vm1480_vm7, %v1481_v63, %v1482_v23  ;;  %v872_v37 = vshll.u32 %v3005_v51, 16  ;;  %v878_v40 = vshrl.u32 %v2071_v14, 16  ;;  %v2731_v63 = vld [vmem:[%s3550_s1 + $0x58] sm:$0xff]  }
  0x2d   : > { %2404 = vmatprep.mubr.msk.bf16.mxu0 %vm2753_vm0, %v2752_v1  ;;  %2421 = vmatpush3.bf16.msra.mxu0 %v2717_v26  ;;  %v706_v26 = vrot.slane %v2071_v14, 1  ;;  %v881_v44 = vshll.u32 %v2071_v14, 16  ;;  %v1035_v57 = vsel %vm1026_vm4, %v1032_v3, %v1034_v36  ;;  %v1488_v59 = vrot.slane %v2975_v35, 3 }
  0x2e   : > { %2422 = vmatprep.subr.bf16.mxu0 %v2752_v1  ;;  %v3090_v32 = vsel %vm1480_vm7, %v1482_v23, %v1484_v27  ;;  %v874_v49 = vrot.slane %v872_v37, 2  ;;  %v1490_v0 = vrot.slane %v2992_v41, 3  ;;  %v890_v7 = vshll.u32 %v2072_v15, 16  ;;  %v2737_v37 = vld [vmem:[%s3550_s1 + $0xf8] sm:$0xff]  }
  0x2f   : > { %v3085_v29 = vsel %vm548_vm5, %v704_v61, %v706_v26  ;;  %v3093_v33 = vsel %vm548_vm5, %v706_v26, %v708_v28  ;;  %v2730_v26 = vld [vmem:[%s3550_s1 + $0xe0] sm:$0xff]   ;;  %v2732_v28 = vld [vmem:[%s3550_s1 + $0xe8] sm:$0xff]  }
  0x30   : > { %v3114_v31 = vsel %vm1480_vm7, %v1488_v59, %v1490_v0 }
  0x31   : > { %2423 = vmatpush3.bf16.msra.mxu0 %v2723_v38  ;;  %v871_v38 = vrot.slane %v869_v34, 1 }
  0x32   : > { %2424 = vmatprep.subr.bf16.mxu0 %v2752_v1 }
  0x33   : > { %2273 = vmatmul.mubr.msk.bf16.gmra.mrb[12].mxu1 %vm343_vm3, %v310_v50  ;;  %v2724_v50 = vld [vmem:[%s3550_s1 + $0x40] sm:$0xff]   ;;  %v875_v58 = vor.u32 %v874_v49, %v871_v38  ;;  %v2736_v49 = vld [vmem:[%s3550_s1 + $0x68] sm:$0xff]  }
  0x34   : > { %2405 = vmatmul.mubr.msk.bf16.gmra.mrb[4].mxu0 %vm343_vm3, %v1031_v54  ;;  %2276 = vmatprep.mubr.msk.bf16.mxu1 %vm2753_vm0, %v2752_v1  ;;  %v880_v54 = vrot.slane %v878_v40, 1  ;;  %v2733_v40 = vld [vmem:[%s3550_s1 + $0x60] sm:$0xff]  }
  0x35   : > { %2408 = vmatprep.mubr.msk.bf16.mxu0 %vm2753_vm0, %v2752_v1  ;;  %2425 = vmatpush3.bf16.msra.mxu0 %v2725_v55  ;;  %v883_v55 = vrot.slane %v881_v44, 2  ;;  %v3109_v51 = vsel %vm841_vm2, %v2914_v62, %v875_v58  ;;  %v1036_v62 = vrot.slane %v2072_v15, 2 }
  0x36   : > { %2426 = vmatprep.subr.bf16.mxu0 %v2752_v1 }
  0x37   : > { %v884_v5 = vor.u32 %v883_v55, %v880_v54  ;;  %v1037_v14 = vsel %vm1026_vm4, %v1034_v36, %v1036_v62  ;;  %v1178_v36 = vrot.slane %v2934_v10, 2  ;;  %v558_v54 = vrot.slane %v2969_v30, 1 }
  0x38   : > { %v1335_v55 = vshll.u32 %v2975_v35, 16 }
  0x39   : > { %2427 = vmatpush3.bf16.msra.mxu0 %v2728_v9  ;;  %v3121_v60 = vsel %vm841_vm2, %v875_v58, %v884_v5  ;;  %v892_v9 = vrot.slane %v890_v7, 2  ;;  %v1181_v44 = vsel %vm1026_vm4, %v1178_v36, %v1180_v47  ;;  %v2740_v47 = vld [vmem:[%s3550_s1 + $0x78] sm:$0xff]  }
  0x3a   : > { %2448 = vmatprep.subr.bf16.mxu0 %v2752_v1  ;;  %v1337_v0 = vrot.slane %v1335_v55, 3 }
  0x3b   : > { %2277 = vmatmul.mubr.msk.bf16.gmra.mrb[16].mxu1 %vm343_vm3, %v318_v21  ;;  %v2729_v21 = vld [vmem:[%s3550_s1 + $0x50] sm:$0xff]  }
  0x3c   : > { %2409 = vmatmul.mubr.msk.bf16.gmra.mrb[8].mxu0 %vm343_vm3, %v1033_v24  ;;  %2288 = vmatprep.mubr.msk.bf16.mxu1 %vm2753_vm0, %v2752_v1  ;;  %v1174_v24 = vrot.slane %v2853_v18, 2 }
  0x3d   : > { %2412 = vmatprep.mubr.msk.bf16.mxu0 %vm2753_vm0, %v2752_v1 }
  0x43   : > { %2289 = vmatmul.mubr.msk.bf16.vlgmr.msra.gmra.mrb[0].mxu1 %vm343_vm3, %v2843_v13  ;;  %v887_v13 = vshrl.u32 %v2072_v15, 16  ;;  %v1173_v15 = vrot.slane %v2851_v17, 2 }
  0x44   : > { %2413 = vmatmul.mubr.msk.bf16.gmra.mrb[12].mxu0 %vm343_vm3, %v1035_v57  ;;  %2309 = vmatpush3.bf16.msra.mxu1 %v2724_v50  ;;  %v2741_v50 = vld [vmem:[%s3550_s1 + $0x108] sm:$0xff]   ;;  %v2743_v57 = vld [vmem:[%s3550_s1 + $0x118] sm:$0xff]  }
  0x45   : > { %2292 = vmatprep.mubr.msk.bf16.mxu1 %vm2753_vm0, %v2752_v1  ;;  %2416 = vmatprep.mubr.msk.bf16.mxu0 %vm2753_vm0, %v2752_v1  ;;  %v889_v3 = vrot.slane %v887_v13, 1  ;;  %v1175_v23 = vsel %vm1026_vm4, %v1173_v15, %v1174_v24 }
  0x46   : > { %2310 = vmatprep.subr.bf16.mxu1 %v2752_v1 }
  0x47   : > { %v893_v19 = vor.u32 %v892_v9, %v889_v3 }
  0x48   : > { %2311 = vmatpush3.bf16.msra.mxu1 %v2727_v46  ;;  %v1344_v46 = vshll.u32 %v2992_v41, 16 }
  0x49   : > { %2312 = vmatprep.subr.bf16.mxu1 %v2752_v1  ;;  %v3134_v61 = vsel %vm841_vm2, %v884_v5, %v893_v19  ;;  %v1341_v5 = vshrl.u32 %v2992_v41, 16 }
  0x4a   : > { %v1346_v62 = vrot.slane %v1344_v46, 3 }
  0x4b   : > { %2293 = vmatmul.mubr.msk.bf16.gmra.mrb[4].mxu1 %vm343_vm3, %v2851_v17  ;;  %v1176_v17 = vrot.slane %v2894_v53, 2  ;;  %v1343_v7 = vrot.slane %v1341_v5, 2 }
  0x4c   : > { %2417 = vmatmul.mubr.msk.bf16.gmra.mrb[16].mxu0 %vm343_vm3, %v1037_v14  ;;  %2296 = vmatprep.mubr.msk.bf16.mxu1 %vm2753_vm0, %v2752_v1 }
  0x4d   : > { %2428 = vmatprep.mubr.msk.bf16.mxu0 %vm2753_vm0, %v2752_v1  ;;  %2313 = vmatpush3.bf16.msra.mxu1 %v2729_v21  ;;  %v1177_v34 = vsel %vm1026_vm4, %v1174_v24, %v1176_v17  ;;  %v1179_v38 = vsel %vm1026_vm4, %v1176_v17, %v1178_v36 }
  0x4e   : > { %2314 = vmatprep.subr.bf16.mxu1 %v2752_v1 }
  0x51   : > { %2315 = vmatpush3.bf16.msra.mxu1 %v2731_v63 }
  0x52   : > { %2336 = vmatprep.subr.bf16.mxu1 %v2752_v1 }
  0x53   : > { %2297 = vmatmul.mubr.msk.bf16.gmra.mrb[8].mxu1 %vm343_vm3, %v2853_v18  ;;  %v2734_v18 = vld [vmem:[%s3550_s1 + $0xf0] sm:$0xff]  }
  0x54   : > { %2429 = vmatmul.mubr.msk.bf16.vlgmr.msra.gmra.mrb[0].mxu0 %vm343_vm3, %v1175_v23  ;;  %2300 = vmatprep.mubr.msk.bf16.mxu1 %vm2753_vm0, %v2752_v1 }
  0x55   : > { %2432 = vmatprep.mubr.msk.bf16.mxu0 %vm2753_vm0, %v2752_v1  ;;  %2449 = vmatpush3.bf16.msra.mxu0 %v2730_v26 }
  0x56   : > { %2450 = vmatprep.subr.bf16.mxu0 %v2752_v1 }
  0x59   : > { %2451 = vmatpush3.bf16.msra.mxu0 %v2732_v28 }
  0x5a   : > { %2452 = vmatprep.subr.bf16.mxu0 %v2752_v1 }
  0x5b   : > { %2301 = vmatmul.mubr.msk.bf16.gmra.mrb[12].mxu1 %vm343_vm3, %v2894_v53 }
  0x5c   : > { %2433 = vmatmul.mubr.msk.bf16.gmra.mrb[4].mxu0 %vm343_vm3, %v1177_v34  ;;  %2304 = vmatprep.mubr.msk.bf16.mxu1 %vm2753_vm0, %v2752_v1 }
  0x5d   : > { %2436 = vmatprep.mubr.msk.bf16.mxu0 %vm2753_vm0, %v2752_v1  ;;  %2453 = vmatpush3.bf16.msra.mxu0 %v2734_v18 }
  0x5e   : > { %2454 = vmatprep.subr.bf16.mxu0 %v2752_v1 }
  0x61   : > { %2455 = vmatpush3.bf16.msra.mxu0 %v2737_v37 }
  0x62   : > { %2476 = vmatprep.subr.bf16.mxu0 %v2752_v1 }
  0x63   : > { %2305 = vmatmul.mubr.msk.bf16.gmra.mrb[16].mxu1 %vm343_vm3, %v2934_v10 }
  0x64   : > { %2437 = vmatmul.mubr.msk.bf16.gmra.mrb[8].mxu0 %vm343_vm3, %v1179_v38  ;;  %2316 = vmatprep.mubr.msk.bf16.mxu1 %vm2753_vm0, %v2752_v1 }
  0x65   : > { %2440 = vmatprep.mubr.msk.bf16.mxu0 %vm2753_vm0, %v2752_v1 }
  0x6b   : > { %2317 = vmatmul.mubr.msk.bf16.vlgmr.msra.gmra.mrb[0].mxu1 %vm343_vm3, %v2988_v39  ;;  %v2738_v39 = vld [vmem:[%s3550_s1 + $0x70] sm:$0xff]  }
  0x6c   : > { %2441 = vmatmul.mubr.msk.bf16.gmra.mrb[12].mxu0 %vm343_vm3, %v1181_v44  ;;  %2337 = vmatpush3.bf16.msra.mxu1 %v2733_v40 }
  0x6d   : > { %2320 = vmatprep.mubr.msk.bf16.mxu1 %vm2753_vm0, %v2752_v1  ;;  %2444 = vmatprep.mubr.msk.bf16.mxu0 %vm2753_vm0, %v2752_v1 }
  0x6e   : > { %2338 = vmatprep.subr.bf16.mxu1 %v2752_v1 }
  0x70   : > { %2339 = vmatpush3.bf16.msra.mxu1 %v2736_v49 }
  0x71   : > { %2340 = vmatprep.subr.bf16.mxu1 %v2752_v1 }
  0x73   : > { %2321 = vmatmul.mubr.msk.bf16.gmra.mrb[4].mxu1 %vm343_vm3, %v2999_v48  ;;  %v2739_v48 = vld [vmem:[%s3550_s1 + $0x100] sm:$0xff]  }
  0x74   : > { %2445 = vmatmul.mubr.msk.bf16.gmra.mrb[16].mxu0 %vm343_vm3, %v3021_v42  ;;  %2324 = vmatprep.mubr.msk.bf16.mxu1 %vm2753_vm0, %v2752_v1  ;;  %v556_v42 = vrot.slane %v2934_v10, 1 }
  0x75   : > { %2456 = vmatprep.mubr.msk.bf16.mxu0 %vm2753_vm0, %v2752_v1  ;;  %2341 = vmatpush3.bf16.msra.mxu1 %v2738_v39 }
  0x76   : > { %2342 = vmatprep.subr.bf16.mxu1 %v2752_v1 }
  0x79   : > { %2343 = vmatpush3.bf16.msra.mxu1 %v2740_v47 }
  0x7a   : > { %2504 = vmatprep.subr.bf16.mxu1 %v2752_v1 }
  0x7b   : > { %2325 = vmatmul.mubr.msk.bf16.gmra.mrb[8].mxu1 %vm343_vm3, %v3010_v52  ;;  %v557_v52 = vsel %vm548_vm5, %v554_v45, %v556_v42  ;;  %v1332_v45 = vshrl.u32 %v2975_v35, 16 }
  0x7c   : > { %2457 = vmatmul.mubr.msk.bf16.vlgmr.msra.gmra.mrb[0].mxu0 %vm343_vm3, %v3028_v56  ;;  %2328 = vmatprep.mubr.msk.bf16.mxu1 %vm2753_vm0, %v2752_v1  ;;  %v2742_v56 = vld [vmem:[%s3550_s1 + $0x110] sm:$0xff]  }
  0x7d   : > { %2460 = vmatprep.mubr.msk.bf16.mxu0 %vm2753_vm0, %v2752_v1  ;;  %2477 = vmatpush3.bf16.msra.mxu0 %v2739_v48  ;;  %v1334_v58 = vrot.slane %v1332_v45, 2 }
  0x7e   : > { %2478 = vmatprep.subr.bf16.mxu0 %v2752_v1 }
  0x7f   : > { %v1338_v30 = vor.u32 %v1337_v0, %v1334_v58 }
  0x81   : > { %2479 = vmatpush3.bf16.msra.mxu0 %v2741_v50  ;;  %v1339_v13 = vsel %vm1315_vm6, %v3045_v11, %v1338_v30 }
  0x82   : > { %2480 = vmatprep.subr.bf16.mxu0 %v2752_v1 }
  0x83   : > { %2329 = vmatmul.mubr.msk.bf16.gmra.mrb[12].mxu1 %vm343_vm3, %v557_v52 }
  0x84   : > { %2461 = vmatmul.mubr.msk.bf16.gmra.mrb[4].mxu0 %vm343_vm3, %v3050_v12  ;;  %2332 = vmatprep.mubr.msk.bf16.mxu1 %vm2753_vm0, %v2752_v1  ;;  %v559_v12 = vsel %vm548_vm5, %v556_v42, %v558_v54 }
  0x85   : > { %2464 = vmatprep.mubr.msk.bf16.mxu0 %vm2753_vm0, %v2752_v1  ;;  %2481 = vmatpush3.bf16.msra.mxu0 %v2742_v56 }
  0x86   : > { %2482 = vmatprep.subr.bf16.mxu0 %v2752_v1 }
  0x89   : > { %2483 = vmatpush3.bf16.msra.mxu0 %v2743_v57 }
  0x8b   : > { %2333 = vmatmul.mubr.msk.bf16.gmra.mrb[16].mxu1 %vm343_vm3, %v559_v12 }
  0x8c   : > { %2465 = vmatmul.mubr.msk.bf16.gmra.mrb[8].mxu0 %vm343_vm3, %v3060_v20  ;;  %2344 = vmatprep.mubr.msk.bf16.mxu1 %vm2753_vm0, %v2752_v1  ;;  %v1347_v20 = vor.u32 %v1346_v62, %v1343_v7 }
  0x8d   : > { %2468 = vmatprep.mubr.msk.bf16.mxu0 %vm2753_vm0, %v2752_v1 }
  0x8e   : > { %v1348_v41 = vsel %vm1315_vm6, %v1338_v30, %v1347_v20 }
  0x93   : > { %2345 = vmatmul.mubr.msk.bf16.vlgmr.msra.gmra.mrb[0].mxu1 %vm343_vm3, %v3053_v16 }
  0x94   : > { %2469 = vmatmul.mubr.msk.bf16.gmra.mrb[12].mxu0 %vm343_vm3, %v1339_v13  ;;  %2508 = vmatpush3.bf16.msra.mxu1 %v2795_v2  ;;  %v1486_v2 = vrot.slane %v2934_v10, 3 }
  0x95   : > { %2348 = vmatprep.mubr.msk.bf16.mxu1 %vm2753_vm0, %v2752_v1  ;;  %2472 = vmatprep.mubr.msk.bf16.mxu0 %vm2753_vm0, %v2752_v1 }
  0x96   : > { %2505 = vmatprep.subr.bf16.mxu1 %v2752_v1 }
  0x98   : > { %2509 = vmatpush3.bf16.msra.mxu1 %v2807_v4  ;;  %v1487_v4 = vsel %vm1480_vm7, %v1484_v27, %v1486_v2 }
  0x99   : > { %2506 = vmatprep.subr.bf16.mxu1 %v2752_v1 }
  0x9b   : > { %2349 = vmatmul.mubr.msk.bf16.gmra.mrb[4].mxu1 %vm343_vm3, %v3064_v22 }
  0x9c   : > { %2473 = vmatmul.mubr.msk.bf16.gmra.mrb[16].mxu0 %vm343_vm3, %v1348_v41  ;;  %2352 = vmatprep.mubr.msk.bf16.mxu1 %vm2753_vm0, %v2752_v1 }
  0x9d   : > { %2484 = vmatprep.mubr.msk.bf16.mxu0 %vm2753_vm0, %v2752_v1  ;;  %2510 = vmatpush3.bf16.msra.mxu1 %v2823_v6  ;;  %v1489_v6 = vsel %vm1480_vm7, %v1486_v2, %v1488_v59 }
  0x9e   : > { %2507 = vmatprep.subr.bf16.mxu1 %v2752_v1 }
  0xa1   : > { %2511 = vmatpush3.bf16.msra.mxu1 %v2837_v8  ;;  %v1624_v8 = vlaneseq }
  0xa3   : > { %2353 = vmatmul.mubr.msk.bf16.gmra.mrb[8].mxu1 %vm343_vm3, %v3074_v25  ;;  %v3342_v53 = vshrl.u32 %v1624_v8, 7 }
  0xa4   : > { %2485 = vmatmul.mubr.msk.bf16.vlgmr.msra.gmra.mrb[0].mxu0 %vm343_vm3, %v3079_v43  ;;  %2356 = vmatprep.mubr.msk.bf16.mxu1 %vm2753_vm0, %v2752_v1 }
  0xa5   : > { %2488 = vmatprep.mubr.msk.bf16.mxu0 %vm2753_vm0, %v2752_v1  ;;  %v1626_v10 = vadd.s32 8, %v3342_v53  ;;  %v3346_v35 = vmul.u32.u64.low 3435973837, %v3342_v53  ;;  %v3347_v11 = vmul.u32.u64.high 3435973837, %v3342_v53, %v3346_v35  ;;  %v1627_v25 = vadd.s32 16, %v3342_v53 }
  0xa6   : > { %v1628_v27 = vadd.s32 24, %v3342_v53  ;;  %v3366_v24 = vadd.s32 32, %v3342_v53  ;;  %v3369_v63 = vadd.s32 40, %v3342_v53  ;;  %v3397_v56 = vadd.s32 48, %v3342_v53 }
  0xa7   : > { %v3349_v16 = vmul.u32.u64.low 3435973837, %v1626_v10  ;;  %v3350_v22 = vmul.u32.u64.high 3435973837, %v1626_v10, %v3349_v16  ;;  %v3400_v54 = vadd.s32 56, %v3342_v53 }
  0xa8   : > { %v3380_v38 = vmul.u32.u64.low 3435973837, %v3366_v24  ;;  %v3381_v40 = vmul.u32.u64.high 3435973837, %v3366_v24, %v3380_v38  ;;  %v3388_v39 = vmul.u32.u64.low 3435973837, %v3369_v63  ;;  %v3389_v47 = vmul.u32.u64.high 3435973837, %v3369_v63, %v3388_v39 }
  0xa9   : > { %v1652_v43 = vshrl.u32 %v3350_v22, 3  ;;  %v3418_v7 = vmul.u32.u64.low 3435973837, %v3397_v56  ;;  %v3419_v62 = vmul.u32.u64.high 3435973837, %v3397_v56, %v3418_v7 }
  0xaa   : > { %v1685_v0 = vshrl.u32 %v3381_v40, 3  ;;  %v1696_v13 = vshrl.u32 %v3389_v47, 3 }
  0xab   : > { %2357 = vmatmul.mubr.msk.bf16.gmra.mrb[12].mxu1 %vm343_vm3, %v3085_v29 }
  0xac   : > { %2489 = vmatmul.mubr.msk.bf16.gmra.mrb[4].mxu0 %vm343_vm3, %v3090_v32  ;;  %2360 = vmatprep.mubr.msk.bf16.mxu1 %vm2753_vm0, %v2752_v1  ;;  %v3356_v29 = vmul.u32.u64.low 3435973837, %v1627_v25  ;;  %v3357_v32 = vmul.u32.u64.high 3435973837, %v1627_v25, %v3356_v29  ;;  %v1686_v16 = vmul.u32 10, %v1685_v0 }
  0xad   : > { %2492 = vmatprep.mubr.msk.bf16.mxu0 %vm2753_vm0, %v2752_v1 }
  0xb3   : > { %2361 = vmatmul.mubr.msk.bf16.gmra.mrb[16].mxu1 %vm343_vm3, %v3093_v33  ;;  %v3359_v33 = vmul.u32.u64.low 3435973837, %v1628_v27  ;;  %v3360_v59 = vmul.u32.u64.high 3435973837, %v1628_v27, %v3359_v33 }
  0xb4   : > { %2493 = vmatmul.mubr.msk.bf16.gmra.mrb[8].mxu0 %vm343_vm3, %v1487_v4  ;;  %2380 = vmatprep.mubr.msk.bf16.mxu1 %vm2753_vm0, %v2752_v1 }
  0xb5   : > { %2496 = vmatprep.mubr.msk.bf16.mxu0 %vm2753_vm0, %v2752_v1  ;;  %v1674_v15 = vshrl.u32 %v3360_v59, 3 }
  0xb7   : > { %v1675_v37 = vmul.u32 10, %v1674_v15 }
  0xb9   : > { %v1676_v52 = vsub.s32 %v1628_v27, %v1675_v37 }
  0xbb   : > { %2381 = vmatmul.mubr.msk.bf16.vlgmr.msra.gmra.mrb[8].mxu1 %vm343_vm3, %v3109_v51  ;;  %vm1748_vm2 = vcmp.ne.s32.totalorder %v1676_v52, 0  ;;  %vm1758_vm4 = vcmp.lt.s32.totalorder %v1676_v52, 0  ;;  %v1778_v46 = vadd.s32 10, %v1676_v52 }
  0xbc   : > { %2497 = vmatmul.mubr.msk.bf16.gmra.mrb[12].mxu0 %vm343_vm3, %v1489_v6  ;;  %2384 = vmatprep.mubr.msk.bf16.mxu1 %vm2753_vm0, %v2752_v1  ;;  %v3424_v4 = vmul.u32.u64.low 3435973837, %v3400_v54  ;;  %v3425_v6 = vmul.u32.u64.high 3435973837, %v3400_v54, %v3424_v4  ;;  %vm3427_vm6 = vmand %vm1758_vm4, %vm1748_vm2 }
  0xbd   : > { %2500 = vmatprep.mubr.msk.bf16.mxu0 %vm2753_vm0, %v2752_v1  ;;  %v1788_v29 = vsel %vm3427_vm6, %v1778_v46, %v1676_v52 }
  0xc3   : > { %2385 = vmatmul.mubr.msk.bf16.gmra.mrb[12].mxu1 %vm343_vm3, %v3121_v60  ;;  %v1653_v60 = vmul.u32 10, %v1652_v43 }
  0xc4   : > { %2501 = vmatmul.mubr.msk.bf16.gmra.mrb[16].mxu0 %vm343_vm3, %v3114_v31  ;;  %2388 = vmatprep.mubr.msk.bf16.mxu1 %vm2753_vm0, %v2752_v1  ;;  %v1641_v1 = vshrl.u32 %v3347_v11, 3 }
  0xc5   : > { %v1654_v21 = vsub.s32 %v1626_v10, %v1653_v60 }
  0xc6   : > { %v1642_v51 = vmul.u32 10, %v1641_v1  ;;  %v3440_v1 = vadd.s32 64, %v3342_v53 }
  0xc7   : > { %vm1746_vm10 = vcmp.ne.s32.totalorder %v1654_v21, 0  ;;  %vm1756_vm11 = vcmp.lt.s32.totalorder %v1654_v21, 0  ;;  %v1776_v36 = vadd.s32 10, %v1654_v21 }
  0xc8   : > { %v1643_v14 = vsub.s32 %v3342_v53, %v1642_v51  ;;  %vm3383_vm13 = vmand %vm1756_vm11, %vm1746_vm10 }
  0xc9   : > { %v1786_v50 = vsel %vm3383_vm13, %v1776_v36, %v1654_v21  ;;  %v1707_v21 = vshrl.u32 %v3419_v62, 3 }
  0xca   : > { %vm1745_vm8 = vcmp.ne.s32.totalorder %v1643_v14, 0  ;;  %vm1755_vm9 = vcmp.lt.s32.totalorder %v1643_v14, 0  ;;  %v1775_v28 = vadd.s32 10, %v1643_v14  ;;  %vm3407_vm1 = vcmp.lt.s32.totalorder %v1786_v50, 8 }
  0xcb   : > { %2389 = vmatmul.mubr.msk.bf16.gmra.mrb[16].mxu1 %vm343_vm3, %v3134_v61  ;;  %v1663_v61 = vshrl.u32 %v3357_v32, 3  ;;  %vm3375_vm12 = vmand %vm1755_vm9, %vm1745_vm8  ;;  %v1697_v32 = vmul.u32 10, %v1696_v13  ;;  %vm1798_vm8 = vcmp.lt.s32.totalorder %v1788_v29, 8  ;;  %v1708_v49 = vmul.u32 10, %v1707_v21 }
  0xcc   : > { %v1785_v42 = vsel %vm3375_vm12, %v1775_v28, %v1643_v14  ;;  %v1718_v28 = vshrl.u32 %v3425_v6, 3 }
  0xcd   : > { %v1664_v26 = vmul.u32 10, %v1663_v61  ;;  %vm1795_vm0 = vcmp.lt.s32.totalorder %v1785_v42, 8  ;;  %v3453_v61 = vmul.u32.u64.low 3435973837, %v3440_v1  ;;  %v3454_v15 = vmul.u32.u64.high 3435973837, %v3440_v1, %v3453_v61 }
  0xcf   : > { %v1665_v48 = vsub.s32 %v1627_v25, %v1664_v26  ;;  %v1729_v0 = vshrl.u32 %v3454_v15, 3 }
  0xd1   : > { %vm1747_vm14 = vcmp.ne.s32.totalorder %v1665_v48, 0  ;;  %vm1757_vm15 = vcmp.lt.s32.totalorder %v1665_v48, 0  ;;  %v1777_v57 = vadd.s32 10, %v1665_v48 }
  0xd2   : > { %vm3412_vm5 = vmand %vm1757_vm15, %vm1747_vm14 }
  0xd3   : > { %v1787_v11 = vsel %vm3412_vm5, %v1777_v57, %v1665_v48  ;;  %v1719_v48 = vmul.u32 10, %v1718_v28 }
  0xd4   : > { %vm1797_vm7 = vcmp.lt.s32.totalorder %v1787_v11, 8 }
  0xd5   : > { %v1720_v46 = vsub.s32 %v3400_v54, %v1719_v48 }
  0xd7   : > { %vm1752_vm2 = vcmp.ne.s32.totalorder %v1720_v46, 0  ;;  %vm1762_vm4 = vcmp.lt.s32.totalorder %v1720_v46, 0  ;;  %v1782_v11 = vadd.s32 10, %v1720_v46 }
 0x166   : > { %v783_v31 = vpop.f32.mrb[0].mxu1 }
 0x167   : > { %v2346_v3 = vpop.f32.mrb[1].mxu1 }
 0x168   : > { %v786_v9 = vpop.f32.mrb[2].mxu1 }
 0x169   : > { %v2347_v19 = vpop.f32.mrb[3].mxu1 }
 0x16a   : > { %v1687_v19 = vsub.s32 %v3366_v24, %v1686_v16 }
 0x16c   : > { %vm1749_vm9 = vcmp.ne.s32.totalorder %v1687_v19, 0  ;;  %vm1759_vm10 = vcmp.lt.s32.totalorder %v1687_v19, 0  ;;  %v1779_v52 = vadd.s32 10, %v1687_v19 }
 0x16d   : > { %vm1769_vm13 = vmand %vm1759_vm10, %vm1749_vm9 }
 0x16e   : > { %v3371_v23 = vpop.f32.mrb[4].mxu1  ;;  %v1789_v13 = vsel %vm1769_vm13, %v1779_v52, %v1687_v19 }
 0x16f   : > { %v2350_v17 = vpop.f32.mrb[5].mxu1 }
 0x170   : > { %v3373_v34 = vpop.f32.mrb[6].mxu1 }
 0x171   : > { %v2351_v44 = vpop.f32.mrb[7].mxu1 }
 0x177   : > { %v1565_v45 = vpop.f32.mrb[0].mxu0 }
 0x178   : > { %v2512_v12 = vadd.f32 %v1565_v45, %v783_v31  ;;  %v2486_v58 = vpop.f32.mrb[1].mxu0  ;;  %v3447_v31 = vadd.s32 72, %v3342_v53 }
 0x179   : > { %v1568_v30 = vpop.f32.mrb[2].mxu0  ;;  %v1709_v58 = vsub.s32 %v3397_v56, %v1708_v49 }
 0x17a   : > { %1614 = vst.msk [vmem:[%s3405_s24] sm:$0xff] %vm343_vm3, %v2512_v12  ;;  %v1825_v20 = vsel %vm1795_vm0, %v2512_v12, 0.0  ;;  %v2513_v41 = vadd.f32 %v1568_v30, %v786_v9  ;;  %v2487_v2 = vpop.f32.mrb[3].mxu0  ;;  %v3463_v36 = vmul.u32.u64.low 3435973837, %v3447_v31  ;;  %v3464_v37 = vmul.u32.u64.high 3435973837, %v3447_v31, %v3463_v36 }
 0x17b   : > { %v1862_v8 = vmul.f32 %v1825_v20, %v1825_v20  ;;  %v1835_v22 = vsel %vm343_vm3, %v1825_v20, 0.0  ;;  %vm1751_vm15 = vcmp.ne.s32.totalorder %v1709_v58, 0  ;;  %vm1761_vm0 = vcmp.lt.s32.totalorder %v1709_v58, 0 }
 0x17c   : > { %1615 = vst.msk [vmem:[%s3405_s24 + $0x8] sm:$0xff] %vm343_vm3, %v2513_v41  ;;  %v1826_v35 = vsel %vm3407_vm1, %v2513_v41, 0.0  ;;  %v1740_v7 = vshrl.u32 %v3464_v37, 3  ;;  %v1730_v20 = vmul.u32 10, %v1729_v0  ;;  %vm1799_vm1 = vcmp.lt.s32.totalorder %v1789_v13, 8  ;;  %vm3484_vm6 = vmand %vm1761_vm0, %vm1751_vm15 }
 0x17d   : > { %v1836_v25 = vsel %vm343_vm3, %v1826_v35, 0.0  ;;  %v1863_v27 = vmul.f32 %v1826_v35, %v1826_v35  ;;  %v1872_v33 = vsel %vm343_vm3, %v1862_v8, 0.0  ;;  %v1781_v6 = vadd.s32 10, %v1709_v58 }
 0x17e   : > { %v1837_v43 = vadd.f32 %v1836_v25, %v1835_v22  ;;  %v1741_v8 = vmul.u32 10, %v1740_v7  ;;  %v1731_v29 = vsub.s32 %v3440_v1, %v1730_v20 }
 0x17f   : > { %v1873_v59 = vsel %vm343_vm3, %v1863_v27, 0.0  ;;  %v1573_v51 = vpop.f32.mrb[4].mxu0 }
 0x180   : > { %v1874_v60 = vadd.f32 %v1873_v59, %v1872_v33  ;;  %v2514_v3 = vadd.f32 %v1573_v51, %v3371_v23  ;;  %v2490_v9 = vpop.f32.mrb[5].mxu0  ;;  %v1698_v23 = vsub.s32 %v3369_v63, %v1697_v32  ;;  %vm1763_vm9 = vcmp.lt.s32.totalorder %v1731_v29, 0 }
 0x181   : > { %v1576_v14 = vpop.f32.mrb[6].mxu0  ;;  %v1742_v9 = vsub.s32 %v3447_v31, %v1741_v8 }
 0x182   : > { %1616 = vst.msk [vmem:[%s3405_s24 + $0x10] sm:$0xff] %vm343_vm3, %v2514_v3  ;;  %v1827_v26 = vsel %vm1797_vm7, %v2514_v3, 0.0  ;;  %v2515_v53 = vadd.f32 %v1576_v14, %v3373_v34  ;;  %v2491_v17 = vpop.f32.mrb[7].mxu0  ;;  %vm1750_vm11 = vcmp.ne.s32.totalorder %v1698_v23, 0  ;;  %vm1760_vm12 = vcmp.lt.s32.totalorder %v1698_v23, 0  ;;  %vm3492_vm7 = vmand %vm1762_vm4, %vm1752_vm2 }
 0x183   : > { %v1838_v24 = vsel %vm343_vm3, %v1827_v26, 0.0  ;;  %v1864_v18 = vmul.f32 %v1827_v26, %v1827_v26  ;;  %v1780_v12 = vadd.s32 10, %v1698_v23  ;;  %vm3475_vm14 = vmand %vm1760_vm12, %vm1750_vm11  ;;  %v1791_v3 = vsel %vm3484_vm6, %v1781_v6, %v1709_v58 }
 0x184   : > { %v1839_v38 = vadd.f32 %v1838_v24, %v1837_v43  ;;  %1617 = vst.msk [vmem:[%s3405_s24 + $0x18] sm:$0xff] %vm343_vm3, %v2515_v53  ;;  %v1828_v40 = vsel %vm1798_vm8, %v2515_v53, 0.0  ;;  %v1792_v1 = vsel %vm3492_vm7, %v1782_v11, %v1720_v46  ;;  %vm1753_vm8 = vcmp.ne.s32.totalorder %v1731_v29, 0 }
 0x185   : > { %v1875_v34 = vsel %vm343_vm3, %v1864_v18, 0.0  ;;  %v1840_v44 = vsel %vm343_vm3, %v1828_v40, 0.0  ;;  %v1865_v63 = vmul.f32 %v1828_v40, %v1828_v40  ;;  %v1790_v62 = vsel %vm3475_vm14, %v1780_v12, %v1698_v23  ;;  %vm3509_vm14 = vmand %vm1763_vm9, %vm1753_vm8 }
 0x186   : > { %v1876_v39 = vadd.f32 %v1875_v34, %v1874_v60  ;;  %v1841_v47 = vadd.f32 %v1840_v44, %v1839_v38  ;;  %vm1800_vm5 = vcmp.lt.s32.totalorder %v1790_v62, 8  ;;  %vm1801_vm10 = vcmp.lt.s32.totalorder %v1791_v3, 8 }
 0x187   : > { %v1877_v42 = vsel %vm343_vm3, %v1865_v63, 0.0  ;;  %v1581_v50 = vpop.f32.mrb[8].mxu0  ;;  %v1783_v17 = vadd.s32 10, %v1731_v29  ;;  %vm1754_vm11 = vcmp.ne.s32.totalorder %v1742_v9, 0  ;;  %vm1764_vm12 = vcmp.lt.s32.totalorder %v1742_v9, 0 }
 0x188   : > { %v1878_v45 = vadd.f32 %v1877_v42, %v1876_v39  ;;  %v2494_v55 = vpop.f32.mrb[9].mxu0  ;;  %vm1802_vm13 = vcmp.lt.s32.totalorder %v1792_v1, 8  ;;  %v1784_v63 = vadd.s32 10, %v1742_v9  ;;  %vm3517_vm15 = vmand %vm1764_vm12, %vm1754_vm11  ;;  %vm1860_vm2 = vcmask 516096  }
 0x189   : > { %v1584_v57 = vpop.f32.mrb[10].mxu0  ;;  %v1793_v52 = vsel %vm3509_vm14, %v1783_v17, %v1731_v29 }
 0x18a   : > { %v2495_v30 = vpop.f32.mrb[11].mxu0  ;;  %v1794_v0 = vsel %vm3517_vm15, %v1784_v63, %v1742_v9  ;;  %vm1803_vm0 = vcmp.lt.s32.totalorder %v1793_v52, 8 }
 0x18e   : > { %v984_v56 = vpop.f32.mrb[8].mxu1 }
 0x18f   : > { %v2516_v41 = vadd.f32 %v1581_v50, %v984_v56  ;;  %v1589_v2 = vpop.f32.mrb[12].mxu0  ;;  %v2382_v4 = vpop.f32.mrb[9].mxu1 }
 0x190   : > { %v2498_v54 = vpop.f32.mrb[13].mxu0  ;;  %v987_v10 = vpop.f32.mrb[10].mxu1 }
 0x191   : > { %1618 = vst.msk [vmem:[%s3405_s24 + $0x20] sm:$0xff] %vm343_vm3, %v2516_v41  ;;  %v1829_v16 = vsel %vm1799_vm1, %v2516_v41, 0.0  ;;  %v2517_v22 = vadd.f32 %v1584_v57, %v987_v10  ;;  %v1592_v25 = vpop.f32.mrb[14].mxu0  ;;  %v2383_v27 = vpop.f32.mrb[11].mxu1  ;;  %vm1804_vm1 = vcmp.lt.s32.totalorder %v1794_v0, 8 }
 0x192   : > { %v1842_v32 = vsel %vm343_vm3, %v1829_v16, 0.0  ;;  %v1866_v33 = vmul.f32 %v1829_v16, %v1829_v16  ;;  %v2499_v59 = vpop.f32.mrb[15].mxu0 }
 0x193   : > { %v1843_v51 = vadd.f32 %v1842_v32, %v1841_v47  ;;  %1619 = vst.msk [vmem:[%s3405_s24 + $0x28] sm:$0xff] %vm343_vm3, %v2517_v22  ;;  %v1830_v60 = vsel %vm1800_vm5, %v2517_v22, 0.0 }
 0x194   : > { %v1879_v19 = vsel %vm343_vm3, %v1866_v33, 0.0  ;;  %v1844_v14 = vsel %vm343_vm3, %v1830_v60, 0.0  ;;  %v1867_v21 = vmul.f32 %v1830_v60, %v1830_v60 }
 0x195   : > { %v1880_v61 = vadd.f32 %v1879_v19, %v1878_v45  ;;  %v1845_v15 = vadd.f32 %v1844_v14, %v1843_v51 }
 0x196   : > { %v1881_v26 = vsel %vm343_vm3, %v1867_v21, 0.0  ;;  %v992_v53 = vpop.f32.mrb[12].mxu1 }
 0x197   : > { %v1882_v23 = vadd.f32 %v1881_v26, %v1880_v61  ;;  %v2518_v31 = vadd.f32 %v1589_v2, %v992_v53  ;;  %v1597_v28 = vpop.f32.mrb[16].mxu0  ;;  %v2386_v24 = vpop.f32.mrb[13].mxu1 }
 0x198   : > { %v2502_v18 = vpop.f32.mrb[17].mxu0  ;;  %v995_v36 = vpop.f32.mrb[14].mxu1 }
 0x199   : > { %1620 = vst.msk [vmem:[%s3405_s24 + $0x30] sm:$0xff] %vm343_vm3, %v2518_v31  ;;  %v1831_v38 = vsel %vm1801_vm10, %v2518_v31, 0.0  ;;  %v2519_v40 = vadd.f32 %v1592_v25, %v995_v36  ;;  %v1600_v34 = vpop.f32.mrb[18].mxu0  ;;  %v2387_v44 = vpop.f32.mrb[15].mxu1 }
 0x19a   : > { %v1846_v49 = vsel %vm343_vm3, %v1831_v38, 0.0  ;;  %v1868_v39 = vmul.f32 %v1831_v38, %v1831_v38  ;;  %v2503_v47 = vpop.f32.mrb[19].mxu0 }
 0x19b   : > { %v1847_v42 = vadd.f32 %v1846_v49, %v1845_v15  ;;  %1621 = vst.msk [vmem:[%s3405_s24 + $0x38] sm:$0xff] %vm343_vm3, %v2519_v40  ;;  %v1832_v50 = vsel %vm1802_vm13, %v2519_v40, 0.0 }
 0x19c   : > { %v1883_v45 = vsel %vm343_vm3, %v1868_v39, 0.0  ;;  %v1848_v55 = vsel %vm343_vm3, %v1832_v50, 0.0  ;;  %v1869_v57 = vmul.f32 %v1832_v50, %v1832_v50 }
 0x19d   : > { %v1884_v12 = vadd.f32 %v1883_v45, %v1882_v23  ;;  %v1849_v58 = vadd.f32 %v1848_v55, %v1847_v42 }
 0x19e   : > { %v1885_v30 = vsel %vm343_vm3, %v1869_v57, 0.0  ;;  %v1000_v5 = vpop.f32.mrb[16].mxu1 }
 0x19f   : > { %v1886_v46 = vadd.f32 %v1885_v30, %v1884_v12  ;;  %v2520_v13 = vadd.f32 %v1597_v28, %v1000_v5  ;;  %v2390_v7 = vpop.f32.mrb[17].mxu1 }
 0x1a0   : > { %v1003_v62 = vpop.f32.mrb[18].mxu1 }
 0x1a1   : > { %1622 = vst.msk [vmem:[%s3405_s24 + $0x40] sm:$0xff] %vm343_vm3, %v2520_v13  ;;  %v1833_v20 = vsel %vm1803_vm0, %v2520_v13, 0.0  ;;  %v2521_v56 = vadd.f32 %v1600_v34, %v1003_v62  ;;  %v2391_v41 = vpop.f32.mrb[19].mxu1 }
 0x1a2   : > { %v1850_v2 = vsel %vm343_vm3, %v1833_v20, 0.0  ;;  %v1870_v4 = vmul.f32 %v1833_v20, %v1833_v20 }
 0x1a3   : > { %v1851_v6 = vadd.f32 %v1850_v2, %v1849_v58  ;;  %1623 = vst.msk [vmem:[%s3405_s24 + $0x48] sm:$0xff] %vm343_vm3, %v2521_v56  ;;  %v1834_v8 = vsel %vm1804_vm1, %v2521_v56, 0.0 }
 0x1a4   : > { %v1887_v54 = vsel %vm343_vm3, %v1870_v4, 0.0  ;;  %v1852_v10 = vsel %vm343_vm3, %v1834_v8, 0.0  ;;  %v1871_v35 = vmul.f32 %v1834_v8, %v1834_v8 }
 0x1a5   : > { %v1888_v11 = vadd.f32 %v1887_v54, %v1886_v46  ;;  %v1853_v16 = vadd.f32 %v1852_v10, %v1851_v6 }
 0x1a6   : > { %v1889_v22 = vsel %vm343_vm3, %v1871_v35, 0.0 }
 0x1a7   : > { %v1854_v25 = vrot.slane %v1853_v16, 4  ;;  %v1890_v27 = vadd.f32 %v1889_v22, %v1888_v11 }
 0x1a9   : > { %v1855_v43 = vadd.f32 %v1854_v25, %v1853_v16  ;;  %v1891_v29 = vrot.slane %v1890_v27, 4 }
 0x1ab   : > { %v1856_v32 = vrot.slane %v1855_v43, 2  ;;  %v1892_v33 = vadd.f32 %v1891_v29, %v1890_v27 }
 0x1ad   : > { %v1857_v59 = vadd.f32 %v1856_v32, %v1855_v43  ;;  %v1893_v51 = vrot.slane %v1892_v33, 2 }
 0x1af   : > { %v1858_v60 = vrot.slane %v1857_v59, 1  ;;  %v1894_v3 = vadd.f32 %v1893_v51, %v1892_v33 }
 0x1b1   : > { %v1859_v9 = vadd.f32 %v1858_v60, %v1857_v59  ;;  %v1895_v19 = vrot.slane %v1894_v3, 1 }
 0x1b3   : > { %1861 = vst.msk [vmem:[%s211_s27] sm:$0x1] %vm1860_vm2, %v1859_v9  ;;  %v1896_v14 = vadd.f32 %v1895_v19, %v1894_v3 }
 0x1b5   : > { %1897 = vst.msk [vmem:[%s214_s30] sm:$0x1] %vm1860_vm2, %v1896_v14 }
 0x1b6 PF: > { %s15_s15 = sadd.s32 1, %s2750_s15  }
 0x1b7   : > { %p12_p4 = scmp.ge.s32.totalorder %s15_s15, 4  }
 0x1b9   :  { %14 = sbr.rel (!%p12_p4) target bundleno = 1 (0x1), region = 90 }

// kernel: _lambda_.19
= control target key start
LH: loop header
LB: loop body
LE: loop exit
PB: predicated region body
PF: predicated region fallthrough
CT: control target
= control target key end

     0   :  { %11 = vsyncpa [#allocation3], 0  ;;  %s833_s0 = inlined_call_operand.vmem [shape: f32[2,64,64], index: 0, kind: input, shape index: {}]   ;;  %s834_s1 = inlined_call_operand.vmem [shape: f32[2,1,64], index: 1, kind: input, shape index: {}]   ;;  %s835_s2 = inlined_call_operand.vmem [shape: f32[2,1,64], index: 2, kind: input, shape index: {}]   ;;  %s836_s3 = inlined_call_operand.vmem [shape: f32[1,64], index: 3, kind: input, shape index: {}]   ;;  %s837_s4 = inlined_call_operand.vmem [shape: f32[1,64], index: 4, kind: input, shape index: {}]   ;;  %s838_s5 = inlined_call_operand.vmem [shape: bf16[2,64,64], index: 5, kind: input, shape index: {}]   ;;  %s839_s6 = inlined_call_operand.hbm [shape: bf16[2,64,64], index: 6, kind: output, shape index: {}]  }
   0x1   :  { %13 = vsyncpa [#allocation3 + $0x1], 0  ;;  %s686_s21 = smov 0   ;;  %s688_s22 = smov 0  }
   0x2   :  { %s690_s23 = smov 0   ;;  %s692_s24 = smov 0  }
   0x3 LB: > { %s707_s25 = sadd.s32 4294967295, %s646_s24   ;;  %s489_s26 = sadd.s32 4294967294, %s646_s24   ;;  %s646_s24 = sphi %s692_s24, %s845_s24   ;;  %s642_s23 = sphi %s690_s23, %s844_s23   ;;  %s638_s22 = sphi %s688_s22, %s843_s22   ;;  %s634_s21 = sphi %s686_s21, %s842_s21  }
   0x4   : > { %s711_s27 = sadd.s32 1, %s646_s24   ;;  %s162_s28 = sadd.s32 1, %s642_s23 }
   0x5   : > { %s159_s29 = ssub.s32 %s646_s24, %s711_s27  ;;  %p172_p0 = scmp.ne.s32.totalorder %s642_s23, %s638_s22 }
   0x6   : > { %p160_p1 = scmp.eq.s32.totalorder %s159_s29, 0  ;;  %p173_p2 = scmp.eq.s32.totalorder %s707_s25, 1 }
   0x7   : > { %p178_p3 = scmp.ne.s32.totalorder %s638_s22, %s634_s21  ;;  %p179_p4 = scmp.eq.s32.totalorder %s489_s26, 1 }
   0x8   : > { %s722_s30 = scalar_select %p160_p1, %s642_s23, %s162_s28  }
   0x9   : > { %p724_p5 = por %p173_p2, %p172_p0  ;;  %p728_p6 = por %p179_p4, %p178_p3 }
   0xa   : > { %p492_p7 = scmp.ge.s32.totalorder %s646_s24, 1  ;;  %p225_p8 = scmp.lt.s32.totalorder %s646_s24, 3 }
   0xc   : > { %p226_p9 = pnand %p492_p7, %p225_p8 }
   0xd   : > { %v270_v0 = vld [vmem:[%s834_s1] sm:$0x1] (!%p226_p9)  ;;  %v271_v1 = vld [vmem:[%s834_s1 + $0x1] sm:$0x1] (!%p226_p9)  ;;  %vm272_vm0 = vcmask (!%p226_p9), 516096   ;;  %p260_p10 = scmp.lt.s32.totalorder (!%p226_p9), %s707_s25, 1  ;;  %v301_v15 = vlaneseq (!%p226_p9) }
   0xe   : > { %229 = sbr.rel (%p226_p9) target bundleno = 71 (0x47), region = 44  ;;  %v276_v2 = vld [vmem:[%s835_s2] sm:$0x1] (!%p226_p9)  ;;  %v277_v3 = vld [vmem:[%s835_s2 + $0x1] sm:$0x1] (!%p226_p9)  ;;  %v273_v4 = vsel (!%p226_p9), %vm272_vm0, %v270_v0, 0.0 }
   0xf   : > { %v274_v5 = vsel (!%p226_p9), %vm272_vm0, %v271_v1, 0.0  ;;  %v278_v6 = vsel (!%p226_p9), %vm272_vm0, %v276_v2, 0.0  ;;  %v279_v7 = vsel (!%p226_p9), %vm272_vm0, %v277_v3, 0.0  ;;  %v302_v16 = vshrl.u32 (!%p226_p9), %v301_v15, 7  ;;  %v285_v17 = vld [vmem:[%s836_s3] sm:$0x1] (!%p226_p9) }
  0x10   : > { %v275_v8 = vadd.f32 (!%p226_p9), %v274_v5, %v273_v4  ;;  %v280_v9 = vadd.f32 (!%p226_p9), %v279_v7, %v278_v6  ;;  %v289_v21 = vld [vmem:[%s837_s4] sm:$0x1] (!%p226_p9)  ;;  %s257_s15 = sand.u32 (!%p226_p9), 1, %s638_s22   ;;  %vm392_vm1 = vcmask (!%p226_p9), 519168   ;;  %s648_s9 = smov (!%p226_p9), [#allocation2]  }
  0x11   : > { %v303_v18 = vsub.s32 (!%p226_p9), 0, %v302_v16  ;;  %s493_s16 = sshll.u32 (!%p226_p9), %s257_s15, 5 }
  0x12   : > { %v281_v10 = vmul.f32 (!%p226_p9), 0.0078125, %v275_v8  ;;  %v282_v11 = vmul.f32 (!%p226_p9), 0.0078125, %v280_v9 }
  0x14   : > { %v283_v12 = vmul.f32 (!%p226_p9), %v281_v10, %v281_v10 }
  0x15   : > { %s261_s17 = scalar_select %p260_p10, %s707_s25, 1 }
  0x16   : > { %v284_v13 = vsub.f32 %v282_v11, %v283_v12 }
  0x17   : > { %s511_s18 = sshll.u32 %s261_s17, 6  ;;  %s512_s19 = sshll.u32 %s261_s17, 5 }
  0x18   : > { %v286_v14 = vadd.f32 1e-05, %v284_v13  ;;  %s264_s28 = scalar_lea.vmem %s833_s0, %s511_s18  ;;  %s269_s10 = scalar_lea.vmem %s838_s5, %s512_s19 }
  0x19   : > { %v292_v22 = vld [vmem:[%s264_s28] sm:$0xff]  ;;  %v293_v24 = vld [vmem:[%s264_s28 + $0x8] sm:$0xff]  ;;  %v294_v25 = vld [vmem:[%s264_s28 + $0x10] sm:$0xff]  ;;  %s763_s17 = scalar_lea.vmem [#allocation2], %s493_s16  ;;  %s521_s19 = sshll.u32 %s707_s25, 9 }
  0x1a   : > { %582 = vrsqrt.f32 %v286_v14  ;;  %v523_v23 = vld [vmem:[%s269_s10] sm:$0xff]   ;;  %v295_v26 = vld [vmem:[%s264_s28 + $0x18] sm:$0xff]  ;;  %v297_v30 = vld [vmem:[%s264_s28 + $0x28] sm:$0xff]  ;;  %s415_s18 = sshll.u32 %s763_s17, 4  ;;  %s772_s26 = scalar_lea.hbm %s839_s6, %s521_s19  ;;  %s767_s18 = int_to_ptr.vmem [resolvable:$true] %s415_s18 }
  0x1b   : > { %v296_v29 = vld [vmem:[%s264_s28 + $0x20] sm:$0xff]  ;;  %v298_v31 = vld [vmem:[%s264_s28 + $0x30] sm:$0xff]  ;;  %v524_v32 = vunpack.c.l.bf16 %v523_v23  ;;  %v525_v33 = vunpack.c.h.bf16 %v523_v23  ;;  %v538_v34 = vld [vmem:[%s269_s10 + $0x8] sm:$0xff]   ;;  %s584_s29 = scalar_lea.vmem %s767_s18, 512 }
  0x1c   : > { %v299_v35 = vld [vmem:[%s264_s28 + $0x38] sm:$0xff]  ;;  %v539_v40 = vld [vmem:[%s269_s10 + $0x10] sm:$0xff]   ;;  %v528_v47 = vunpack.c.l.bf16 %v538_v34  ;;  %v529_v48 = vunpack.c.h.bf16 %v538_v34  ;;  %s792_s28 = scalar_lea.sflag [#allocation3], %s257_s15  ;;  %p585_p11 = scmp.ne.s32.totalorder %s767_s18, %s584_s29 }
  0x1d   : > { %v540_v41 = vld [vmem:[%s269_s10 + $0x18] sm:$0xff]   ;;  %v532_v50 = vunpack.c.l.bf16 %v539_v40  ;;  %v533_v51 = vunpack.c.h.bf16 %v539_v40  ;;  %s588_s10 = sshll.u32 %s648_s9, 4  ;;  %s589_s10 = int_to_ptr.vmem [resolvable:$false] %s588_s10 }
  0x1e   : > { %v536_v52 = vunpack.c.l.bf16 %v540_v41  ;;  %v537_v53 = vunpack.c.h.bf16 %v540_v41  ;;  %p586_p12 = pnand %p585_p11, %p724_p5  ;;  %s590_s11 = scalar_lea.vmem %s589_s10, 1024 }
  0x1f   : > { %p591_p0 = scmp.lt.s32.totalorder %s767_s18, %s589_s10  ;;  %p592_p1 = scmp.lt.s32.totalorder %s590_s11, %s584_s29 }
  0x20   : > { %p587_p13 = pneg %p586_p12 }
  0x21   : > { %p593_p2 = por %p592_p1, %p591_p0 }
  0x23   : > { %p594_p3 = pnand %p593_p2, %p587_p13 }
  0x24   : > { %v583_v19 = vpop.eup %582 }
  0x25   : > { %v288_v20 = vmul.f32 %v583_v19, %v285_v17 }
  0x27   : > { %v290_v27 = vmul.f32 %v288_v20, %v281_v10  ;;  %v304_v28 = vrot.slane %v288_v20, %v303_v18 }
  0x29   : > { %v291_v36 = vsub.f32 %v289_v21, %v290_v27  ;;  %v306_v37 = vmul.f32 %v304_v28, %v292_v22  ;;  %v307_v38 = vmul.f32 %v304_v28, %v293_v24  ;;  %v308_v39 = vmul.f32 %v304_v28, %v294_v25 }
  0x2a   : > { %v309_v42 = vmul.f32 %v304_v28, %v295_v26  ;;  %v310_v43 = vmul.f32 %v304_v28, %v296_v29  ;;  %v311_v44 = vmul.f32 %v304_v28, %v297_v30  ;;  %v312_v45 = vmul.f32 %v304_v28, %v298_v31 }
  0x2b   : > { %v318_v46 = vrot.slane %v291_v36, %v303_v18  ;;  %v313_v49 = vmul.f32 %v304_v28, %v299_v35 }
  0x2d   : > { %v320_v54 = vadd.f32 %v318_v46, %v306_v37  ;;  %v321_v55 = vadd.f32 %v318_v46, %v307_v38  ;;  %v322_v56 = vadd.f32 %v318_v46, %v308_v39  ;;  %v323_v57 = vadd.f32 %v318_v46, %v309_v42 }
  0x2e   : > { %v324_v58 = vadd.f32 %v318_v46, %v310_v43  ;;  %v325_v59 = vadd.f32 %v318_v46, %v311_v44  ;;  %v326_v60 = vadd.f32 %v318_v46, %v312_v45  ;;  %v327_v61 = vadd.f32 %v318_v46, %v313_v49 }
  0x2f   : > { %v344_v62 = vadd.f32 %v524_v32, %v320_v54  ;;  %v345_v63 = vadd.f32 %v525_v33, %v321_v55  ;;  %v346_v0 = vadd.f32 %v528_v47, %v322_v56  ;;  %v347_v1 = vadd.f32 %v529_v48, %v323_v57 }
  0x30   : > { %v348_v2 = vadd.f32 %v532_v50, %v324_v58  ;;  %v349_v3 = vadd.f32 %v533_v51, %v325_v59  ;;  %v350_v4 = vadd.f32 %v536_v52, %v326_v60  ;;  %v351_v5 = vadd.f32 %v537_v53, %v327_v61 }
  0x31   : > { %v352_v6 = vmax.f32 %v344_v62, 0.0  ;;  %v353_v7 = vmax.f32 %v345_v63, 0.0  ;;  %v354_v8 = vmax.f32 %v346_v0, 0.0  ;;  %v355_v9 = vmax.f32 %v347_v1, 0.0 }
  0x32   : > { %v356_v10 = vmax.f32 %v348_v2, 0.0  ;;  %v357_v11 = vmax.f32 %v349_v3, 0.0  ;;  %v358_v12 = vmax.f32 %v350_v4, 0.0  ;;  %v359_v13 = vmax.f32 %v351_v5, 0.0 }
  0x33   : > { %v513_v14 = vpack.c.bf16 %v352_v6, %v352_v6  ;;  %v514_v15 = vpack.c.bf16 %v353_v7, %v353_v7  ;;  %v515_v16 = vpack.c.bf16 %v354_v8, %v354_v8  ;;  %v516_v17 = vpack.c.bf16 %v355_v9, %v355_v9 }
  0x34   : > { %v517_v18 = vpack.c.bf16 %v356_v10, %v356_v10  ;;  %v518_v19 = vpack.c.bf16 %v357_v11, %v357_v11  ;;  %v519_v20 = vpack.c.bf16 %v358_v12, %v358_v12  ;;  %v520_v21 = vpack.c.bf16 %v359_v13, %v359_v13 }
  0x35   : > { %393 = vst.msk [vmem:[%s763_s17] sm:$0xf] %vm392_vm1, %v513_v14  ;;  %394 = vst.msk [vmem:[%s763_s17 + $0x4] sm:$0xf] %vm392_vm1, %v514_v15 }
  0x36   : > { %395 = vst.msk [vmem:[%s763_s17 + $0x8] sm:$0xf] %vm392_vm1, %v515_v16  ;;  %396 = vst.msk [vmem:[%s763_s17 + $0xc] sm:$0xf] %vm392_vm1, %v516_v17 }
  0x37   : > { %397 = vst.msk [vmem:[%s763_s17 + $0x10] sm:$0xf] %vm392_vm1, %v517_v18  ;;  %398 = vst.msk [vmem:[%s763_s17 + $0x14] sm:$0xf] %vm392_vm1, %v518_v19 }
  0x38   : > { %399 = vst.msk [vmem:[%s763_s17 + $0x18] sm:$0xf] %vm392_vm1, %v519_v20  ;;  %400 = vst.msk [vmem:[%s763_s17 + $0x1c] sm:$0xf] %vm392_vm1, %v520_v21 }
  0x39   : > { %597 = shalt.err (!%p594_p3)
}
  0x3a   : > { %s598_s12 = scalar_lea.hbm %s772_s26, 512  ;;  %s602_s15 = scalar_lea.hbm %s839_s6, 1024 }
  0x3b   : > { %p599_p4 = scmp.ne.s32.totalorder %s772_s26, %s598_s12  ;;  %p603_p9 = scmp.lt.u32.totalorder %s772_s26, %s839_s6 }
  0x3c   : > { %p604_p10 = scmp.lt.u32.totalorder %s602_s15, %s598_s12  ;;  %p606_p12 = scmp.lt.u32.totalorder %s598_s12, %s772_s26 }
  0x3d   : > { %p600_p7 = pnand %p599_p4, %p724_p5 }
  0x3e   : > { %p605_p11 = por %p604_p10, %p603_p9 }
  0x3f   : > { %p601_p8 = pneg %p600_p7 }
  0x40   : > { %p607_p13 = por %p606_p12, %p605_p11 }
  0x42   : > { %p608_p0 = pnand %p607_p13, %p601_p8 }
  0x44   : > { %611 = shalt.err (!%p608_p0)
}
  0x45   : > { %s649_s19 = smov 64   ;;  %s650_s25 = smov 4  }
  0x46   : > { %541 = dma.vmem_to_hbm [thread:$0]  (%p724_p5), %s767_s18, 512, %s772_s26, %s792_s28, %s649_s19, %s649_s19, %s650_s25  }
  0x47 PF: > { %p547_p1 = scmp.ge.s32.totalorder %s646_s24, 2  ;;  %s430_s20 = sand.u32 1, %s634_s21  }
  0x48   : > { %s431_s29 = scalar_lea.sflag [#allocation3], %s430_s20 }
  0x49   : > { %p544_p2 = pnand %p547_p1, %p728_p6 }
  0x4b   : > { %629 = dma.done.wait (!%p544_p2), %s431_s29, 512  }
  0x4c   : > { %631 = vsyncadd (!%p544_p2), %s431_s29, 4294966784  ;;  %p16_p3 = scmp.ge.s32.totalorder %s711_s27, 4   ;;  %s842_s21 = smov %s638_s22 }
  0x4d   : > { %s843_s22 = smov %s642_s23  ;;  %s844_s23 = smov %s722_s30 }
  0x4e   : > { %s845_s24 = smov %s711_s27  ;;  %18 = sbr.rel (!%p16_p3) target bundleno = 3 (0x3), region = 82 }
  0x55   :  { %436 = vsyncpa [#allocation3], 1 }
  0x56   :  { %438 = vsyncpa [#allocation3 + $0x1], 1 }

// kernel: _lambda_.15
= control target key start
LH: loop header
LB: loop body
LE: loop exit
PB: predicated region body
PF: predicated region fallthrough
CT: control target
= control target key end

     0   :  { %s574_s21 = smov 0   ;;  %s628_s0 = inlined_call_operand.vmem [shape: f32[2,64,64], index: 0, kind: input, shape index: {}]   ;;  %s629_s1 = inlined_call_operand.vmem [shape: f32[2,1,64], index: 1, kind: input, shape index: {}]   ;;  %s630_s2 = inlined_call_operand.vmem [shape: f32[2,1,64], index: 2, kind: input, shape index: {}]   ;;  %s631_s3 = inlined_call_operand.vmem [shape: f32[1,64], index: 3, kind: input, shape index: {}]   ;;  %s632_s4 = inlined_call_operand.vmem [shape: f32[1,64], index: 4, kind: input, shape index: {}]   ;;  %s633_s5 = inlined_call_operand.vmem [shape: bf16[2,64,64], index: 5, kind: input, shape index: {}]   ;;  %s634_s6 = inlined_call_operand.vmem [shape: bf16[2,64,64], index: 6, kind: output, shape index: {}]  }
   0x1 LB: > { %s470_s22 = sadd.s32 4294967295, %s537_s21   ;;  %p474_p0 = scmp.ge.s32.totalorder %s537_s21, 1  ;;  %s537_s21 = sphi %s574_s21, %s16_s21  }
   0x2   : > { %p222_p1 = scmp.lt.s32.totalorder %s537_s21, 3 }
   0x4   : > { %p223_p2 = pnand %p474_p0, %p222_p1 }
   0x5   : > { %v272_v0 = vld [vmem:[%s629_s1] sm:$0x1] (!%p223_p2)  ;;  %v273_v1 = vld [vmem:[%s629_s1 + $0x1] sm:$0x1] (!%p223_p2)  ;;  %vm274_vm0 = vcmask (!%p223_p2), 516096   ;;  %p257_p3 = scmp.lt.s32.totalorder (!%p223_p2), %s470_s22, 1  ;;  %v303_v15 = vlaneseq (!%p223_p2) }
   0x6   : > { %226 = sbr.rel (%p223_p2) target bundleno = 48 (0x30), region = 44  ;;  %v275_v2 = vsel (!%p223_p2), %vm274_vm0, %v272_v0, 0.0  ;;  %v276_v3 = vsel (!%p223_p2), %vm274_vm0, %v273_v1, 0.0  ;;  %v278_v4 = vld [vmem:[%s630_s2] sm:$0x1] (!%p223_p2)  ;;  %vm394_vm1 = vcmask (!%p223_p2), 519168  }
   0x7   : > { %v279_v5 = vld [vmem:[%s630_s2 + $0x1] sm:$0x1] (!%p223_p2)  ;;  %v277_v6 = vadd.f32 (!%p223_p2), %v276_v3, %v275_v2  ;;  %v280_v7 = vsel (!%p223_p2), %vm274_vm0, %v278_v4, 0.0  ;;  %v304_v16 = vshrl.u32 (!%p223_p2), %v303_v15, 7  ;;  %v287_v17 = vld [vmem:[%s631_s3] sm:$0x1] (!%p223_p2) }
   0x8   : > { %v281_v8 = vsel (!%p223_p2), %vm274_vm0, %v279_v5, 0.0  ;;  %v291_v21 = vld [vmem:[%s632_s4] sm:$0x1] (!%p223_p2) }
   0x9   : > { %v282_v9 = vadd.f32 (!%p223_p2), %v281_v8, %v280_v7  ;;  %v283_v10 = vmul.f32 (!%p223_p2), 0.0078125, %v277_v6  ;;  %v305_v18 = vsub.s32 (!%p223_p2), 0, %v304_v16 }
   0xb   : > { %v284_v11 = vmul.f32 (!%p223_p2), 0.0078125, %v282_v9  ;;  %v285_v12 = vmul.f32 (!%p223_p2), %v283_v10, %v283_v10 }
   0xd   : > { %v286_v13 = vsub.f32 %v284_v11, %v285_v12  ;;  %s636_s22 = smov (!%p257_p3, %s470_s22), 1 }
   0xe   : > { %s491_s7 = sshll.u32 %s636_s22, 6  ;;  %s492_s8 = sshll.u32 %s636_s22, 5 }
   0xf   : > { %v288_v14 = vadd.f32 1e-05, %v286_v13  ;;  %s261_s11 = scalar_lea.vmem %s628_s0, %s491_s7  ;;  %s266_s14 = scalar_lea.vmem %s633_s5, %s492_s8 }
  0x10   : > { %v294_v22 = vld [vmem:[%s261_s11] sm:$0xff]  ;;  %v295_v24 = vld [vmem:[%s261_s11 + $0x8] sm:$0xff]  ;;  %v296_v25 = vld [vmem:[%s261_s11 + $0x10] sm:$0xff]  ;;  %s271_s23 = scalar_lea.vmem %s634_s6, %s492_s8 }
  0x11   : > { %529 = vrsqrt.f32 %v288_v14  ;;  %v503_v23 = vld [vmem:[%s266_s14] sm:$0xff]   ;;  %v297_v26 = vld [vmem:[%s261_s11 + $0x18] sm:$0xff]  ;;  %v299_v30 = vld [vmem:[%s261_s11 + $0x28] sm:$0xff] }
  0x12   : > { %v298_v29 = vld [vmem:[%s261_s11 + $0x20] sm:$0xff]  ;;  %v300_v31 = vld [vmem:[%s261_s11 + $0x30] sm:$0xff]  ;;  %v504_v32 = vunpack.c.l.bf16 %v503_v23  ;;  %v505_v33 = vunpack.c.h.bf16 %v503_v23  ;;  %v518_v34 = vld [vmem:[%s266_s14 + $0x8] sm:$0xff]  }
  0x13   : > { %v301_v35 = vld [vmem:[%s261_s11 + $0x38] sm:$0xff]  ;;  %v519_v40 = vld [vmem:[%s266_s14 + $0x10] sm:$0xff]   ;;  %v508_v47 = vunpack.c.l.bf16 %v518_v34  ;;  %v509_v48 = vunpack.c.h.bf16 %v518_v34 }
  0x14   : > { %v520_v41 = vld [vmem:[%s266_s14 + $0x18] sm:$0xff]   ;;  %v512_v50 = vunpack.c.l.bf16 %v519_v40  ;;  %v513_v51 = vunpack.c.h.bf16 %v519_v40 }
  0x15   : > { %v516_v52 = vunpack.c.l.bf16 %v520_v41  ;;  %v517_v53 = vunpack.c.h.bf16 %v520_v41 }
  0x1b   : > { %v530_v19 = vpop.eup %529 }
  0x1c   : > { %v290_v20 = vmul.f32 %v530_v19, %v287_v17 }
  0x1e   : > { %v292_v27 = vmul.f32 %v290_v20, %v283_v10  ;;  %v306_v28 = vrot.slane %v290_v20, %v305_v18 }
  0x20   : > { %v293_v36 = vsub.f32 %v291_v21, %v292_v27  ;;  %v308_v37 = vmul.f32 %v306_v28, %v294_v22  ;;  %v309_v38 = vmul.f32 %v306_v28, %v295_v24  ;;  %v310_v39 = vmul.f32 %v306_v28, %v296_v25 }
  0x21   : > { %v311_v42 = vmul.f32 %v306_v28, %v297_v26  ;;  %v312_v43 = vmul.f32 %v306_v28, %v298_v29  ;;  %v313_v44 = vmul.f32 %v306_v28, %v299_v30  ;;  %v314_v45 = vmul.f32 %v306_v28, %v300_v31 }
  0x22   : > { %v320_v46 = vrot.slane %v293_v36, %v305_v18  ;;  %v315_v49 = vmul.f32 %v306_v28, %v301_v35 }
  0x24   : > { %v322_v54 = vadd.f32 %v320_v46, %v308_v37  ;;  %v323_v55 = vadd.f32 %v320_v46, %v309_v38  ;;  %v324_v56 = vadd.f32 %v320_v46, %v310_v39  ;;  %v325_v57 = vadd.f32 %v320_v46, %v311_v42 }
  0x25   : > { %v326_v58 = vadd.f32 %v320_v46, %v312_v43  ;;  %v327_v59 = vadd.f32 %v320_v46, %v313_v44  ;;  %v328_v60 = vadd.f32 %v320_v46, %v314_v45  ;;  %v329_v61 = vadd.f32 %v320_v46, %v315_v49 }
  0x26   : > { %v346_v62 = vadd.f32 %v504_v32, %v322_v54  ;;  %v347_v63 = vadd.f32 %v505_v33, %v323_v55  ;;  %v348_v0 = vadd.f32 %v508_v47, %v324_v56  ;;  %v349_v1 = vadd.f32 %v509_v48, %v325_v57 }
  0x27   : > { %v350_v2 = vadd.f32 %v512_v50, %v326_v58  ;;  %v351_v3 = vadd.f32 %v513_v51, %v327_v59  ;;  %v352_v4 = vadd.f32 %v516_v52, %v328_v60  ;;  %v353_v5 = vadd.f32 %v517_v53, %v329_v61 }
  0x28   : > { %v354_v6 = vmax.f32 %v346_v62, 0.0  ;;  %v355_v7 = vmax.f32 %v347_v63, 0.0  ;;  %v356_v8 = vmax.f32 %v348_v0, 0.0  ;;  %v357_v9 = vmax.f32 %v349_v1, 0.0 }
  0x29   : > { %v358_v10 = vmax.f32 %v350_v2, 0.0  ;;  %v359_v11 = vmax.f32 %v351_v3, 0.0  ;;  %v360_v12 = vmax.f32 %v352_v4, 0.0  ;;  %v361_v13 = vmax.f32 %v353_v5, 0.0 }
  0x2a   : > { %v494_v14 = vpack.c.bf16 %v354_v6, %v354_v6  ;;  %v495_v15 = vpack.c.bf16 %v355_v7, %v355_v7  ;;  %v496_v16 = vpack.c.bf16 %v356_v8, %v356_v8  ;;  %v497_v17 = vpack.c.bf16 %v357_v9, %v357_v9 }
  0x2b   : > { %v498_v18 = vpack.c.bf16 %v358_v10, %v358_v10  ;;  %v499_v19 = vpack.c.bf16 %v359_v11, %v359_v11  ;;  %v500_v20 = vpack.c.bf16 %v360_v12, %v360_v12  ;;  %v501_v21 = vpack.c.bf16 %v361_v13, %v361_v13 }
  0x2c   : > { %395 = vst.msk [vmem:[%s271_s23] sm:$0xf] %vm394_vm1, %v494_v14  ;;  %396 = vst.msk [vmem:[%s271_s23 + $0x4] sm:$0xf] %vm394_vm1, %v495_v15 }
  0x2d   : > { %397 = vst.msk [vmem:[%s271_s23 + $0x8] sm:$0xf] %vm394_vm1, %v496_v16  ;;  %398 = vst.msk [vmem:[%s271_s23 + $0xc] sm:$0xf] %vm394_vm1, %v497_v17 }
  0x2e   : > { %399 = vst.msk [vmem:[%s271_s23 + $0x10] sm:$0xf] %vm394_vm1, %v498_v18  ;;  %400 = vst.msk [vmem:[%s271_s23 + $0x14] sm:$0xf] %vm394_vm1, %v499_v19 }
  0x2f   : > { %401 = vst.msk [vmem:[%s271_s23 + $0x18] sm:$0xf] %vm394_vm1, %v500_v20  ;;  %402 = vst.msk [vmem:[%s271_s23 + $0x1c] sm:$0xf] %vm394_vm1, %v501_v21 }
  0x30 PF: > { %s16_s21 = sadd.s32 1, %s537_s21  }
  0x31   : > { %p13_p4 = scmp.ge.s32.totalorder %s16_s21, 4  }
  0x33   :  { %15 = sbr.rel (!%p13_p4) target bundleno = 1 (0x1), region = 77 }

</bundles_post_ra>
